<compile_context>
chip_gen: v5e
topology: v5e:2x2
jax: 0.10.0
libtpu: 0.0.40
codegen_flags: <defaults>
</compile_context>

<pallas_src>
from functools import partial

import jax
import jax.numpy as jnp
from jax import lax
from jax.experimental import pallas as pl
from jax.experimental.pallas import tpu as pltpu

LN_EPS = 1e-5        # torch.nn.LayerNorm default
MSG_EPS = 1e-7       # GENConv message eps


def _round_up(v, m):
    return (v + m - 1) // m * m


def _masked_layernorm(h, gamma, beta, mask, n_real):
    """LayerNorm over the first `n_real` channels of a zero-padded lane axis."""
    inv_n = jnp.float32(1.0 / n_real)
    mu = jnp.sum(h * mask, axis=-1, keepdims=True) * inv_n
    d = (h - mu) * mask
    var = jnp.sum(d * d, axis=-1, keepdims=True) * inv_n
    return d * lax.rsqrt(var + LN_EPS) * gamma + beta


def patchgcn_kernel(x_ref, a_ref, em_ref,                    # (TM,Cp) f32, (TM,Np) bf16, (Np,2Cp) bf16
                    w1_ref, b1_ref, g1_ref, be1_ref,         # MLP layer 1 (+ its LayerNorm)
                    w2_ref, b2_ref,                          # MLP layer 2
                    g2_ref, be2_ref,                         # module LayerNorm
                    o_ref,                                   # (TM, Cp) f32
                    *, c_real, c2_real):
    cp = o_ref.shape[1]                      # padded hidden (multiple of 128)

    # ---- fused softmax-aggregation: one MXU pass over A @ [e | e*m] -----------
    both = jnp.dot(a_ref[...], em_ref[...], preferred_element_type=jnp.float32)  # (tm, 2cp)
    denom = both[:, :cp]
    numer = both[:, cp:]
    inv = pl.reciprocal(jnp.where(denom > 0.0, denom, 1.0), approx=True)
    agg = jnp.where(denom > 0.0, numer * inv, 0.0)           # 0 for nodes with no in-edges

    x_dst = x_ref[...]                                        # destination-node rows of this tile

    # channel-validity masks (padding-aware LayerNorm over the real channel count)
    mask2 = (lax.broadcasted_iota(jnp.int32, (1, 2 * cp), 1) < c2_real).astype(jnp.float32)
    mask1 = (lax.broadcasted_iota(jnp.int32, (1, cp), 1) < c_real).astype(jnp.float32)

    # ---- GENConv: residual with x_dst, then MLP (bf16 MXU, f32 accumulate) ----
    h = agg + x_dst
    h1 = jnp.dot(h.astype(jnp.bfloat16), w1_ref[...],
                 preferred_element_type=jnp.float32) + b1_ref[...]
    h1 = _masked_layernorm(h1, g1_ref[...], be1_ref[...], mask2, c2_real)
    h1 = jnp.maximum(h1, 0.0)
    h2 = jnp.dot(h1.astype(jnp.bfloat16), w2_ref[...],
                 preferred_element_type=jnp.float32) + b2_ref[...]

    # ---- DeepGCNLayer(block='res'): LayerNorm -> GELU -> residual --------------
    hn = _masked_layernorm(h2, g2_ref[...], be2_ref[...], mask1, c_real)
    hg = 0.5 * hn * (1.0 + lax.erf(hn * jnp.float32(0.7071067811865476)))   # exact GELU
    # TODO(synk): dropout(p=0.1) from DeepGCNLayer is identity in eval mode; not applied.
    o_ref[...] = x_dst + hg


def patchgcn_forward(x, edge_index, params, *, tm=128):
    """x: [N, C] float32; edge_index: [2, E] int32 (row 0 = src, row 1 = dst)."""
    N, C = x.shape
    cp = _round_up(C, 128)                 # lane-dense hidden dim
    tm = min(tm, _round_up(N, 8))          # row tile (multiple of 8)
    np_ = _round_up(N, tm)                 # padded node count, divisible by tm
    c2 = 2 * C
    c2p = 2 * cp

    # Glue: dense adjacency with edge multiplicity, A[dst, src]; counts are small
    # integers -> exact in bf16 (halves the dominant HBM/VMEM traffic).
    A = jnp.zeros((np_, np_), jnp.float32).at[edge_index[1], edge_index[0]].add(1.0)
    A = A.astype(jnp.bfloat16)

    xp = jnp.zeros((np_, cp), jnp.float32).at[:N, :C].set(x)

    # GENConv softmax message, computed once (hoisted out of the row-tiled grid):
    # m = relu(x_j)+eps, e = exp(t*(m - mmax)) with a per-channel stabilizer that
    # cancels exactly in the numer/denom ratio inside the kernel.
    t = params["t"].reshape(()).astype(jnp.float32)
    m = jnp.maximum(xp, 0.0) + MSG_EPS
    e = jnp.exp(t * (m - jnp.max(m, axis=0, keepdims=True)))
    em = jnp.concatenate([e, e * m], axis=-1).astype(jnp.bfloat16)       # (np_, 2cp)

    def pad2(a, r, c, dtype=jnp.float32):
        out = jnp.zeros((r, c), dtype)
        return out.at[: a.shape[0], : a.shape[1]].set(a.astype(dtype))

    w1 = pad2(params["w1"], cp, c2p, jnp.bfloat16)
    w2 = pad2(params["w2"], c2p, cp, jnp.bfloat16)
    b1 = pad2(params["b1"], 1, c2p)
    g1 = pad2(params["g1"], 1, c2p)
    be1 = pad2(params["be1"], 1, c2p)
    b2 = pad2(params["b2"], 1, cp)
    g2 = pad2(params["g2"], 1, cp)
    be2 = pad2(params["be2"], 1, cp)

    n_tiles = np_ // tm
    const = lambda i: (0, 0)

    cost = pl.CostEstimate(
        flops=int(2 * np_ * np_ * c2p + 4 * np_ * cp * c2p),
        transcendentals=int(2 * np_ * cp),
        bytes_accessed=int(A.size * 2 + em.size * 2 + xp.size * 4
                           + (w1.size + w2.size) * 2
                           + 4 * (b1.size + g1.size + be1.size + b2.size + g2.size + be2.size)
                           + np_ * cp * 4),
    )

    out = pl.pallas_call(
        partial(patchgcn_kernel, c_real=C, c2_real=c2),
        out_shape=jax.ShapeDtypeStruct((np_, cp), jnp.float32),
        grid_spec=pltpu.PrefetchScalarGridSpec(
            num_scalar_prefetch=0,
            grid=(n_tiles,),
            in_specs=[
                pl.BlockSpec((tm, cp), lambda i: (i, 0)),    # x destination-row tile (f32)
                pl.BlockSpec((tm, np_), lambda i: (i, 0)),   # A destination-row tile (bf16)
                pl.BlockSpec((np_, c2p), const),             # em = [e | e*m] (bf16, resident)
                pl.BlockSpec((cp, c2p), const),              # w1 (bf16)
                pl.BlockSpec((1, c2p), const),               # b1
                pl.BlockSpec((1, c2p), const),               # g1
                pl.BlockSpec((1, c2p), const),               # be1
                pl.BlockSpec((c2p, cp), const),              # w2 (bf16)
                pl.BlockSpec((1, cp), const),                # b2
                pl.BlockSpec((1, cp), const),                # g2
                pl.BlockSpec((1, cp), const),                # be2
            ],
            out_specs=pl.BlockSpec((tm, cp), lambda i: (i, 0)),
        ),
        compiler_params=pltpu.CompilerParams(
            dimension_semantics=("parallel",),
            vmem_limit_bytes=48 * 1024 * 1024,
        ),
        cost_estimate=cost,
    )(xp, A, em, w1, b1, g1, be1, w2, b2, g2, be2)

    return out[:N, :C]


def make_params(key, hidden_dim):
    C = hidden_dim
    ks = jax.random.split(key, 4)
    scale1 = 1.0 / jnp.sqrt(jnp.float32(C))
    scale2 = 1.0 / jnp.sqrt(jnp.float32(2 * C))
    return {
        "t":   jnp.ones((1,), jnp.float32),                                  # learn_t init = 1.0
        "w1":  jax.random.uniform(ks[0], (C, 2 * C), jnp.float32, -scale1, scale1),
        "b1":  jax.random.uniform(ks[1], (1, 2 * C), jnp.float32, -scale1, scale1),
        "g1":  jnp.ones((1, 2 * C), jnp.float32),                            # MLP LayerNorm weight
        "be1": jnp.zeros((1, 2 * C), jnp.float32),                           # MLP LayerNorm bias
        "w2":  jax.random.uniform(ks[2], (2 * C, C), jnp.float32, -scale2, scale2),
        "b2":  jax.random.uniform(ks[3], (1, C), jnp.float32, -scale2, scale2),
        "g2":  jnp.ones((1, C), jnp.float32),                                # module LayerNorm weight
        "be2": jnp.zeros((1, C), jnp.float32),                               # module LayerNorm bias
    }


def reference_forward(x, edge_index, params, *, matmul_dtype=jnp.float32):
    """Plain-JAX reference. matmul_dtype=f32 -> exact semantic spec;
    matmul_dtype=bf16 -> mirrors the kernel's bf16 matmul-operand casts."""
    N, C = x.shape
    f32 = jnp.float32
    A = jnp.zeros((N, N), f32).at[edge_index[1], edge_index[0]].add(1.0)
    t = params["t"][0]
    m = jnp.maximum(x, 0.0) + MSG_EPS
    e = jnp.exp(t * (m - jnp.max(m, axis=0, keepdims=True)))
    em = jnp.concatenate([e, e * m], axis=-1)
    both = jnp.dot(A.astype(matmul_dtype), em.astype(matmul_dtype), preferred_element_type=f32)
    denom, numer = both[:, :C], both[:, C:]
    agg = jnp.where(denom > 0.0, numer / denom, 0.0)
    h = agg + x
    h1 = jnp.dot(h.astype(matmul_dtype), params["w1"].astype(matmul_dtype),
                 preferred_element_type=f32) + params["b1"]
    mu = h1.mean(-1, keepdims=True); var = ((h1 - mu) ** 2).mean(-1, keepdims=True)
    h1 = (h1 - mu) * lax.rsqrt(var + LN_EPS) * params["g1"] + params["be1"]
    h1 = jnp.maximum(h1, 0.0)
    h2 = jnp.dot(h1.astype(matmul_dtype), params["w2"].astype(matmul_dtype),
                 preferred_element_type=f32) + params["b2"]
    mu2 = h2.mean(-1, keepdims=True); var2 = ((h2 - mu2) ** 2).mean(-1, keepdims=True)
    hn = (h2 - mu2) * lax.rsqrt(var2 + LN_EPS) * params["g2"] + params["be2"]
    return x + jax.nn.gelu(hn, approximate=False)


if __name__ == "__main__":
    # Small but tiling-exercising sizes: 256 nodes, hidden_dim=32, 1024 edges
    # -> hidden padded 32->128 lanes, 2 row tiles of 128 on the grid.
    N, C, E = 256, 32, 1024
    key = jax.random.PRNGKey(0)
    kx, ke, kp = jax.random.split(key, 3)

    x = jax.random.normal(kx, (N, C), jnp.float32)
    edge_index = jax.random.randint(ke, (2, E), 0, N, jnp.int32)
    params = make_params(kp, C)

    fwd = jax.jit(patchgcn_forward)
    out = jax.block_until_ready(fwd(x, edge_index, params))
    assert out.shape == (N, C)

    # Implementation check against a reference that applies the same bf16
    # matmul-operand casts (tolerance absorbs the approx-reciprocal and MXU
    # accumulation-order differences only).
    ref_match = reference_forward(x, edge_index, params, matmul_dtype=jnp.bfloat16)
    assert jnp.allclose(out, ref_match, atol=2e-2, rtol=2e-2), "kernel/bf16-reference mismatch"

    # Drift bound vs. the pure-f32 semantic spec (bf16 matmul operands + approx
    # reciprocal cause small, bounded numerical drift).
    ref_f32 = reference_forward(x, edge_index, params, matmul_dtype=jnp.float32)
    assert float(jnp.max(jnp.abs(out - ref_f32))) < 0.1, "bf16 drift vs f32 spec too large"

    print("KERNEL_OK")
</pallas_src>

<mosaic_0001>
module attributes {stable_mosaic.version = 11 : i64} {
  func.func @patchgcn_kernel(%arg0: i32, %arg1: memref<128x128xf32, #tpu.memory_space<vmem>>, %arg2: memref<128x256xbf16, #tpu.memory_space<vmem>>, %arg3: memref<256x256xbf16, #tpu.memory_space<vmem>>, %arg4: memref<128x256xbf16, #tpu.memory_space<vmem>>, %arg5: memref<1x256xf32, #tpu.memory_space<vmem>>, %arg6: memref<1x256xf32, #tpu.memory_space<vmem>>, %arg7: memref<1x256xf32, #tpu.memory_space<vmem>>, %arg8: memref<256x128xbf16, #tpu.memory_space<vmem>>, %arg9: memref<1x128xf32, #tpu.memory_space<vmem>>, %arg10: memref<1x128xf32, #tpu.memory_space<vmem>>, %arg11: memref<1x128xf32, #tpu.memory_space<vmem>>, %arg12: memref<128x128xf32, #tpu.memory_space<vmem>>) attributes {dimension_semantics = [#tpu.dimension_semantics<parallel>], iteration_bounds = array<i64: 2>, scalar_prefetch = 0 : i64, scratch_operands = 0 : i64, tpu.core_type = #tpu.core_type<tc>, window_params = [{transform_indices = @transform_0, window_bounds = array<i64: 128, 128>}, {transform_indices = @transform_1, window_bounds = array<i64: 128, 256>}, {pipeline_mode = #tpu.pipeline_mode<synchronous>, transform_indices = @transform_2, window_bounds = array<i64: 256, 256>}, {pipeline_mode = #tpu.pipeline_mode<synchronous>, transform_indices = @transform_3, window_bounds = array<i64: 128, 256>}, {pipeline_mode = #tpu.pipeline_mode<synchronous>, transform_indices = @transform_4, window_bounds = array<i64: 1, 256>}, {pipeline_mode = #tpu.pipeline_mode<synchronous>, transform_indices = @transform_5, window_bounds = array<i64: 1, 256>}, {pipeline_mode = #tpu.pipeline_mode<synchronous>, transform_indices = @transform_6, window_bounds = array<i64: 1, 256>}, {pipeline_mode = #tpu.pipeline_mode<synchronous>, transform_indices = @transform_7, window_bounds = array<i64: 256, 128>}, {pipeline_mode = #tpu.pipeline_mode<synchronous>, transform_indices = @transform_8, window_bounds = array<i64: 1, 128>}, {pipeline_mode = #tpu.pipeline_mode<synchronous>, transform_indices = @transform_9, window_bounds = array<i64: 1, 128>}, {pipeline_mode = #tpu.pipeline_mode<synchronous>, transform_indices = @transform_10, window_bounds = array<i64: 1, 128>}, {transform_indices = @transform_11, window_bounds = array<i64: 128, 128>}]} {
    %c0 = arith.constant 0 : index
    %c0_0 = arith.constant 0 : index
    %0 = vector.load %arg2[%c0, %c0_0] : memref<128x256xbf16, #tpu.memory_space<vmem>>, vector<128x256xbf16>
    %c0_1 = arith.constant 0 : index
    %c0_2 = arith.constant 0 : index
    %1 = vector.load %arg3[%c0_1, %c0_2] : memref<256x256xbf16, #tpu.memory_space<vmem>>, vector<256x256xbf16>
    %cst = arith.constant dense<0.000000e+00> : vector<128x256xf32>
    %2 = tpu.matmul %0, %1, %cst {dimension_numbers = #tpu.dot_dimension_numbers<[1], [0], [0], [1], [0, 0, 1, 1], [], []>} : vector<128x256xbf16>, vector<256x256xbf16>, vector<128x256xf32> -> vector<128x256xf32>
    %3 = vector.extract_strided_slice %2 {offsets = [0, 0], sizes = [128, 128], strides = [1, 1]} : vector<128x256xf32> to vector<128x128xf32>
    %4 = vector.extract_strided_slice %2 {offsets = [0, 128], sizes = [128, 128], strides = [1, 1]} : vector<128x256xf32> to vector<128x128xf32>
    %cst_3 = arith.constant 0.000000e+00 : f32
    %5 = vector.broadcast %cst_3 : f32 to vector<128x128xf32>
    %6 = arith.cmpf ogt, %3, %5 : vector<128x128xf32>
    %cst_4 = arith.constant 1.000000e+00 : f32
    %7 = vector.broadcast %cst_4 : f32 to vector<128x128xf32>
    %8 = arith.select %6, %3, %7 : vector<128x128xi1>, vector<128x128xf32>
    %9 = tpu.reciprocal %8 {approx = true} : vector<128x128xf32> -> vector<128x128xf32>
    %cst_5 = arith.constant 0.000000e+00 : f32
    %10 = vector.broadcast %cst_5 : f32 to vector<128x128xf32>
    %11 = arith.cmpf ogt, %3, %10 : vector<128x128xf32>
    %12 = arith.mulf %4, %9 : vector<128x128xf32>
    %cst_6 = arith.constant 0.000000e+00 : f32
    %13 = vector.broadcast %cst_6 : f32 to vector<128x128xf32>
    %14 = arith.select %11, %12, %13 : vector<128x128xi1>, vector<128x128xf32>
    %c0_7 = arith.constant 0 : index
    %c0_8 = arith.constant 0 : index
    %15 = vector.load %arg1[%c0_7, %c0_8] : memref<128x128xf32, #tpu.memory_space<vmem>>, vector<128x128xf32>
    %16 = tpu.iota {dimensions = array<i32: 1>} : vector<1x256xi32>
    %c64_i32 = arith.constant 64 : i32
    %17 = vector.broadcast %c64_i32 : i32 to vector<1x256xi32>
    %18 = arith.cmpi slt, %16, %17 : vector<1x256xi32>
    %19 = arith.extui %18 : vector<1x256xi1> to vector<1x256xi32>
    %20 = arith.sitofp %19 : vector<1x256xi32> to vector<1x256xf32>
    %21 = tpu.iota {dimensions = array<i32: 1>} : vector<1x128xi32>
    %c32_i32 = arith.constant 32 : i32
    %22 = vector.broadcast %c32_i32 : i32 to vector<1x128xi32>
    %23 = arith.cmpi slt, %21, %22 : vector<1x128xi32>
    %24 = arith.extui %23 : vector<1x128xi1> to vector<1x128xi32>
    %25 = arith.sitofp %24 : vector<1x128xi32> to vector<1x128xf32>
    %26 = arith.addf %14, %15 : vector<128x128xf32>
    %27 = arith.truncf %26 : vector<128x128xf32> to vector<128x128xbf16>
    %c0_9 = arith.constant 0 : index
    %c0_10 = arith.constant 0 : index
    %28 = vector.load %arg4[%c0_9, %c0_10] : memref<128x256xbf16, #tpu.memory_space<vmem>>, vector<128x256xbf16>
    %cst_11 = arith.constant dense<0.000000e+00> : vector<128x256xf32>
    %29 = tpu.matmul %27, %28, %cst_11 {dimension_numbers = #tpu.dot_dimension_numbers<[1], [0], [0], [1], [0, 0, 1, 1], [], []>} : vector<128x128xbf16>, vector<128x256xbf16>, vector<128x256xf32> -> vector<128x256xf32>
    %c0_12 = arith.constant 0 : index
    %c0_13 = arith.constant 0 : index
    %30 = vector.load %arg5[%c0_12, %c0_13] : memref<1x256xf32, #tpu.memory_space<vmem>>, vector<1x256xf32>
    %31 = vector.broadcast %30 : vector<1x256xf32> to vector<128x256xf32>
    %32 = arith.addf %29, %31 : vector<128x256xf32>
    %c0_14 = arith.constant 0 : index
    %c0_15 = arith.constant 0 : index
    %33 = vector.load %arg6[%c0_14, %c0_15] : memref<1x256xf32, #tpu.memory_space<vmem>>, vector<1x256xf32>
    %c0_16 = arith.constant 0 : index
    %c0_17 = arith.constant 0 : index
    %34 = vector.load %arg7[%c0_16, %c0_17] : memref<1x256xf32, #tpu.memory_space<vmem>>, vector<1x256xf32>
    %35 = vector.broadcast %20 : vector<1x256xf32> to vector<128x256xf32>
    %36 = arith.mulf %32, %35 : vector<128x256xf32>
    %cst_18 = arith.constant dense<0.000000e+00> : vector<128xf32>
    %37 = vector.multi_reduction <add>, %36, %cst_18 [1] : vector<128x256xf32> to vector<128xf32>
    %38 = vector.shape_cast %37 : vector<128xf32> to vector<128x1xf32>
    %cst_19 = arith.constant 1.562500e-02 : f32
    %39 = vector.broadcast %cst_19 : f32 to vector<128x1xf32>
    %40 = arith.mulf %38, %39 : vector<128x1xf32>
    %41 = vector.broadcast %40 : vector<128x1xf32> to vector<128x256xf32>
    %42 = arith.subf %32, %41 : vector<128x256xf32>
    %43 = vector.broadcast %20 : vector<1x256xf32> to vector<128x256xf32>
    %44 = arith.mulf %42, %43 : vector<128x256xf32>
    %45 = arith.mulf %44, %44 : vector<128x256xf32>
    %cst_20 = arith.constant dense<0.000000e+00> : vector<128xf32>
    %46 = vector.multi_reduction <add>, %45, %cst_20 [1] : vector<128x256xf32> to vector<128xf32>
    %47 = vector.shape_cast %46 : vector<128xf32> to vector<128x1xf32>
    %cst_21 = arith.constant 1.562500e-02 : f32
    %48 = vector.broadcast %cst_21 : f32 to vector<128x1xf32>
    %49 = arith.mulf %47, %48 : vector<128x1xf32>
    %cst_22 = arith.constant 9.99999974E-6 : f32
    %50 = vector.broadcast %cst_22 : f32 to vector<128x1xf32>
    %51 = arith.addf %49, %50 : vector<128x1xf32>
    %52 = math.rsqrt %51 : vector<128x1xf32>
    %53 = vector.broadcast %52 : vector<128x1xf32> to vector<128x256xf32>
    %54 = arith.mulf %44, %53 : vector<128x256xf32>
    %55 = vector.broadcast %33 : vector<1x256xf32> to vector<128x256xf32>
    %56 = arith.mulf %54, %55 : vector<128x256xf32>
    %57 = vector.broadcast %34 : vector<1x256xf32> to vector<128x256xf32>
    %58 = arith.addf %56, %57 : vector<128x256xf32>
    %cst_23 = arith.constant 0.000000e+00 : f32
    %59 = vector.broadcast %cst_23 : f32 to vector<128x256xf32>
    %60 = arith.maximumf %58, %59 : vector<128x256xf32>
    %61 = arith.truncf %60 : vector<128x256xf32> to vector<128x256xbf16>
    %c0_24 = arith.constant 0 : index
    %c0_25 = arith.constant 0 : index
    %62 = vector.load %arg8[%c0_24, %c0_25] : memref<256x128xbf16, #tpu.memory_space<vmem>>, vector<256x128xbf16>
    %cst_26 = arith.constant dense<0.000000e+00> : vector<128x128xf32>
    %63 = tpu.matmul %61, %62, %cst_26 {dimension_numbers = #tpu.dot_dimension_numbers<[1], [0], [0], [1], [0, 0, 1, 1], [], []>} : vector<128x256xbf16>, vector<256x128xbf16>, vector<128x128xf32> -> vector<128x128xf32>
    %c0_27 = arith.constant 0 : index
    %c0_28 = arith.constant 0 : index
    %64 = vector.load %arg9[%c0_27, %c0_28] : memref<1x128xf32, #tpu.memory_space<vmem>>, vector<1x128xf32>
    %65 = vector.broadcast %64 : vector<1x128xf32> to vector<128x128xf32>
    %66 = arith.addf %63, %65 : vector<128x128xf32>
    %c0_29 = arith.constant 0 : index
    %c0_30 = arith.constant 0 : index
    %67 = vector.load %arg10[%c0_29, %c0_30] : memref<1x128xf32, #tpu.memory_space<vmem>>, vector<1x128xf32>
    %c0_31 = arith.constant 0 : index
    %c0_32 = arith.constant 0 : index
    %68 = vector.load %arg11[%c0_31, %c0_32] : memref<1x128xf32, #tpu.memory_space<vmem>>, vector<1x128xf32>
    %69 = vector.broadcast %25 : vector<1x128xf32> to vector<128x128xf32>
    %70 = arith.mulf %66, %69 : vector<128x128xf32>
    %cst_33 = arith.constant dense<0.000000e+00> : vector<128xf32>
    %71 = vector.multi_reduction <add>, %70, %cst_33 [1] : vector<128x128xf32> to vector<128xf32>
    %72 = vector.shape_cast %71 : vector<128xf32> to vector<128x1xf32>
    %cst_34 = arith.constant 3.125000e-02 : f32
    %73 = vector.broadcast %cst_34 : f32 to vector<128x1xf32>
    %74 = arith.mulf %72, %73 : vector<128x1xf32>
    %75 = vector.broadcast %74 : vector<128x1xf32> to vector<128x128xf32>
    %76 = arith.subf %66, %75 : vector<128x128xf32>
    %77 = vector.broadcast %25 : vector<1x128xf32> to vector<128x128xf32>
    %78 = arith.mulf %76, %77 : vector<128x128xf32>
    %79 = arith.mulf %78, %78 : vector<128x128xf32>
    %cst_35 = arith.constant dense<0.000000e+00> : vector<128xf32>
    %80 = vector.multi_reduction <add>, %79, %cst_35 [1] : vector<128x128xf32> to vector<128xf32>
    %81 = vector.shape_cast %80 : vector<128xf32> to vector<128x1xf32>
    %cst_36 = arith.constant 3.125000e-02 : f32
    %82 = vector.broadcast %cst_36 : f32 to vector<128x1xf32>
    %83 = arith.mulf %81, %82 : vector<128x1xf32>
    %cst_37 = arith.constant 9.99999974E-6 : f32
    %84 = vector.broadcast %cst_37 : f32 to vector<128x1xf32>
    %85 = arith.addf %83, %84 : vector<128x1xf32>
    %86 = math.rsqrt %85 : vector<128x1xf32>
    %87 = vector.broadcast %86 : vector<128x1xf32> to vector<128x128xf32>
    %88 = arith.mulf %78, %87 : vector<128x128xf32>
    %89 = vector.broadcast %67 : vector<1x128xf32> to vector<128x128xf32>
    %90 = arith.mulf %88, %89 : vector<128x128xf32>
    %91 = vector.broadcast %68 : vector<1x128xf32> to vector<128x128xf32>
    %92 = arith.addf %90, %91 : vector<128x128xf32>
    %cst_38 = arith.constant 5.000000e-01 : f32
    %93 = vector.broadcast %cst_38 : f32 to vector<128x128xf32>
    %94 = arith.mulf %93, %92 : vector<128x128xf32>
    %cst_39 = arith.constant 0.707106769 : f32
    %95 = vector.broadcast %cst_39 : f32 to vector<128x128xf32>
    %96 = arith.mulf %92, %95 : vector<128x128xf32>
    %97 = math.erf %96 : vector<128x128xf32>
    %cst_40 = arith.constant 1.000000e+00 : f32
    %98 = vector.broadcast %cst_40 : f32 to vector<128x128xf32>
    %99 = arith.addf %98, %97 : vector<128x128xf32>
    %100 = arith.mulf %94, %99 : vector<128x128xf32>
    %101 = arith.addf %15, %100 : vector<128x128xf32>
    %c0_41 = arith.constant 0 : index
    %c0_42 = arith.constant 0 : index
    %102 = vector.load %arg12[%c0_41, %c0_42] : memref<128x128xf32, #tpu.memory_space<vmem>>, vector<128x128xf32>
    tpu.vector_store %arg12[%c0_41, %c0_42], %101 {strides = array<i32>} : memref<128x128xf32, #tpu.memory_space<vmem>>, vector<128x128xf32>,
    return
  }
  func.func @transform_0(%arg0: i32) -> (i32, i32) {
    %c0_i32 = arith.constant 0 : i32
    %c0_i32_0 = arith.constant 0 : i32
    return %arg0, %c0_i32 : i32, i32
  }
  func.func @transform_1(%arg0: i32) -> (i32, i32) {
    %c0_i32 = arith.constant 0 : i32
    %c0_i32_0 = arith.constant 0 : i32
    return %arg0, %c0_i32 : i32, i32
  }
  func.func @transform_2(%arg0: i32) -> (i32, i32) {
    %c0_i32 = arith.constant 0 : i32
    %c0_i32_0 = arith.constant 0 : i32
    %c0_i32_1 = arith.constant 0 : i32
    return %c0_i32, %c0_i32_0 : i32, i32
  }
  func.func @transform_3(%arg0: i32) -> (i32, i32) {
    %c0_i32 = arith.constant 0 : i32
    %c0_i32_0 = arith.constant 0 : i32
    %c0_i32_1 = arith.constant 0 : i32
    return %c0_i32, %c0_i32_0 : i32, i32
  }
  func.func @transform_4(%arg0: i32) -> (i32, i32) {
    %c0_i32 = arith.constant 0 : i32
    %c0_i32_0 = arith.constant 0 : i32
    %c0_i32_1 = arith.constant 0 : i32
    return %c0_i32, %c0_i32_0 : i32, i32
  }
  func.func @transform_5(%arg0: i32) -> (i32, i32) {
    %c0_i32 = arith.constant 0 : i32
    %c0_i32_0 = arith.constant 0 : i32
    %c0_i32_1 = arith.constant 0 : i32
    return %c0_i32, %c0_i32_0 : i32, i32
  }
  func.func @transform_6(%arg0: i32) -> (i32, i32) {
    %c0_i32 = arith.constant 0 : i32
    %c0_i32_0 = arith.constant 0 : i32
    %c0_i32_1 = arith.constant 0 : i32
    return %c0_i32, %c0_i32_0 : i32, i32
  }
  func.func @transform_7(%arg0: i32) -> (i32, i32) {
    %c0_i32 = arith.constant 0 : i32
    %c0_i32_0 = arith.constant 0 : i32
    %c0_i32_1 = arith.constant 0 : i32
    return %c0_i32, %c0_i32_0 : i32, i32
  }
  func.func @transform_8(%arg0: i32) -> (i32, i32) {
    %c0_i32 = arith.constant 0 : i32
    %c0_i32_0 = arith.constant 0 : i32
    %c0_i32_1 = arith.constant 0 : i32
    return %c0_i32, %c0_i32_0 : i32, i32
  }
  func.func @transform_9(%arg0: i32) -> (i32, i32) {
    %c0_i32 = arith.constant 0 : i32
    %c0_i32_0 = arith.constant 0 : i32
    %c0_i32_1 = arith.constant 0 : i32
    return %c0_i32, %c0_i32_0 : i32, i32
  }
  func.func @transform_10(%arg0: i32) -> (i32, i32) {
    %c0_i32 = arith.constant 0 : i32
    %c0_i32_0 = arith.constant 0 : i32
    %c0_i32_1 = arith.constant 0 : i32
    return %c0_i32, %c0_i32_0 : i32, i32
  }
  func.func @transform_11(%arg0: i32) -> (i32, i32) {
    %c0_i32 = arith.constant 0 : i32
    %c0_i32_0 = arith.constant 0 : i32
    return %arg0, %c0_i32 : i32, i32
  }
}

</mosaic_0001>

<bundles_post_ra>
// kernel: patchgcn_forward.1
= control target key start
LH: loop header
LB: loop body
LE: loop exit
PB: predicated region body
PF: predicated region fallthrough
CT: control target
= control target key end

     0   :  { %s3905_s17 = smov 0   ;;  %s5702_s0 = inlined_call_operand.vmem [shape: f32[256,128], index: 0, kind: input, shape index: {}]   ;;  %s5703_s1 = inlined_call_operand.vmem [shape: bf16[256,256], index: 1, kind: input, shape index: {}]   ;;  %s5704_s2 = inlined_call_operand.vmem [shape: bf16[256,256], index: 2, kind: input, shape index: {}]   ;;  %s5705_s3 = inlined_call_operand.vmem [shape: bf16[128,256], index: 3, kind: input, shape index: {}]   ;;  %s5706_s4 = inlined_call_operand.vmem [shape: f32[1,256], index: 4, kind: input, shape index: {}]   ;;  %s5707_s5 = inlined_call_operand.vmem [shape: f32[1,256], index: 5, kind: input, shape index: {}]   ;;  %s5708_s6 = inlined_call_operand.vmem [shape: f32[1,256], index: 6, kind: input, shape index: {}]   ;;  %s5709_s7 = inlined_call_operand.vmem [shape: bf16[256,128], index: 7, kind: input, shape index: {}]   ;;  %s5710_s8 = inlined_call_operand.vmem [shape: f32[1,128], index: 8, kind: input, shape index: {}]   ;;  %s5711_s9 = inlined_call_operand.vmem [shape: f32[1,128], index: 9, kind: input, shape index: {}]   ;;  %s5712_s10 = inlined_call_operand.vmem [shape: f32[1,128], index: 10, kind: input, shape index: {}]   ;;  %s5713_s11 = inlined_call_operand.vmem [shape: f32[256,128], index: 11, kind: output, shape index: {}]  }
   0x1 LB: > { %s3245_s18 = sadd.s32 4294967295, %s3842_s17   ;;  %p3249_p0 = scmp.ge.s32.totalorder %s3842_s17, 1  ;;  %s3842_s17 = sphi %s3905_s17, %s21_s17  }
   0x2   : > { %p350_p1 = scmp.lt.s32.totalorder %s3842_s17, 3 }
   0x4   : > { %p351_p2 = pnand %p3249_p0, %p350_p1 }
   0x5   : > { %s3250_s29 = sshll.u32 (!%p351_p2), %s3245_s18, 4 }
   0x6   : > { %354 = sbr.rel (%p351_p2) target bundleno = 1317 (0x525), region = 64  ;;  %p397_p3 = scmp.lt.s32.totalorder (!%p351_p2), %s3250_s29, 31 }
   0xb   : > { %v3379_v0 = vld [vmem:[%s5704_s2 + $0x70] sm:$0xf]  ;;  %v3629_v1 = vld [vmem:[%s5704_s2 + $0x74] sm:$0xf0]  ;;  %v3628_v5 = vld [vmem:[%s5704_s2 + $0x74] sm:$0xf] }
   0xc   : > { %v3443_v2 = vld [vmem:[%s5704_s2 + $0xf0] sm:$0xf]  ;;  %v3380_v3 = vor.u32 %v3629_v1, %v3379_v0  ;;  %v3645_v4 = vld [vmem:[%s5704_s2 + $0xf4] sm:$0xf0]  ;;  %v3381_v6 = vld [vmem:[%s5704_s2 + $0x78] sm:$0xf0] }
   0xd   : > { %v3444_v7 = vor.u32 %v3645_v4, %v3443_v2  ;;  %v3384_v8 = vor.u32 %v3628_v5, %v3381_v6  ;;  %v3644_v9 = vld [vmem:[%s5704_s2 + $0xf4] sm:$0xf]  ;;  %v3445_v10 = vld [vmem:[%s5704_s2 + $0xf8] sm:$0xf0]  ;;  %v3371_v11 = vld [vmem:[%s5704_s2 + $0x60] sm:$0xf] }
   0xe   : > { %703 = vmatpush.bf16.msra.mxu0 %v3380_v3  ;;  %v3448_v12 = vor.u32 %v3644_v9, %v3445_v10  ;;  %v3627_v13 = vld [vmem:[%s5704_s2 + $0x64] sm:$0xf0]  ;;  %v3435_v14 = vld [vmem:[%s5704_s2 + $0xe0] sm:$0xf]  ;;  %v3626_v18 = vld [vmem:[%s5704_s2 + $0x64] sm:$0xf] }
   0xf   : > { %v3643_v15 = vld [vmem:[%s5704_s2 + $0xe4] sm:$0xf0]  ;;  %752 = vmatpush.bf16.msra.mxu1 %v3444_v7  ;;  %801 = vmatpush.bf16.msra.mxu2 %v3384_v8  ;;  %v3372_v16 = vor.u32 %v3627_v13, %v3371_v11  ;;  %v3373_v19 = vld [vmem:[%s5704_s2 + $0x68] sm:$0xf0]  ;;  %v3642_v20 = vld [vmem:[%s5704_s2 + $0xe4] sm:$0xf] }
  0x10   : > { %v3436_v17 = vor.u32 %v3643_v15, %v3435_v14  ;;  %850 = vmatpush.bf16.msra.mxu3 %v3448_v12  ;;  %v3376_v21 = vor.u32 %v3626_v18, %v3373_v19  ;;  %v3437_v22 = vld [vmem:[%s5704_s2 + $0xe8] sm:$0xf0]  ;;  %v3363_v23 = vld [vmem:[%s5704_s2 + $0x50] sm:$0xf]  ;;  %v3625_v24 = vld [vmem:[%s5704_s2 + $0x54] sm:$0xf0] }
  0x11   : > { %v3440_v25 = vor.u32 %v3642_v20, %v3437_v22  ;;  %v3427_v26 = vld [vmem:[%s5704_s2 + $0xd0] sm:$0xf]  ;;  %v3641_v27 = vld [vmem:[%s5704_s2 + $0xd4] sm:$0xf0]  ;;  %v3624_v28 = vld [vmem:[%s5704_s2 + $0x54] sm:$0xf]  ;;  %v3364_v29 = vor.u32 %v3625_v24, %v3363_v23 }
  0x12   : > { %704 = vmatpush.bf16.msra.mxu0 %v3372_v16  ;;  %v3365_v30 = vld [vmem:[%s5704_s2 + $0x58] sm:$0xf0]  ;;  %v3640_v31 = vld [vmem:[%s5704_s2 + $0xd4] sm:$0xf]  ;;  %v3428_v33 = vor.u32 %v3641_v27, %v3427_v26  ;;  %v3355_v35 = vld [vmem:[%s5704_s2 + $0x40] sm:$0xf] }
  0x13   : > { %v3429_v32 = vld [vmem:[%s5704_s2 + $0xd8] sm:$0xf0]  ;;  %753 = vmatpush.bf16.msra.mxu1 %v3436_v17  ;;  %802 = vmatpush.bf16.msra.mxu2 %v3376_v21  ;;  %v3368_v34 = vor.u32 %v3624_v28, %v3365_v30  ;;  %v3623_v36 = vld [vmem:[%s5704_s2 + $0x44] sm:$0xf0]  ;;  %v3419_v37 = vld [vmem:[%s5704_s2 + $0xc0] sm:$0xf] }
  0x14   : > { %851 = vmatpush.bf16.msra.mxu3 %v3440_v25  ;;  %v3432_v38 = vor.u32 %v3640_v31, %v3429_v32  ;;  %v3639_v39 = vld [vmem:[%s5704_s2 + $0xc4] sm:$0xf0]  ;;  %v3622_v40 = vld [vmem:[%s5704_s2 + $0x44] sm:$0xf]  ;;  %v3357_v41 = vld [vmem:[%s5704_s2 + $0x48] sm:$0xf0]  ;;  %v3356_v44 = vor.u32 %v3623_v36, %v3355_v35 }
  0x15   : > { %v3638_v42 = vld [vmem:[%s5704_s2 + $0xc4] sm:$0xf]  ;;  %v3421_v43 = vld [vmem:[%s5704_s2 + $0xc8] sm:$0xf0]  ;;  %v3420_v45 = vor.u32 %v3639_v39, %v3419_v37  ;;  %v3360_v46 = vor.u32 %v3622_v40, %v3357_v41  ;;  %v3347_v47 = vld [vmem:[%s5704_s2 + $0x30] sm:$0xf] }
  0x16   : > { %705 = vmatpush.bf16.msra.mxu0 %v3364_v29  ;;  %v3621_v48 = vld [vmem:[%s5704_s2 + $0x34] sm:$0xf0]  ;;  %v3411_v49 = vld [vmem:[%s5704_s2 + $0xb0] sm:$0xf]  ;;  %v3424_v50 = vor.u32 %v3638_v42, %v3421_v43  ;;  %v3620_v52 = vld [vmem:[%s5704_s2 + $0x34] sm:$0xf] }
  0x17   : > { %754 = vmatpush.bf16.msra.mxu1 %v3428_v33  ;;  %803 = vmatpush.bf16.msra.mxu2 %v3368_v34  ;;  %v3637_v51 = vld [vmem:[%s5704_s2 + $0xb4] sm:$0xf0]  ;;  %v3349_v53 = vld [vmem:[%s5704_s2 + $0x38] sm:$0xf0]  ;;  %v3636_v54 = vld [vmem:[%s5704_s2 + $0xb4] sm:$0xf]  ;;  %v3348_v56 = vor.u32 %v3621_v48, %v3347_v47 }
  0x18   : > { %852 = vmatpush.bf16.msra.mxu3 %v3432_v38  ;;  %v3413_v55 = vld [vmem:[%s5704_s2 + $0xb8] sm:$0xf0]  ;;  %v3412_v57 = vor.u32 %v3637_v51, %v3411_v49  ;;  %v3352_v58 = vor.u32 %v3620_v52, %v3349_v53  ;;  %v3339_v59 = vld [vmem:[%s5704_s2 + $0x20] sm:$0xf]  ;;  %v3619_v60 = vld [vmem:[%s5704_s2 + $0x24] sm:$0xf0] }
  0x19   : > { %v3403_v61 = vld [vmem:[%s5704_s2 + $0xa0] sm:$0xf]  ;;  %v3416_v62 = vor.u32 %v3636_v54, %v3413_v55  ;;  %v3635_v63 = vld [vmem:[%s5704_s2 + $0xa4] sm:$0xf0]  ;;  %v3618_v0 = vld [vmem:[%s5704_s2 + $0x24] sm:$0xf]  ;;  %v3340_v4 = vor.u32 %v3619_v60, %v3339_v59 }
  0x1a   : > { %706 = vmatpush.bf16.msra.mxu0 %v3356_v44  ;;  %v3341_v1 = vld [vmem:[%s5704_s2 + $0x28] sm:$0xf0]  ;;  %v3634_v2 = vld [vmem:[%s5704_s2 + $0xa4] sm:$0xf]  ;;  %v3331_v5 = vld [vmem:[%s5704_s2 + $0x10] sm:$0xf]  ;;  %v3404_v8 = vor.u32 %v3635_v63, %v3403_v61 }
  0x1b   : > { %755 = vmatpush.bf16.msra.mxu1 %v3420_v45  ;;  %804 = vmatpush.bf16.msra.mxu2 %v3360_v46  ;;  %v3405_v3 = vld [vmem:[%s5704_s2 + $0xa8] sm:$0xf0]  ;;  %v3617_v6 = vld [vmem:[%s5704_s2 + $0x14] sm:$0xf0]  ;;  %v3395_v7 = vld [vmem:[%s5704_s2 + $0x90] sm:$0xf]  ;;  %v3344_v9 = vor.u32 %v3618_v0, %v3341_v1 }
  0x1c   : > { %853 = vmatpush.bf16.msra.mxu3 %v3424_v50  ;;  %v3633_v10 = vld [vmem:[%s5704_s2 + $0x94] sm:$0xf0]  ;;  %v3616_v11 = vld [vmem:[%s5704_s2 + $0x14] sm:$0xf]  ;;  %v3333_v12 = vld [vmem:[%s5704_s2 + $0x18] sm:$0xf0]  ;;  %v3408_v13 = vor.u32 %v3634_v2, %v3405_v3  ;;  %v3332_v18 = vor.u32 %v3617_v6, %v3331_v5 }
  0x1d   : > { %v3632_v14 = vld [vmem:[%s5704_s2 + $0x94] sm:$0xf]  ;;  %v3397_v15 = vld [vmem:[%s5704_s2 + $0x98] sm:$0xf0]  ;;  %v3323_v16 = vld [vmem:[%s5704_s2] sm:$0xf]  ;;  %v3396_v21 = vor.u32 %v3633_v10, %v3395_v7  ;;  %v3336_v22 = vor.u32 %v3616_v11, %v3333_v12 }
  0x1e   : > { %707 = vmatpush.bf16.msra.mxu0 %v3348_v56  ;;  %v3615_v17 = vld [vmem:[%s5704_s2 + $0x4] sm:$0xf0]  ;;  %v3387_v19 = vld [vmem:[%s5704_s2 + $0x80] sm:$0xf]  ;;  %v3614_v23 = vld [vmem:[%s5704_s2 + $0x4] sm:$0xf]  ;;  %v3400_v24 = vor.u32 %v3632_v14, %v3397_v15 }
  0x1f   : > { %756 = vmatpush.bf16.msra.mxu1 %v3412_v57  ;;  %805 = vmatpush.bf16.msra.mxu2 %v3352_v58  ;;  %v3631_v20 = vld [vmem:[%s5704_s2 + $0x84] sm:$0xf0]  ;;  %s5725_s29 = smov (!%p397_p3, %s3250_s29), 31  ;;  %v3325_v25 = vld [vmem:[%s5704_s2 + $0x8] sm:$0xf0]  ;;  %v3324_v30 = vor.u32 %v3615_v17, %v3323_v16 }
  0x20   : > { %854 = vmatpush.bf16.msra.mxu3 %v3416_v62  ;;  %v3630_v26 = vld [vmem:[%s5704_s2 + $0x84] sm:$0xf]  ;;  %v3389_v27 = vld [vmem:[%s5704_s2 + $0x88] sm:$0xf0]  ;;  %s4107_s28 = sshll.u32 %s5725_s29, 3  ;;  %v3388_v33 = vor.u32 %v3631_v20, %v3387_v19  ;;  %v3328_v34 = vor.u32 %v3614_v23, %v3325_v25 }
  0x21   : > { %v3509_v28 = vld [vmem:[%s5705_s3 + $0x70] sm:$0xf]  ;;  %v3661_v29 = vld [vmem:[%s5705_s3 + $0x74] sm:$0xf0]  ;;  %s4119_s19 = scalar_lea.vmem %s5703_s1, %s4107_s28  ;;  %v3660_v31 = vld [vmem:[%s5705_s3 + $0x74] sm:$0xf]  ;;  %v3392_v38 = vor.u32 %v3630_v26, %v3389_v27  ;;  %s4249_s14 = scalar_lea.vmem %s5702_s0, %s4107_s28 }
  0x22   : > { %708 = vmatpush.bf16.msra.mxu0 %v3340_v4  ;;  %v3511_v32 = vld [vmem:[%s5705_s3 + $0x78] sm:$0xf0]  ;;  %v3259_v35 = vld [vmem:[%s4119_s19] sm:$0xf]  ;;  %v3599_v36 = vld [vmem:[%s4119_s19 + $0x4] sm:$0xf0]  ;;  %v3510_v40 = vor.u32 %v3661_v29, %v3509_v28 }
  0x23   : > { %757 = vmatpush.bf16.msra.mxu1 %v3404_v8  ;;  %806 = vmatpush.bf16.msra.mxu2 %v3344_v9  ;;  %v3598_v37 = vld [vmem:[%s4119_s19 + $0x4] sm:$0xf]  ;;  %v3261_v39 = vld [vmem:[%s4119_s19 + $0x8] sm:$0xf0]  ;;  %v3260_v41 = vor.u32 %v3599_v36, %v3259_v35  ;;  %v3514_v42 = vor.u32 %v3660_v31, %v3511_v32  ;;  %v3501_v44 = vld [vmem:[%s5705_s3 + $0x60] sm:$0xf] }
  0x24   : > { %855 = vmatpush.bf16.msra.mxu3 %v3408_v13  ;;  %v3264_v43 = vor.u32 %v3598_v37, %v3261_v39  ;;  %v3659_v45 = vld [vmem:[%s5705_s3 + $0x64] sm:$0xf0]  ;;  %v3658_v46 = vld [vmem:[%s5705_s3 + $0x64] sm:$0xf]  ;;  %v3503_v48 = vld [vmem:[%s5705_s3 + $0x68] sm:$0xf0] }
  0x25   : > { %v3502_v47 = vor.u32 %v3659_v45, %v3501_v44  ;;  %v3506_v49 = vor.u32 %v3658_v46, %v3503_v48  ;;  %v3267_v50 = vld [vmem:[%s4119_s19 + $0x10] sm:$0xf]  ;;  %v3601_v51 = vld [vmem:[%s4119_s19 + $0x14] sm:$0xf0]  ;;  %v3600_v52 = vld [vmem:[%s4119_s19 + $0x14] sm:$0xf] }
  0x26   : > { %709 = vmatpush.bf16.msra.mxu0 %v3332_v18  ;;  %v3269_v53 = vld [vmem:[%s4119_s19 + $0x18] sm:$0xf0]  ;;  %v3268_v54 = vor.u32 %v3601_v51, %v3267_v50  ;;  %v3493_v56 = vld [vmem:[%s5705_s3 + $0x50] sm:$0xf]  ;;  %v3657_v57 = vld [vmem:[%s5705_s3 + $0x54] sm:$0xf0] }
  0x27   : > { %758 = vmatpush.bf16.msra.mxu1 %v3396_v21  ;;  %807 = vmatpush.bf16.msra.mxu2 %v3336_v22  ;;  %v3272_v55 = vor.u32 %v3600_v52, %v3269_v53  ;;  %v3656_v58 = vld [vmem:[%s5705_s3 + $0x54] sm:$0xf]  ;;  %v3494_v59 = vor.u32 %v3657_v57, %v3493_v56  ;;  %v3495_v60 = vld [vmem:[%s5705_s3 + $0x58] sm:$0xf0]  ;;  %v3275_v62 = vld [vmem:[%s4119_s19 + $0x20] sm:$0xf] }
  0x28   : > { %856 = vmatpush.bf16.msra.mxu3 %v3400_v24  ;;  %v3498_v61 = vor.u32 %v3656_v58, %v3495_v60  ;;  %v3603_v63 = vld [vmem:[%s4119_s19 + $0x24] sm:$0xf0]  ;;  %v3602_v0 = vld [vmem:[%s4119_s19 + $0x24] sm:$0xf]  ;;  %v3277_v1 = vld [vmem:[%s4119_s19 + $0x28] sm:$0xf0] }
  0x29   : > { %v3276_v2 = vor.u32 %v3603_v63, %v3275_v62  ;;  %v3280_v3 = vor.u32 %v3602_v0, %v3277_v1  ;;  %v3485_v4 = vld [vmem:[%s5705_s3 + $0x40] sm:$0xf]  ;;  %v3655_v5 = vld [vmem:[%s5705_s3 + $0x44] sm:$0xf0]  ;;  %v3654_v6 = vld [vmem:[%s5705_s3 + $0x44] sm:$0xf] }
  0x2a   : > { %710 = vmatpush.bf16.msra.mxu0 %v3324_v30  ;;  %v3486_v7 = vor.u32 %v3655_v5, %v3485_v4  ;;  %v3487_v8 = vld [vmem:[%s5705_s3 + $0x48] sm:$0xf0]  ;;  %v3283_v10 = vld [vmem:[%s4119_s19 + $0x30] sm:$0xf]  ;;  %v3605_v11 = vld [vmem:[%s4119_s19 + $0x34] sm:$0xf0] }
  0x2b   : > { %759 = vmatpush.bf16.msra.mxu1 %v3388_v33  ;;  %808 = vmatpush.bf16.msra.mxu2 %v3328_v34  ;;  %v3490_v9 = vor.u32 %v3654_v6, %v3487_v8  ;;  %v3604_v12 = vld [vmem:[%s4119_s19 + $0x34] sm:$0xf]  ;;  %v3285_v13 = vld [vmem:[%s4119_s19 + $0x38] sm:$0xf0]  ;;  %v3284_v14 = vor.u32 %v3605_v11, %v3283_v10  ;;  %v3477_v16 = vld [vmem:[%s5705_s3 + $0x30] sm:$0xf] }
  0x2c   : > { %857 = vmatpush.bf16.msra.mxu3 %v3392_v38  ;;  %v3288_v15 = vor.u32 %v3604_v12, %v3285_v13  ;;  %v3653_v17 = vld [vmem:[%s5705_s3 + $0x34] sm:$0xf0]  ;;  %v3652_v18 = vld [vmem:[%s5705_s3 + $0x34] sm:$0xf]  ;;  %v3479_v20 = vld [vmem:[%s5705_s3 + $0x38] sm:$0xf0] }
  0x2d   : > { %711 = vmatmul.bf16.vlgmr.msra.gmra.mxu0 %v3260_v41  ;;  %v3478_v19 = vor.u32 %v3653_v17, %v3477_v16  ;;  %v3482_v21 = vor.u32 %v3652_v18, %v3479_v20  ;;  %v3291_v22 = vld [vmem:[%s4119_s19 + $0x40] sm:$0xf]  ;;  %v3607_v23 = vld [vmem:[%s4119_s19 + $0x44] sm:$0xf0]  ;;  %v3606_v24 = vld [vmem:[%s4119_s19 + $0x44] sm:$0xf] }
  0x2e   : > { %1133 = vmatpush.bf16.msrb.mxu0 %v3510_v40  ;;  %760 = vmatmul.bf16.vlgmr.msra.gmra.mxu1 %v3264_v43  ;;  %v3293_v25 = vld [vmem:[%s4119_s19 + $0x48] sm:$0xf0]  ;;  %v3292_v26 = vor.u32 %v3607_v23, %v3291_v22  ;;  %v3469_v28 = vld [vmem:[%s5705_s3 + $0x20] sm:$0xf]  ;;  %v3651_v29 = vld [vmem:[%s5705_s3 + $0x24] sm:$0xf0] }
  0x2f   : > { %1182 = vmatpush.bf16.msrb.mxu1 %v3514_v42  ;;  %809 = vmatmul.bf16.vlgmr.msra.gmra.mxu2 %v3260_v41  ;;  %v3296_v27 = vor.u32 %v3606_v24, %v3293_v25  ;;  %v3650_v30 = vld [vmem:[%s5705_s3 + $0x24] sm:$0xf]  ;;  %v3470_v31 = vor.u32 %v3651_v29, %v3469_v28  ;;  %v3471_v32 = vld [vmem:[%s5705_s3 + $0x28] sm:$0xf0]  ;;  %v3299_v34 = vld [vmem:[%s4119_s19 + $0x50] sm:$0xf] }
  0x30   : > { %858 = vmatmul.bf16.vlgmr.msra.gmra.mxu3 %v3264_v43  ;;  %v3474_v33 = vor.u32 %v3650_v30, %v3471_v32  ;;  %v3609_v35 = vld [vmem:[%s4119_s19 + $0x54] sm:$0xf0]  ;;  %v3608_v36 = vld [vmem:[%s4119_s19 + $0x54] sm:$0xf]  ;;  %v3301_v37 = vld [vmem:[%s4119_s19 + $0x58] sm:$0xf0] }
  0x31   : > { %v3300_v38 = vor.u32 %v3609_v35, %v3299_v34  ;;  %v3304_v39 = vor.u32 %v3608_v36, %v3301_v37  ;;  %v3461_v40 = vld [vmem:[%s5705_s3 + $0x10] sm:$0xf]  ;;  %v3649_v41 = vld [vmem:[%s5705_s3 + $0x14] sm:$0xf0]  ;;  %v3648_v42 = vld [vmem:[%s5705_s3 + $0x14] sm:$0xf] }
  0x32   : > { %1134 = vmatpush.bf16.msrb.mxu0 %v3502_v47  ;;  %v3462_v43 = vor.u32 %v3649_v41, %v3461_v40  ;;  %v3463_v44 = vld [vmem:[%s5705_s3 + $0x18] sm:$0xf0]  ;;  %v3307_v46 = vld [vmem:[%s4119_s19 + $0x60] sm:$0xf]  ;;  %v3611_v47 = vld [vmem:[%s4119_s19 + $0x64] sm:$0xf0] }
  0x33   : > { %1183 = vmatpush.bf16.msrb.mxu1 %v3506_v49  ;;  %v3466_v45 = vor.u32 %v3648_v42, %v3463_v44  ;;  %v3610_v48 = vld [vmem:[%s4119_s19 + $0x64] sm:$0xf]  ;;  %v3309_v49 = vld [vmem:[%s4119_s19 + $0x68] sm:$0xf0]  ;;  %v3308_v50 = vor.u32 %v3611_v47, %v3307_v46  ;;  %v3315_v52 = vld [vmem:[%s4119_s19 + $0x70] sm:$0xf] }
  0x34   : > { %v3312_v51 = vor.u32 %v3610_v48, %v3309_v49  ;;  %v3613_v53 = vld [vmem:[%s4119_s19 + $0x74] sm:$0xf0]  ;;  %v3453_v58 = vld [vmem:[%s5705_s3] sm:$0xf]  ;;  %v3646_v60 = vld [vmem:[%s5705_s3 + $0x4] sm:$0xf] }
  0x35   : > { %v3316_v56 = vor.u32 %v3613_v53, %v3315_v52  ;;  %v3455_v62 = vld [vmem:[%s5705_s3 + $0x8] sm:$0xf0]  ;;  %v981_v48 = vld [vmem:[%s4249_s14 + $0x10] sm:$0xff]  ;;  %v982_v49 = vld [vmem:[%s4249_s14 + $0x18] sm:$0xff] }
  0x36   : > { %1135 = vmatpush.bf16.msrb.mxu0 %v3494_v59  ;;  %v3647_v59 = vld [vmem:[%s5705_s3 + $0x4] sm:$0xf0]  ;;  %v3458_v63 = vor.u32 %v3646_v60, %v3455_v62 }
  0x37   : > { %1184 = vmatpush.bf16.msrb.mxu1 %v3498_v61  ;;  %v3454_v61 = vor.u32 %v3647_v59, %v3453_v58  ;;  %v980_v24 = vld [vmem:[%s4249_s14 + $0x8] sm:$0xff] }
  0x3a   : > { %1136 = vmatpush.bf16.msrb.mxu0 %v3486_v7 }
  0x3b   : > { %1185 = vmatpush.bf16.msrb.mxu1 %v3490_v9 }
  0x3d   : > { %716 = vmatmul.bf16.gmra.mxu0 %v3268_v54 }
  0x3e   : > { %765 = vmatmul.bf16.gmra.mxu1 %v3272_v55  ;;  %1137 = vmatpush.bf16.msrb.mxu0 %v3478_v19 }
  0x3f   : > { %814 = vmatmul.bf16.gmra.mxu2 %v3268_v54  ;;  %1186 = vmatpush.bf16.msrb.mxu1 %v3482_v21  ;;  %v3612_v54 = vld [vmem:[%s4119_s19 + $0x74] sm:$0xf]  ;;  %v979_v21 = vld [vmem:[%s4249_s14] sm:$0xff] }
  0x40   : > { %863 = vmatmul.bf16.gmra.mxu3 %v3272_v55  ;;  %v3317_v55 = vld [vmem:[%s4119_s19 + $0x78] sm:$0xf0]  ;;  %s5212_s19 = scalar_lea.vmem %s5713_s11, %s4107_s28 }
  0x41   : > { %v3320_v57 = vor.u32 %v3612_v54, %v3317_v55 }
  0x42   : > { %1138 = vmatpush.bf16.msrb.mxu0 %v3470_v31 }
  0x43   : > { %1187 = vmatpush.bf16.msrb.mxu1 %v3474_v33 }
  0x46   : > { %1139 = vmatpush.bf16.msrb.mxu0 %v3462_v43 }
  0x47   : > { %1188 = vmatpush.bf16.msrb.mxu1 %v3466_v45 }
  0x4a   : > { %1140 = vmatpush.bf16.msrb.mxu0 %v3454_v61 }
  0x4b   : > { %1189 = vmatpush.bf16.msrb.mxu1 %v3458_v63 }
  0x4d   : > { %721 = vmatmul.bf16.gmra.mxu0 %v3276_v2 }
  0x4e   : > { %770 = vmatmul.bf16.gmra.mxu1 %v3280_v3 }
  0x4f   : > { %819 = vmatmul.bf16.gmra.mxu2 %v3276_v2 }
  0x50   : > { %868 = vmatmul.bf16.gmra.mxu3 %v3280_v3 }
  0x5d   : > { %726 = vmatmul.bf16.gmra.mxu0 %v3284_v14 }
  0x5e   : > { %775 = vmatmul.bf16.gmra.mxu1 %v3288_v15 }
  0x5f   : > { %824 = vmatmul.bf16.gmra.mxu2 %v3284_v14 }
  0x60   : > { %873 = vmatmul.bf16.gmra.mxu3 %v3288_v15 }
  0x6d   : > { %731 = vmatmul.bf16.gmra.mxu0 %v3292_v26 }
  0x6e   : > { %780 = vmatmul.bf16.gmra.mxu1 %v3296_v27 }
  0x6f   : > { %829 = vmatmul.bf16.gmra.mxu2 %v3292_v26 }
  0x70   : > { %878 = vmatmul.bf16.gmra.mxu3 %v3296_v27 }
  0x7d   : > { %736 = vmatmul.bf16.gmra.mxu0 %v3300_v38 }
  0x7e   : > { %785 = vmatmul.bf16.gmra.mxu1 %v3304_v39 }
  0x7f   : > { %834 = vmatmul.bf16.gmra.mxu2 %v3300_v38 }
  0x80   : > { %883 = vmatmul.bf16.gmra.mxu3 %v3304_v39 }
  0x8d   : > { %741 = vmatmul.bf16.gmra.mxu0 %v3308_v50 }
  0x8e   : > { %790 = vmatmul.bf16.gmra.mxu1 %v3312_v51 }
  0x8f   : > { %839 = vmatmul.bf16.gmra.mxu2 %v3308_v50 }
  0x90   : > { %888 = vmatmul.bf16.gmra.mxu3 %v3312_v51 }
  0x9d   : > { %746 = vmatmul.bf16.gmra.mxu0 %v3316_v56 }
  0x9e   : > { %795 = vmatmul.bf16.gmra.mxu1 %v3320_v57 }
  0x9f   : > { %844 = vmatmul.bf16.gmra.mxu2 %v3316_v56 }
  0xa0   : > { %893 = vmatmul.bf16.gmra.mxu3 %v3320_v57 }
  0xaa   : > { %v712_v0 = vpop.f32.mrf.mxu0 }
  0xab   : > { %v761_v1 = vpop.f32.mrf.mxu1 }
  0xac   : > { %v762_v2 = vadd.f32 %v761_v1, %v712_v0 }
  0xae   : > { %vm899_vm0 = vcmp.gt.f32.partialorder %v762_v2, 0.0 }
  0xaf   : > { %v915_v3 = vsel %vm899_vm0, %v762_v2, 1.0 }
  0xb0   : > { %3690 = vrcp.f32 %v915_v3 }
  0xb2   : > { %v810_v4 = vpop.f32.mrf.mxu2  ;;  %v714_v6 = vpop.f32.mrf.mxu0 }
  0xb3   : > { %v859_v5 = vpop.f32.mrf.mxu3  ;;  %v763_v7 = vpop.f32.mrf.mxu1 }
  0xb4   : > { %v764_v8 = vadd.f32 %v763_v7, %v714_v6  ;;  %v860_v9 = vadd.f32 %v859_v5, %v810_v4 }
  0xb6   : > { %vm900_vm1 = vcmp.gt.f32.partialorder %v764_v8, 0.0  ;;  %v3691_v11 = vpop.eup %3690 }
  0xb7   : > { %v916_v10 = vsel %vm900_vm1, %v764_v8, 1.0  ;;  %v947_v15 = vmul.f32 %v3691_v11, %v860_v9  ;;  %v983_v9 = vld [vmem:[%s4249_s14 + $0x20] sm:$0xff] }
  0xb8   : > { %3692 = vrcp.f32 %v916_v10  ;;  %v984_v10 = vld [vmem:[%s4249_s14 + $0x28] sm:$0xff] }
  0xb9   : > { %v963_v20 = vsel %vm899_vm0, %v947_v15, 0.0 }
  0xba   : > { %v812_v12 = vpop.f32.mrf.mxu2  ;;  %v717_v14 = vpop.f32.mrf.mxu0  ;;  %v1007_v27 = vadd.f32 %v979_v21, %v963_v20 }
  0xbb   : > { %v861_v13 = vpop.f32.mrf.mxu3  ;;  %v766_v16 = vpop.f32.mrf.mxu1 }
  0xbc   : > { %v767_v17 = vadd.f32 %v766_v16, %v717_v14  ;;  %v862_v18 = vadd.f32 %v861_v13, %v812_v12 }
  0xbe   : > { %v3693_v19 = vpop.eup %3692  ;;  %vm901_vm2 = vcmp.gt.f32.partialorder %v767_v17, 0.0 }
  0xbf   : > { %v948_v22 = vmul.f32 %v3693_v19, %v862_v18  ;;  %v917_v23 = vsel %vm901_vm2, %v767_v17, 1.0 }
  0xc0   : > { %3694 = vrcp.f32 %v917_v23 }
  0xc1   : > { %v964_v25 = vsel %vm900_vm1, %v948_v22, 0.0 }
  0xc2   : > { %v815_v26 = vpop.f32.mrf.mxu2  ;;  %v719_v29 = vpop.f32.mrf.mxu0  ;;  %v1008_v30 = vadd.f32 %v980_v24, %v964_v25 }
  0xc3   : > { %v864_v28 = vpop.f32.mrf.mxu3  ;;  %v768_v31 = vpop.f32.mrf.mxu1 }
  0xc4   : > { %v769_v32 = vadd.f32 %v768_v31, %v719_v29  ;;  %v1023_v33 = vpack.c.bf16 %v1008_v30, %v1007_v27  ;;  %v865_v34 = vadd.f32 %v864_v28, %v815_v26 }
  0xc6   : > { %vm902_vm3 = vcmp.gt.f32.partialorder %v769_v32, 0.0  ;;  %1141 = vmatmul.bf16.vlgmr.msrb.gmra.mxu0 %v1023_v33  ;;  %1190 = vmatmul.bf16.vlgmr.msrb.gmra.mxu1 %v1023_v33  ;;  %v3695_v36 = vpop.eup %3694 }
  0xc7   : > { %v918_v35 = vsel %vm902_vm3, %v769_v32, 1.0  ;;  %v949_v40 = vmul.f32 %v3695_v36, %v865_v34  ;;  %v985_v34 = vld [vmem:[%s4249_s14 + $0x30] sm:$0xff] }
  0xc8   : > { %3696 = vrcp.f32 %v918_v35  ;;  %v986_v35 = vld [vmem:[%s4249_s14 + $0x38] sm:$0xff] }
  0xc9   : > { %v965_v47 = vsel %vm901_vm2, %v949_v40, 0.0 }
  0xca   : > { %v817_v37 = vpop.f32.mrf.mxu2  ;;  %v722_v39 = vpop.f32.mrf.mxu0  ;;  %v1009_v54 = vadd.f32 %v981_v48, %v965_v47 }
  0xcb   : > { %v866_v38 = vpop.f32.mrf.mxu3  ;;  %v771_v41 = vpop.f32.mrf.mxu1 }
  0xcc   : > { %v772_v42 = vadd.f32 %v771_v41, %v722_v39  ;;  %v867_v43 = vadd.f32 %v866_v38, %v817_v37 }
  0xce   : > { %v3697_v44 = vpop.eup %3696  ;;  %vm903_vm4 = vcmp.gt.f32.partialorder %v772_v42, 0.0 }
  0xcf   : > { %v950_v45 = vmul.f32 %v3697_v44, %v867_v43  ;;  %v919_v46 = vsel %vm903_vm4, %v772_v42, 1.0 }
  0xd0   : > { %3698 = vrcp.f32 %v919_v46 }
  0xd1   : > { %v966_v51 = vsel %vm902_vm3, %v950_v45, 0.0 }
  0xd2   : > { %v820_v50 = vpop.f32.mrf.mxu2  ;;  %v724_v53 = vpop.f32.mrf.mxu0  ;;  %v1010_v55 = vadd.f32 %v982_v49, %v966_v51 }
  0xd3   : > { %v869_v52 = vpop.f32.mrf.mxu3  ;;  %v773_v56 = vpop.f32.mrf.mxu1 }
  0xd4   : > { %v774_v57 = vadd.f32 %v773_v56, %v724_v53  ;;  %v1024_v58 = vpack.c.bf16 %v1010_v55, %v1009_v54  ;;  %v870_v59 = vadd.f32 %v869_v52, %v820_v50  ;;  %v987_v56 = vld [vmem:[%s4249_s14 + $0x40] sm:$0xff] }
  0xd6   : > { %vm904_vm5 = vcmp.gt.f32.partialorder %v774_v57, 0.0  ;;  %1146 = vmatmul.bf16.gmra.mxu0 %v1024_v58  ;;  %1195 = vmatmul.bf16.gmra.mxu1 %v1024_v58  ;;  %v3699_v61 = vpop.eup %3698 }
  0xd7   : > { %v920_v60 = vsel %vm904_vm5, %v774_v57, 1.0  ;;  %v951_v1 = vmul.f32 %v3699_v61, %v870_v59 }
  0xd8   : > { %3700 = vrcp.f32 %v920_v60  ;;  %v988_v60 = vld [vmem:[%s4249_s14 + $0x48] sm:$0xff] }
  0xd9   : > { %v967_v8 = vsel %vm903_vm4, %v951_v1, 0.0 }
  0xda   : > { %v822_v62 = vpop.f32.mrf.mxu2  ;;  %v727_v0 = vpop.f32.mrf.mxu0  ;;  %v1011_v15 = vadd.f32 %v983_v9, %v967_v8 }
  0xdb   : > { %v871_v63 = vpop.f32.mrf.mxu3  ;;  %v776_v2 = vpop.f32.mrf.mxu1 }
  0xdc   : > { %v777_v3 = vadd.f32 %v776_v2, %v727_v0  ;;  %v872_v4 = vadd.f32 %v871_v63, %v822_v62 }
  0xde   : > { %v3701_v5 = vpop.eup %3700  ;;  %vm905_vm6 = vcmp.gt.f32.partialorder %v777_v3, 0.0 }
  0xdf   : > { %v952_v6 = vmul.f32 %v3701_v5, %v872_v4  ;;  %v921_v7 = vsel %vm905_vm6, %v777_v3, 1.0 }
  0xe0   : > { %3702 = vrcp.f32 %v921_v7 }
  0xe1   : > { %v968_v12 = vsel %vm904_vm5, %v952_v6, 0.0 }
  0xe2   : > { %v825_v11 = vpop.f32.mrf.mxu2  ;;  %v729_v14 = vpop.f32.mrf.mxu0  ;;  %v1012_v16 = vadd.f32 %v984_v10, %v968_v12 }
  0xe3   : > { %v874_v13 = vpop.f32.mrf.mxu3  ;;  %v778_v17 = vpop.f32.mrf.mxu1 }
  0xe4   : > { %v779_v18 = vadd.f32 %v778_v17, %v729_v14  ;;  %v1025_v19 = vpack.c.bf16 %v1012_v16, %v1011_v15  ;;  %v875_v20 = vadd.f32 %v874_v13, %v825_v11  ;;  %v989_v17 = vld [vmem:[%s4249_s14 + $0x50] sm:$0xff] }
  0xe6   : > { %vm906_vm7 = vcmp.gt.f32.partialorder %v779_v18, 0.0  ;;  %1151 = vmatmul.bf16.gmra.mxu0 %v1025_v19  ;;  %1200 = vmatmul.bf16.gmra.mxu1 %v1025_v19  ;;  %v3703_v22 = vpop.eup %3702 }
  0xe7   : > { %v922_v21 = vsel %vm906_vm7, %v779_v18, 1.0  ;;  %v953_v26 = vmul.f32 %v3703_v22, %v875_v20 }
  0xe8   : > { %3704 = vrcp.f32 %v922_v21  ;;  %v990_v21 = vld [vmem:[%s4249_s14 + $0x58] sm:$0xff] }
  0xe9   : > { %v969_v33 = vsel %vm905_vm6, %v953_v26, 0.0 }
  0xea   : > { %v827_v23 = vpop.f32.mrf.mxu2  ;;  %v732_v25 = vpop.f32.mrf.mxu0  ;;  %v1013_v40 = vadd.f32 %v985_v34, %v969_v33 }
  0xeb   : > { %v876_v24 = vpop.f32.mrf.mxu3  ;;  %v781_v27 = vpop.f32.mrf.mxu1 }
  0xec   : > { %v782_v28 = vadd.f32 %v781_v27, %v732_v25  ;;  %v877_v29 = vadd.f32 %v876_v24, %v827_v23 }
  0xee   : > { %v3705_v30 = vpop.eup %3704  ;;  %vm907_vm8 = vcmp.gt.f32.partialorder %v782_v28, 0.0 }
  0xef   : > { %v954_v31 = vmul.f32 %v3705_v30, %v877_v29  ;;  %v923_v32 = vsel %vm907_vm8, %v782_v28, 1.0 }
  0xf0   : > { %3706 = vrcp.f32 %v923_v32 }
  0xf1   : > { %v970_v37 = vsel %vm906_vm7, %v954_v31, 0.0 }
  0xf2   : > { %v830_v36 = vpop.f32.mrf.mxu2  ;;  %v734_v38 = vpop.f32.mrf.mxu0  ;;  %v1014_v41 = vadd.f32 %v986_v35, %v970_v37 }
  0xf3   : > { %v879_v39 = vpop.f32.mrf.mxu3  ;;  %v783_v42 = vpop.f32.mrf.mxu1 }
  0xf4   : > { %v784_v43 = vadd.f32 %v783_v42, %v734_v38  ;;  %v1026_v44 = vpack.c.bf16 %v1014_v41, %v1013_v40  ;;  %v880_v45 = vadd.f32 %v879_v39, %v830_v36  ;;  %v991_v42 = vld [vmem:[%s4249_s14 + $0x60] sm:$0xff] }
  0xf6   : > { %v3707_v46 = vpop.eup %3706  ;;  %vm908_vm9 = vcmp.gt.f32.partialorder %v784_v43, 0.0  ;;  %1156 = vmatmul.bf16.gmra.mxu0 %v1026_v44  ;;  %1205 = vmatmul.bf16.gmra.mxu1 %v1026_v44 }
  0xf7   : > { %v924_v47 = vsel %vm908_vm9, %v784_v43, 1.0  ;;  %v955_v48 = vmul.f32 %v3707_v46, %v880_v45  ;;  %v992_v46 = vld [vmem:[%s4249_s14 + $0x68] sm:$0xff] }
  0xf8   : > { %3708 = vrcp.f32 %v924_v47 }
  0xf9   : > { %v971_v55 = vsel %vm907_vm8, %v955_v48, 0.0 }
  0xfa   : > { %v832_v49 = vpop.f32.mrf.mxu2  ;;  %v737_v50 = vpop.f32.mrf.mxu0  ;;  %v1015_v61 = vadd.f32 %v987_v56, %v971_v55 }
  0xfb   : > { %v881_v51 = vpop.f32.mrf.mxu3  ;;  %v786_v52 = vpop.f32.mrf.mxu1 }
  0xfc   : > { %v882_v53 = vadd.f32 %v881_v51, %v832_v49  ;;  %v787_v54 = vadd.f32 %v786_v52, %v737_v50 }
  0xfe   : > { %v3709_v57 = vpop.eup %3708  ;;  %vm909_vm10 = vcmp.gt.f32.partialorder %v787_v54, 0.0 }
  0xff   : > { %v925_v58 = vsel %vm909_vm10, %v787_v54, 1.0  ;;  %v956_v59 = vmul.f32 %v3709_v57, %v882_v53 }
 0x100   : > { %3710 = vrcp.f32 %v925_v58 }
 0x101   : > { %v972_v62 = vsel %vm908_vm9, %v956_v59, 0.0 }
 0x102   : > { %v835_v63 = vpop.f32.mrf.mxu2  ;;  %v1016_v0 = vadd.f32 %v988_v60, %v972_v62  ;;  %v739_v1 = vpop.f32.mrf.mxu0 }
 0x103   : > { %v884_v2 = vpop.f32.mrf.mxu3  ;;  %v788_v3 = vpop.f32.mrf.mxu1 }
 0x104   : > { %v789_v4 = vadd.f32 %v788_v3, %v739_v1  ;;  %v1027_v5 = vpack.c.bf16 %v1016_v0, %v1015_v61  ;;  %v885_v6 = vadd.f32 %v884_v2, %v835_v63  ;;  %v993_v0 = vld [vmem:[%s4249_s14 + $0x70] sm:$0xff]  ;;  %v994_v3 = vld [vmem:[%s4249_s14 + $0x78] sm:$0xff] }
 0x106   : > { %v3711_v7 = vpop.eup %3710  ;;  %vm910_vm11 = vcmp.gt.f32.partialorder %v789_v4, 0.0  ;;  %1161 = vmatmul.bf16.gmra.mxu0 %v1027_v5  ;;  %1210 = vmatmul.bf16.gmra.mxu1 %v1027_v5 }
 0x107   : > { %v926_v8 = vsel %vm910_vm11, %v789_v4, 1.0  ;;  %v957_v9 = vmul.f32 %v3711_v7, %v885_v6 }
 0x108   : > { %3712 = vrcp.f32 %v926_v8  ;;  %v995_v8 = vlaneseq }
 0x109   : > { %v973_v16 = vsel %vm909_vm10, %v957_v9, 0.0 }
 0x10a   : > { %v837_v10 = vpop.f32.mrf.mxu2  ;;  %v742_v11 = vpop.f32.mrf.mxu0  ;;  %v1017_v22 = vadd.f32 %v989_v17, %v973_v16  ;;  %v4295_v9 = vand.u32 127, %v995_v8 }
 0x10b   : > { %v886_v12 = vpop.f32.mrf.mxu3  ;;  %v791_v13 = vpop.f32.mrf.mxu1 }
 0x10c   : > { %v887_v14 = vadd.f32 %v886_v12, %v837_v10  ;;  %v792_v15 = vadd.f32 %v791_v13, %v742_v11  ;;  %v1047_v10 = vld [vmem:[%s5706_s4] sm:$0x3]  ;;  %vm998_vm0 = vcmp.lt.s32.totalorder %v4295_v9, 64 }
 0x10d   : > { %v4300_v11 = vperm.slane %v1047_v10, 0  ;;  %v4302_v12 = vperm.slane %v1047_v10, 1 }
 0x10e   : > { %v3713_v18 = vpop.eup %3712  ;;  %vm911_vm12 = vcmp.gt.f32.partialorder %v792_v15, 0.0 }
 0x10f   : > { %v927_v19 = vsel %vm911_vm12, %v792_v15, 1.0  ;;  %v958_v20 = vmul.f32 %v3713_v18, %v887_v14  ;;  %v3844_v15 = vmov 0.0  }
 0x110   : > { %3714 = vrcp.f32 %v927_v19  ;;  %v4306_v16 = vsel %vm998_vm0, 1.0, %v3844_v15 }
 0x111   : > { %v974_v23 = vsel %vm910_vm11, %v958_v20, 0.0 }
 0x112   : > { %v840_v24 = vpop.f32.mrf.mxu2  ;;  %v1018_v25 = vadd.f32 %v990_v21, %v974_v23  ;;  %v744_v26 = vpop.f32.mrf.mxu0 }
 0x113   : > { %v889_v27 = vpop.f32.mrf.mxu3  ;;  %v793_v28 = vpop.f32.mrf.mxu1 }
 0x114   : > { %v794_v29 = vadd.f32 %v793_v28, %v744_v26  ;;  %v1028_v30 = vpack.c.bf16 %v1018_v25, %v1017_v22  ;;  %v890_v31 = vadd.f32 %v889_v27, %v840_v24 }
 0x116   : > { %v3715_v32 = vpop.eup %3714  ;;  %vm912_vm13 = vcmp.gt.f32.partialorder %v794_v29, 0.0  ;;  %1166 = vmatmul.bf16.gmra.mxu0 %v1028_v30  ;;  %1215 = vmatmul.bf16.gmra.mxu1 %v1028_v30 }
 0x117   : > { %v928_v33 = vsel %vm912_vm13, %v794_v29, 1.0  ;;  %v959_v34 = vmul.f32 %v3715_v32, %v890_v31 }
 0x118   : > { %3716 = vrcp.f32 %v928_v33 }
 0x119   : > { %v975_v41 = vsel %vm911_vm12, %v959_v34, 0.0 }
 0x11a   : > { %v842_v35 = vpop.f32.mrf.mxu2  ;;  %v747_v36 = vpop.f32.mrf.mxu0  ;;  %v1019_v47 = vadd.f32 %v991_v42, %v975_v41 }
 0x11b   : > { %v891_v37 = vpop.f32.mrf.mxu3  ;;  %v796_v38 = vpop.f32.mrf.mxu1 }
 0x11c   : > { %v892_v39 = vadd.f32 %v891_v37, %v842_v35  ;;  %v797_v40 = vadd.f32 %v796_v38, %v747_v36 }
 0x11e   : > { %v3717_v43 = vpop.eup %3716  ;;  %vm913_vm14 = vcmp.gt.f32.partialorder %v797_v40, 0.0 }
 0x11f   : > { %v929_v44 = vsel %vm913_vm14, %v797_v40, 1.0  ;;  %v960_v45 = vmul.f32 %v3717_v43, %v892_v39 }
 0x120   : > { %3718 = vrcp.f32 %v929_v44 }
 0x121   : > { %v976_v48 = vsel %vm912_vm13, %v960_v45, 0.0 }
 0x122   : > { %v845_v49 = vpop.f32.mrf.mxu2  ;;  %v1020_v50 = vadd.f32 %v992_v46, %v976_v48  ;;  %v749_v51 = vpop.f32.mrf.mxu0 }
 0x123   : > { %v894_v52 = vpop.f32.mrf.mxu3  ;;  %v798_v53 = vpop.f32.mrf.mxu1 }
 0x124   : > { %v799_v54 = vadd.f32 %v798_v53, %v749_v51  ;;  %v1029_v55 = vpack.c.bf16 %v1020_v50, %v1019_v47  ;;  %v895_v56 = vadd.f32 %v894_v52, %v845_v49 }
 0x126   : > { %v3719_v57 = vpop.eup %3718  ;;  %vm914_vm15 = vcmp.gt.f32.partialorder %v799_v54, 0.0  ;;  %1171 = vmatmul.bf16.gmra.mxu0 %v1029_v55  ;;  %1220 = vmatmul.bf16.gmra.mxu1 %v1029_v55 }
 0x127   : > { %v930_v58 = vsel %vm914_vm15, %v799_v54, 1.0  ;;  %v961_v59 = vmul.f32 %v3719_v57, %v895_v56 }
 0x128   : > { %3720 = vrcp.f32 %v930_v58 }
 0x129   : > { %v977_v63 = vsel %vm913_vm14, %v961_v59, 0.0 }
 0x12a   : > { %v847_v60 = vpop.f32.mrf.mxu2  ;;  %v1021_v4 = vadd.f32 %v993_v0, %v977_v63 }
 0x12b   : > { %v896_v61 = vpop.f32.mrf.mxu3 }
 0x12c   : > { %v897_v62 = vadd.f32 %v896_v61, %v847_v60 }
 0x12e   : > { %v3721_v1 = vpop.eup %3720 }
 0x12f   : > { %v962_v2 = vmul.f32 %v3721_v1, %v897_v62 }
 0x131   : > { %v978_v5 = vsel %vm914_vm15, %v962_v2, 0.0 }
 0x132   : > { %v1022_v6 = vadd.f32 %v994_v3, %v978_v5 }
 0x134   : > { %v1030_v7 = vpack.c.bf16 %v1022_v6, %v1021_v4 }
 0x136   : > { %1176 = vmatmul.bf16.gmra.mxu0 %v1030_v7  ;;  %1225 = vmatmul.bf16.gmra.mxu1 %v1030_v7 }
 0x143   : > { %v1142_v13 = vpop.f32.mrf.mxu0  ;;  %v1191_v14 = vpop.f32.mrf.mxu1 }
 0x144   : > { %v4309_v17 = vadd.f32 %v1142_v13, %v4300_v11  ;;  %v4312_v18 = vadd.f32 %v1191_v14, %v4302_v12 }
 0x146   : > { %v1233_v19 = vmul.f32 %v4306_v16, %v4309_v17  ;;  %v1234_v20 = vmul.f32 0.0, %v4312_v18 }
 0x148   : > { %v1265_v21 = vadd.f32 %v1234_v20, %v1233_v19 }
 0x14a   : > { %1266 = vadd.xlane.f32.xlu0 %v1265_v21 }
 0x14b   : > { %v1144_v22 = vpop.f32.mrf.mxu0  ;;  %v1193_v23 = vpop.f32.mrf.mxu1 }
 0x14c   : > { %v4318_v24 = vadd.f32 %v1144_v22, %v4300_v11  ;;  %v4321_v25 = vadd.f32 %v1193_v23, %v4302_v12 }
 0x14e   : > { %v1235_v26 = vmul.f32 %v4306_v16, %v4318_v24  ;;  %v1236_v27 = vmul.f32 0.0, %v4321_v25 }
 0x150   : > { %v1268_v28 = vadd.f32 %v1236_v27, %v1235_v26 }
 0x152   : > { %1269 = vadd.xlane.f32.xlu0 %v1268_v28 }
 0x153   : > { %v1147_v29 = vpop.f32.mrf.mxu0  ;;  %v1196_v30 = vpop.f32.mrf.mxu1 }
 0x154   : > { %v4327_v31 = vadd.f32 %v1147_v29, %v4300_v11  ;;  %v4330_v32 = vadd.f32 %v1196_v30, %v4302_v12 }
 0x156   : > { %v1237_v33 = vmul.f32 %v4306_v16, %v4327_v31  ;;  %v1238_v34 = vmul.f32 0.0, %v4330_v32 }
 0x158   : > { %v1271_v35 = vadd.f32 %v1238_v34, %v1237_v33 }
 0x15a   : > { %1272 = vadd.xlane.f32.xlu1 %v1271_v35 }
 0x15b   : > { %v1149_v36 = vpop.f32.mrf.mxu0  ;;  %v1198_v37 = vpop.f32.mrf.mxu1 }
 0x15c   : > { %v4336_v38 = vadd.f32 %v1149_v36, %v4300_v11  ;;  %v4339_v39 = vadd.f32 %v1198_v37, %v4302_v12 }
 0x15e   : > { %v1239_v40 = vmul.f32 %v4306_v16, %v4336_v38  ;;  %v1240_v41 = vmul.f32 0.0, %v4339_v39 }
 0x160   : > { %v1274_v42 = vadd.f32 %v1240_v41, %v1239_v40 }
 0x162   : > { %1275 = vadd.xlane.f32.xlu1 %v1274_v42 }
 0x163   : > { %v1152_v43 = vpop.f32.mrf.mxu0  ;;  %v1201_v44 = vpop.f32.mrf.mxu1 }
 0x164   : > { %v4345_v45 = vadd.f32 %v1152_v43, %v4300_v11  ;;  %v4348_v46 = vadd.f32 %v1201_v44, %v4302_v12 }
 0x166   : > { %v1241_v47 = vmul.f32 %v4306_v16, %v4345_v45  ;;  %v1242_v48 = vmul.f32 0.0, %v4348_v46 }
 0x168   : > { %v1277_v49 = vadd.f32 %v1242_v48, %v1241_v47 }
 0x16a   : > { %1278 = vadd.xlane.f32.xlu2 %v1277_v49 }
 0x16b   : > { %v1154_v50 = vpop.f32.mrf.mxu0  ;;  %v1203_v51 = vpop.f32.mrf.mxu1 }
 0x16c   : > { %v4354_v52 = vadd.f32 %v1154_v50, %v4300_v11  ;;  %v4357_v53 = vadd.f32 %v1203_v51, %v4302_v12 }
 0x16e   : > { %v1243_v54 = vmul.f32 %v4306_v16, %v4354_v52  ;;  %v1244_v55 = vmul.f32 0.0, %v4357_v53 }
 0x170   : > { %v1280_v56 = vadd.f32 %v1244_v55, %v1243_v54 }
 0x172   : > { %1281 = vadd.xlane.f32.xlu2 %v1280_v56 }
 0x173   : > { %v1157_v57 = vpop.f32.mrf.mxu0  ;;  %v1206_v58 = vpop.f32.mrf.mxu1 }
 0x174   : > { %v4363_v59 = vadd.f32 %v1157_v57, %v4300_v11  ;;  %v4366_v60 = vadd.f32 %v1206_v58, %v4302_v12 }
 0x176   : > { %v1245_v61 = vmul.f32 %v4306_v16, %v4363_v59  ;;  %v1246_v62 = vmul.f32 0.0, %v4366_v60 }
 0x178   : > { %v1283_v63 = vadd.f32 %v1246_v62, %v1245_v61 }
 0x17a   : > { %1284 = vadd.xlane.f32.xlu0 %v1283_v63 }
 0x17b   : > { %v1159_v0 = vpop.f32.mrf.mxu0  ;;  %v1208_v1 = vpop.f32.mrf.mxu1 }
 0x17c   : > { %v4372_v2 = vadd.f32 %v1159_v0, %v4300_v11  ;;  %v4375_v3 = vadd.f32 %v1208_v1, %v4302_v12 }
 0x17e   : > { %v1247_v4 = vmul.f32 %v4306_v16, %v4372_v2  ;;  %v1248_v5 = vmul.f32 0.0, %v4375_v3 }
 0x180   : > { %v1286_v6 = vadd.f32 %v1248_v5, %v1247_v4 }
 0x182   : > { %1287 = vadd.xlane.f32.xlu1 %v1286_v6 }
 0x183   : > { %v1162_v7 = vpop.f32.mrf.mxu0  ;;  %v1211_v8 = vpop.f32.mrf.mxu1 }
 0x184   : > { %v4381_v10 = vadd.f32 %v1162_v7, %v4300_v11  ;;  %v4384_v13 = vadd.f32 %v1211_v8, %v4302_v12 }
 0x186   : > { %v1249_v14 = vmul.f32 %v4306_v16, %v4381_v10  ;;  %v1250_v19 = vmul.f32 0.0, %v4384_v13 }
 0x188   : > { %v1289_v20 = vadd.f32 %v1250_v19, %v1249_v14 }
 0x18a   : > { %1290 = vadd.xlane.f32.xlu1 %v1289_v20 }
 0x18b   : > { %v1164_v21 = vpop.f32.mrf.mxu0  ;;  %v1213_v22 = vpop.f32.mrf.mxu1 }
 0x18c   : > { %v4401_v40 = vadd.f32 %v1164_v21, %v4300_v11 }
 0x18e   : > { %v1251_v44 = vmul.f32 %v4306_v16, %v4401_v40 }
 0x193   : > { %v1167_v27 = vpop.f32.mrf.mxu0  ;;  %v1216_v30 = vpop.f32.mrf.mxu1 }
 0x194   : > { %v4424_v55 = vadd.f32 %v1216_v30, %v4302_v12 }
 0x196   : > { %v1254_v1 = vmul.f32 0.0, %v4424_v55 }
 0x19b   : > { %v1169_v48 = vpop.f32.mrf.mxu0  ;;  %v1218_v51 = vpop.f32.mrf.mxu1 }
 0x19c   : > { %v4441_v19 = vadd.f32 %v1169_v48, %v4300_v11  ;;  %v4444_v20 = vadd.f32 %v1218_v51, %v4302_v12 }
 0x1a3   : > { %v1172_v6 = vpop.f32.mrf.mxu0 }
 0x1bd   : > { %v1267_v23 = vpop.xlane.xlu0 %1266 }
 0x1be   : > { %v1313_v26 = vmul.f32 0.015625, %v1267_v23 }
 0x1c0   : > { %v1329_v28 = vsub.f32 %v4309_v17, %v1313_v26  ;;  %v1330_v29 = vsub.f32 %v4312_v18, %v1313_v26  ;;  %v4404_v17 = vadd.f32 %v1213_v22, %v4302_v12 }
 0x1c2   : > { %v4392_v33 = vmul.f32 %v4306_v16, %v1329_v28  ;;  %v4394_v34 = vmul.f32 0.0, %v1330_v29  ;;  %v1252_v47 = vmul.f32 0.0, %v4404_v17  ;;  %v1256_v28 = vmul.f32 0.0, %v4444_v20 }
 0x1c4   : > { %v1393_v35 = vmul.f32 %v4392_v33, %v4392_v33  ;;  %v1394_v36 = vmul.f32 %v4394_v34, %v4394_v34  ;;  %v1292_v58 = vadd.f32 %v1252_v47, %v1251_v44 }
 0x1c5   : > { %v1270_v37 = vpop.xlane.xlu0 %1269 }
 0x1c6   : > { %v1314_v18 = vmul.f32 0.015625, %v1270_v37  ;;  %v1425_v41 = vadd.f32 %v1394_v36, %v1393_v35 }
 0x1c8   : > { %v1331_v42 = vsub.f32 %v4318_v24, %v1314_v18  ;;  %v1332_v43 = vsub.f32 %v4321_v25, %v1314_v18  ;;  %1426 = vadd.xlane.f32.xlu2 %v1425_v41  ;;  %v4421_v25 = vadd.f32 %v1167_v27, %v4300_v11  ;;  %v1255_v27 = vmul.f32 %v4306_v16, %v4441_v19 }
 0x1ca   : > { %v4412_v49 = vmul.f32 %v4306_v16, %v1331_v42  ;;  %v4414_v50 = vmul.f32 0.0, %v1332_v43  ;;  %v1253_v0 = vmul.f32 %v4306_v16, %v4421_v25  ;;  %v1298_v42 = vadd.f32 %v1256_v28, %v1255_v27  ;;  %v1174_v43 = vpop.f32.mrf.mxu0 }
 0x1cc   : > { %v1395_v54 = vmul.f32 %v4412_v49, %v4412_v49  ;;  %v1396_v24 = vmul.f32 %v4414_v50, %v4414_v50  ;;  %v1295_v14 = vadd.f32 %v1254_v1, %v1253_v0 }
 0x1cd   : > { %v1273_v56 = vpop.xlane.xlu1 %1272 }
 0x1ce   : > { %v1315_v57 = vmul.f32 0.015625, %v1273_v56  ;;  %v1428_v61 = vadd.f32 %v1396_v24, %v1395_v54 }
 0x1d0   : > { %v1333_v62 = vsub.f32 %v4327_v31, %v1315_v57  ;;  %v1334_v63 = vsub.f32 %v4330_v32, %v1315_v57  ;;  %1293 = vadd.xlane.f32.xlu2 %v1292_v58  ;;  %1429 = vadd.xlane.f32.xlu0 %v1428_v61  ;;  %v1221_v32 = vpop.f32.mrf.mxu1  ;;  %v4481_v61 = vadd.f32 %v1174_v43, %v4300_v11 }
 0x1d1   : > { %v4464_v36 = vadd.f32 %v1221_v32, %v4302_v12 }
 0x1d2   : > { %v4432_v4 = vmul.f32 %v4306_v16, %v1333_v62  ;;  %v4434_v5 = vmul.f32 0.0, %v1334_v63  ;;  %v1177_v32 = vpop.f32.mrf.mxu0 }
 0x1d3   : > { %v1258_v54 = vmul.f32 0.0, %v4464_v36  ;;  %v4513_v28 = vadd.f32 %v1177_v32, %v4300_v11 }
 0x1d4   : > { %v1397_v7 = vmul.f32 %v4432_v4, %v4432_v4  ;;  %v1398_v31 = vmul.f32 %v4434_v5, %v4434_v5 }
 0x1d5   : > { %v1276_v8 = vpop.xlane.xlu1 %1275 }
 0x1d6   : > { %v1316_v21 = vmul.f32 0.015625, %v1276_v8  ;;  %v1431_v22 = vadd.f32 %v1398_v31, %v1397_v7  ;;  %v3669_v7 = vld [vmem:[%s5709_s7 + $0x38] sm:$0xff] }
 0x1d7   : > { %v3677_v31 = vld [vmem:[%s5709_s7 + $0x78] sm:$0xff]  ;;  %1951 = vmatpush.bf16.msrb.mxu2 %v3669_v7 }
 0x1d8   : > { %v1335_v23 = vsub.f32 %v4336_v38, %v1316_v21  ;;  %v1336_v26 = vsub.f32 %v4339_v39, %v1316_v21  ;;  %1296 = vadd.xlane.f32.xlu2 %v1295_v14  ;;  %1432 = vadd.xlane.f32.xlu0 %v1431_v22  ;;  %v4461_v39 = vadd.f32 %v1172_v6, %v4300_v11  ;;  %v1223_v44 = vpop.f32.mrf.mxu1  ;;  %v3668_v22 = vld [vmem:[%s5709_s7 + $0x30] sm:$0xff] }
 0x1d9   : > { %v4484_v62 = vadd.f32 %v1223_v44, %v4302_v12  ;;  %v1259_v14 = vmul.f32 %v4306_v16, %v4481_v61  ;;  %2000 = vmatpush.bf16.msrb.mxu3 %v3677_v31  ;;  %v1261_v44 = vmul.f32 %v4306_v16, %v4513_v28 }
 0x1da   : > { %v4452_v29 = vmul.f32 %v4306_v16, %v1335_v23  ;;  %v4454_v30 = vmul.f32 0.0, %v1336_v26  ;;  %v1257_v51 = vmul.f32 %v4306_v16, %v4461_v39  ;;  %v3676_v23 = vld [vmem:[%s5709_s7 + $0x70] sm:$0xff] }
 0x1db   : > { %v1260_v21 = vmul.f32 0.0, %v4484_v62  ;;  %1952 = vmatpush.bf16.msrb.mxu2 %v3668_v22 }
 0x1dc   : > { %v1399_v35 = vmul.f32 %v4452_v29, %v4452_v29  ;;  %v1400_v38 = vmul.f32 %v4454_v30, %v4454_v30 }
 0x1dd   : > { %v1279_v37 = vpop.xlane.xlu2 %1278  ;;  %2001 = vmatpush.bf16.msrb.mxu3 %v3676_v23 }
 0x1de   : > { %v1317_v18 = vmul.f32 0.015625, %v1279_v37  ;;  %v1434_v41 = vadd.f32 %v1400_v38, %v1399_v35 }
 0x1e0   : > { %v1337_v47 = vsub.f32 %v4345_v45, %v1317_v18  ;;  %v1338_v48 = vsub.f32 %v4348_v46, %v1317_v18  ;;  %1435 = vadd.xlane.f32.xlu1 %v1434_v41  ;;  %1299 = vadd.xlane.f32.xlu0 %v1298_v42  ;;  %v1301_v46 = vadd.f32 %v1258_v54, %v1257_v51  ;;  %v1226_v8 = vpop.f32.mrf.mxu1  ;;  %v1179_v54 = vpop.f32.mrf.mxu0 }
 0x1e1   : > { %v4516_v35 = vadd.f32 %v1226_v8, %v4302_v12  ;;  %v1304_v18 = vadd.f32 %v1260_v21, %v1259_v14 }
 0x1e2   : > { %v4472_v24 = vmul.f32 %v4306_v16, %v1337_v47  ;;  %v4474_v56 = vmul.f32 0.0, %v1338_v48 }
 0x1e3   : > { %v1262_v47 = vmul.f32 0.0, %v4516_v35 }
 0x1e4   : > { %v1401_v57 = vmul.f32 %v4472_v24, %v4472_v24  ;;  %v1402_v45 = vmul.f32 %v4474_v56, %v4474_v56 }
 0x1e5   : > { %v1282_v58 = vpop.xlane.xlu2 %1281 }
 0x1e6   : > { %v1318_v63 = vmul.f32 0.015625, %v1282_v58  ;;  %v1437_v0 = vadd.f32 %v1402_v45, %v1401_v57  ;;  %v1307_v58 = vadd.f32 %v1262_v47, %v1261_v44  ;;  %v3665_v44 = vld [vmem:[%s5709_s7 + $0x18] sm:$0xff] }
 0x1e7   : > { %v3673_v47 = vld [vmem:[%s5709_s7 + $0x58] sm:$0xff] }
 0x1e8   : > { %v1339_v1 = vsub.f32 %v4354_v52, %v1318_v63  ;;  %v1340_v6 = vsub.f32 %v4357_v53, %v1318_v63  ;;  %1438 = vadd.xlane.f32.xlu1 %v1437_v0  ;;  %1302 = vadd.xlane.f32.xlu0 %v1301_v46  ;;  %v1228_v57 = vpop.f32.mrf.mxu1  ;;  %v4533_v46 = vadd.f32 %v1179_v54, %v4300_v11  ;;  %v3664_v54 = vld [vmem:[%s5709_s7 + $0x10] sm:$0xff] }
 0x1e9   : > { %v4536_v63 = vadd.f32 %v1228_v57, %v4302_v12  ;;  %v3672_v57 = vld [vmem:[%s5709_s7 + $0x50] sm:$0xff] }
 0x1ea   : > { %v4498_v52 = vmul.f32 %v4306_v16, %v1339_v1  ;;  %v4500_v53 = vmul.f32 0.0, %v1340_v6  ;;  %v1263_v31 = vmul.f32 %v4306_v16, %v4533_v46 }
 0x1eb   : > { %v1264_v32 = vmul.f32 0.0, %v4536_v63 }
 0x1ec   : > { %v1403_v26 = vmul.f32 %v4498_v52, %v4498_v52  ;;  %v1404_v27 = vmul.f32 %v4500_v53, %v4500_v53 }
 0x1ed   : > { %v1285_v38 = vpop.xlane.xlu0 %1284  ;;  %v1310_v22 = vadd.f32 %v1264_v32, %v1263_v31 }
 0x1ee   : > { %v1319_v37 = vmul.f32 0.015625, %v1285_v38  ;;  %v1440_v41 = vadd.f32 %v1404_v27, %v1403_v26 }
 0x1f0   : > { %v1341_v42 = vsub.f32 %v4363_v59, %v1319_v37  ;;  %v1342_v43 = vsub.f32 %v4366_v60, %v1319_v37  ;;  %1305 = vadd.xlane.f32.xlu1 %v1304_v18  ;;  %1441 = vadd.xlane.f32.xlu2 %v1440_v41 }
 0x1f2   : > { %v4524_v48 = vmul.f32 %v4306_v16, %v1341_v42  ;;  %v4526_v51 = vmul.f32 0.0, %v1342_v43  ;;  %v3666_v42 = vld [vmem:[%s5709_s7 + $0x20] sm:$0xff] }
 0x1f3   : > { %v3674_v43 = vld [vmem:[%s5709_s7 + $0x60] sm:$0xff] }
 0x1f4   : > { %v1405_v45 = vmul.f32 %v4524_v48, %v4524_v48  ;;  %v1406_v59 = vmul.f32 %v4526_v51, %v4526_v51 }
 0x1f5   : > { %v1288_v60 = vpop.xlane.xlu1 %1287 }
 0x1f6   : > { %v1320_v0 = vmul.f32 0.015625, %v1288_v60  ;;  %v1443_v1 = vadd.f32 %v1406_v59, %v1405_v45  ;;  %v3663_v60 = vld [vmem:[%s5709_s7 + $0x8] sm:$0xff] }
 0x1f8   : > { %v1343_v6 = vsub.f32 %v4372_v2, %v1320_v0  ;;  %v1344_v7 = vsub.f32 %v4375_v3, %v1320_v0  ;;  %1308 = vadd.xlane.f32.xlu1 %v1307_v58  ;;  %1444 = vadd.xlane.f32.xlu2 %v1443_v1  ;;  %v3671_v58 = vld [vmem:[%s5709_s7 + $0x48] sm:$0xff]  ;;  %v3662_v1 = vld [vmem:[%s5709_s7] sm:$0xff] }
 0x1fa   : > { %v4544_v8 = vmul.f32 %v4306_v16, %v1343_v6  ;;  %v4546_v11 = vmul.f32 0.0, %v1344_v7  ;;  %v3670_v6 = vld [vmem:[%s5709_s7 + $0x40] sm:$0xff] }
 0x1fc   : > { %v1407_v12 = vmul.f32 %v4544_v8, %v4544_v8  ;;  %v1408_v2 = vmul.f32 %v4546_v11, %v4546_v11 }
 0x1fd   : > { %v1291_v14 = vpop.xlane.xlu1 %1290 }
 0x1fe   : > { %v1321_v3 = vmul.f32 0.015625, %v1291_v14  ;;  %v1446_v21 = vadd.f32 %v1408_v2, %v1407_v12 }
 0x200   : > { %v1345_v23 = vsub.f32 %v4381_v10, %v1321_v3  ;;  %v1346_v26 = vsub.f32 %v4384_v13, %v1321_v3  ;;  %1447 = vadd.xlane.f32.xlu0 %v1446_v21  ;;  %1311 = vadd.xlane.f32.xlu2 %v1310_v22  ;;  %v3667_v10 = vld [vmem:[%s5709_s7 + $0x28] sm:$0xff] }
 0x201   : > { %v3675_v13 = vld [vmem:[%s5709_s7 + $0x68] sm:$0xff]  ;;  %1953 = vmatpush.bf16.msrb.mxu2 %v3667_v10 }
 0x202   : > { %v4555_v27 = vmul.f32 %v4306_v16, %v1345_v23  ;;  %v4557_v38 = vmul.f32 0.0, %v1346_v26  ;;  %2002 = vmatpush.bf16.msrb.mxu3 %v3675_v13 }
 0x204   : > { %v1409_v37 = vmul.f32 %v4555_v27, %v4555_v27  ;;  %v1410_v18 = vmul.f32 %v4557_v38, %v4557_v38 }
 0x205   : > { %1954 = vmatpush.bf16.msrb.mxu2 %v3666_v42 }
 0x206   : > { %v1449_v41 = vadd.f32 %v1410_v18, %v1409_v37  ;;  %2003 = vmatpush.bf16.msrb.mxu3 %v3674_v43 }
 0x208   : > { %1450 = vadd.xlane.f32.xlu0 %v1449_v41 }
 0x209   : > { %1955 = vmatpush.bf16.msrb.mxu2 %v3665_v44 }
 0x20a   : > { %2004 = vmatpush.bf16.msrb.mxu3 %v3673_v47 }
 0x20d   : > { %1956 = vmatpush.bf16.msrb.mxu2 %v3664_v54 }
 0x20e   : > { %2005 = vmatpush.bf16.msrb.mxu3 %v3672_v57 }
 0x211   : > { %1957 = vmatpush.bf16.msrb.mxu2 %v3663_v60 }
 0x212   : > { %2006 = vmatpush.bf16.msrb.mxu3 %v3671_v58  ;;  %v1231_v58 = vld [vmem:[%s5707_s5] sm:$0x3] }
 0x215   : > { %1958 = vmatpush.bf16.msrb.mxu2 %v3662_v1 }
 0x216   : > { %2007 = vmatpush.bf16.msrb.mxu3 %v3670_v6 }
 0x23b   : > { %v1427_v45 = vpop.xlane.xlu2 %1426 }
 0x23c   : > { %v1473_v59 = vmul.f32 0.015625, %v1427_v45 }
 0x23e   : > { %v1489_v0 = vadd.f32 1e-05, %v1473_v59 }
 0x240   : > { %3722 = vrsqrt.f32 %v1489_v0  ;;  %vm1511_vm2 = vweird.f32 %v1489_v0 }
 0x243   : > { %v1294_v7 = vpop.xlane.xlu2 %1293  ;;  %v1430_v31 = vpop.xlane.xlu0 %1429 }
 0x244   : > { %v1322_v32 = vmul.f32 0.015625, %v1294_v7  ;;  %v1474_v12 = vmul.f32 0.015625, %v1430_v31  ;;  %v1232_v31 = vld [vmem:[%s5708_s6] sm:$0x3] }
 0x246   : > { %v3723_v2 = vpop.eup %3722  ;;  %v1347_v14 = vsub.f32 %v4401_v40, %v1322_v32  ;;  %v1348_v3 = vsub.f32 %v4404_v17, %v1322_v32  ;;  %v1490_v21 = vadd.f32 1e-05, %v1474_v12  ;;  %v4630_v32 = vperm.slane %v1231_v58, 0 }
 0x247   : > { %v1506_v22 = vmul.f32 %v3723_v2, %v1489_v0  ;;  %vm1512_vm1 = vweird.f32 %v3723_v2 }
 0x248   : > { %v4602_v23 = vmul.f32 %v4306_v16, %v1347_v14  ;;  %v4604_v26 = vmul.f32 0.0, %v1348_v3  ;;  %3724 = vrsqrt.f32 %v1490_v21  ;;  %vm1513_vm3 = vmor %vm1511_vm2, %vm1512_vm1  ;;  %vm1521_vm5 = vweird.f32 %v1490_v21 }
 0x249   : > { %v1507_v37 = vmul.f32 %v3723_v2, %v1506_v22 }
 0x24a   : > { %v1411_v18 = vmul.f32 %v4602_v23, %v4602_v23  ;;  %v1412_v41 = vmul.f32 %v4604_v26, %v4604_v26 }
 0x24b   : > { %v1508_v10 = vmul.f32 0.5, %v1507_v37  ;;  %v1297_v13 = vpop.xlane.xlu2 %1296  ;;  %v1433_v40 = vpop.xlane.xlu0 %1432  ;;  %v4634_v37 = vperm.slane %v1231_v58, 1 }
 0x24c   : > { %v1323_v42 = vmul.f32 0.015625, %v1297_v13  ;;  %v1475_v17 = vmul.f32 0.015625, %v1433_v40  ;;  %v1452_v43 = vadd.f32 %v1412_v41, %v1411_v18  ;;  %v4636_v40 = vperm.slane %v1232_v31, 0 }
 0x24d   : > { %v1509_v44 = vsub.f32 1.5, %v1508_v10 }
 0x24e   : > { %v3725_v47 = vpop.eup %3724  ;;  %v1349_v54 = vsub.f32 %v4421_v25, %v1323_v42  ;;  %v1350_v57 = vsub.f32 %v4424_v55, %v1323_v42  ;;  %v4612_v45 = vadd.f32 1e-05, %v1475_v17  ;;  %1453 = vadd.xlane.f32.xlu1 %v1452_v43  ;;  %v4638_v42 = vperm.slane %v1232_v31, 1 }
 0x24f   : > { %v1510_v59 = vmul.f32 %v3723_v2, %v1509_v44  ;;  %v1516_v60 = vmul.f32 %v3725_v47, %v1490_v21  ;;  %vm1522_vm4 = vweird.f32 %v3725_v47 }
 0x250   : > { %v4618_v1 = vmul.f32 %v4306_v16, %v1349_v54  ;;  %v4620_v6 = vmul.f32 0.0, %v1350_v57  ;;  %3726 = vrsqrt.f32 %v4612_v45  ;;  %vm1523_vm6 = vmor %vm1521_vm5, %vm1522_vm4  ;;  %vm1531_vm7 = vweird.f32 %v4612_v45 }
 0x251   : > { %v1514_v25 = vsel %vm1513_vm3, %v3723_v2, %v1510_v59  ;;  %v1517_v55 = vmul.f32 %v3725_v47, %v1516_v60 }
 0x252   : > { %v1413_v7 = vmul.f32 %v4618_v1, %v4618_v1  ;;  %v1414_v0 = vmul.f32 %v4620_v6, %v4620_v6  ;;  %v1665_v12 = vmul.f32 %v1514_v25, %v4392_v33  ;;  %v1666_v14 = vmul.f32 %v1514_v25, %v4394_v34 }
 0x253   : > { %v1518_v3 = vmul.f32 0.5, %v1517_v55  ;;  %v1436_v22 = vpop.xlane.xlu1 %1435  ;;  %v1300_v2 = vpop.xlane.xlu0 %1299 }
 0x254   : > { %v1476_v18 = vmul.f32 0.015625, %v1436_v22  ;;  %v1324_v41 = vmul.f32 0.015625, %v1300_v2  ;;  %v1455_v10 = vadd.f32 %v1414_v0, %v1413_v7  ;;  %v1702_v57 = vmul.f32 %v4630_v32, %v1665_v12 }
 0x255   : > { %v1519_v13 = vsub.f32 1.5, %v1518_v3  ;;  %v1703_v59 = vmul.f32 %v4634_v37, %v1666_v14 }
 0x256   : > { %v3727_v17 = vpop.eup %3726  ;;  %v4640_v43 = vadd.f32 1e-05, %v1476_v18  ;;  %v1351_v33 = vsub.f32 %v4441_v19, %v1324_v41  ;;  %v1352_v34 = vsub.f32 %v4444_v20, %v1324_v41  ;;  %1456 = vadd.xlane.f32.xlu2 %v1455_v10  ;;  %v1739_v14 = vadd.f32 %v4636_v40, %v1702_v57 }
 0x257   : > { %v1520_v44 = vmul.f32 %v3725_v47, %v1519_v13  ;;  %v1526_v54 = vmul.f32 %v3727_v17, %v4612_v45  ;;  %v1740_v3 = vadd.f32 %v4638_v42, %v1703_v59  ;;  %vm1532_vm8 = vweird.f32 %v3727_v17 }
 0x258   : > { %3728 = vrsqrt.f32 %v4640_v43  ;;  %v4649_v60 = vmul.f32 %v4306_v16, %v1351_v33  ;;  %v4651_v21 = vmul.f32 0.0, %v1352_v34  ;;  %v1771_v57 = vmax.f32 %v1739_v14, 0.0  ;;  %vm1533_vm9 = vmor %vm1531_vm7, %vm1532_vm8 }
 0x259   : > { %v1524_v58 = vsel %vm1523_vm6, %v3725_v47, %v1520_v44  ;;  %v1527_v19 = vmul.f32 %v3727_v17, %v1526_v54  ;;  %vm1541_vm11 = vweird.f32 %v4640_v43 }
 0x25a   : > { %v1667_v20 = vmul.f32 %v1524_v58, %v4412_v49  ;;  %v1668_v25 = vmul.f32 %v1524_v58, %v4414_v50  ;;  %v1415_v55 = vmul.f32 %v4649_v60, %v4649_v60  ;;  %v1416_v7 = vmul.f32 %v4651_v21, %v4651_v21 }
 0x25b   : > { %v1528_v0 = vmul.f32 0.5, %v1527_v19  ;;  %v1439_v31 = vpop.xlane.xlu1 %1438  ;;  %v1303_v12 = vpop.xlane.xlu0 %1302 }
 0x25c   : > { %v1477_v22 = vmul.f32 0.015625, %v1439_v31  ;;  %v1325_v47 = vmul.f32 0.015625, %v1303_v12  ;;  %v1458_v2 = vadd.f32 %v1416_v7, %v1415_v55  ;;  %v1704_v49 = vmul.f32 %v4630_v32, %v1667_v20 }
 0x25d   : > { %v1529_v18 = vsub.f32 1.5, %v1528_v0  ;;  %v1705_v50 = vmul.f32 %v4634_v37, %v1668_v25 }
 0x25e   : > { %v3729_v41 = vpop.eup %3728  ;;  %v4664_v10 = vadd.f32 1e-05, %v1477_v22  ;;  %v1353_v13 = vsub.f32 %v4461_v39, %v1325_v47  ;;  %v1354_v33 = vsub.f32 %v4464_v36, %v1325_v47  ;;  %1459 = vadd.xlane.f32.xlu0 %v1458_v2  ;;  %v1741_v34 = vadd.f32 %v4636_v40, %v1704_v49 }
 0x25f   : > { %v1530_v44 = vmul.f32 %v3727_v17, %v1529_v18  ;;  %v1536_v54 = vmul.f32 %v3729_v41, %v4640_v43  ;;  %v1742_v59 = vadd.f32 %v4638_v42, %v1705_v50  ;;  %v1772_v39 = vmax.f32 %v1740_v3, 0.0 }
 0x260   : > { %3730 = vrsqrt.f32 %v4664_v10  ;;  %v4673_v45 = vmul.f32 %v4306_v16, %v1353_v13  ;;  %v4675_v58 = vmul.f32 0.0, %v1354_v33  ;;  %v1773_v20 = vmax.f32 %v1741_v34, 0.0 }
 0x261   : > { %v1534_v19 = vsel %vm1533_vm9, %v3727_v17, %v1530_v44  ;;  %v1537_v36 = vmul.f32 %v3729_v41, %v1536_v54  ;;  %v1774_v25 = vmax.f32 %v1742_v59, 0.0  ;;  %vm1542_vm10 = vweird.f32 %v3729_v41 }
 0x262   : > { %v1417_v55 = vmul.f32 %v4673_v45, %v4673_v45  ;;  %v1418_v7 = vmul.f32 %v4675_v58, %v4675_v58  ;;  %v1669_v0 = vmul.f32 %v1534_v19, %v4432_v4  ;;  %v1803_v22 = vpack.c.bf16 %v1773_v20, %v1771_v57  ;;  %vm1543_vm12 = vmor %vm1541_vm11, %vm1542_vm10 }
 0x263   : > { %v1538_v31 = vmul.f32 0.5, %v1537_v36  ;;  %v1306_v12 = vpop.xlane.xlu1 %1305  ;;  %v1442_v14 = vpop.xlane.xlu2 %1441  ;;  %v1804_v47 = vpack.c.bf16 %v1774_v25, %v1772_v39  ;;  %v1670_v2 = vmul.f32 %v1534_v19, %v4434_v5  ;;  %vm1551_vm13 = vweird.f32 %v4664_v10 }
 0x264   : > { %v1326_v3 = vmul.f32 0.015625, %v1306_v12  ;;  %v1478_v17 = vmul.f32 0.015625, %v1442_v14  ;;  %v1461_v49 = vadd.f32 %v1418_v7, %v1417_v55  ;;  %1959 = vmatmul.bf16.vlgmr.msrb.gmra.mxu2 %v1803_v22  ;;  %v1706_v44 = vmul.f32 %v4630_v32, %v1669_v0 }
 0x265   : > { %v1539_v18 = vsub.f32 1.5, %v1538_v31  ;;  %2008 = vmatmul.bf16.vlgmr.msrb.gmra.mxu3 %v1804_v47  ;;  %v1707_v54 = vmul.f32 %v4634_v37, %v1670_v2 }
 0x266   : > { %v3731_v50 = vpop.eup %3730  ;;  %v1355_v13 = vsub.f32 %v4481_v61, %v1326_v3  ;;  %v1356_v4 = vsub.f32 %v4484_v62, %v1326_v3  ;;  %v4686_v33 = vadd.f32 1e-05, %v1478_v17  ;;  %1462 = vadd.xlane.f32.xlu1 %v1461_v49  ;;  %v1743_v7 = vadd.f32 %v4636_v40, %v1706_v44 }
 0x267   : > { %v1540_v34 = vmul.f32 %v3729_v41, %v1539_v18  ;;  %v1546_v5 = vmul.f32 %v3731_v50, %v4664_v10  ;;  %v1744_v0 = vadd.f32 %v4638_v42, %v1707_v54  ;;  %vm1552_vm14 = vweird.f32 %v3731_v50 }
 0x268   : > { %v4692_v57 = vmul.f32 %v4306_v16, %v1355_v13  ;;  %v4694_v59 = vmul.f32 0.0, %v1356_v4  ;;  %3732 = vrsqrt.f32 %v4686_v33  ;;  %v1775_v13 = vmax.f32 %v1743_v7, 0.0  ;;  %vm1553_vm15 = vmor %vm1551_vm13, %vm1552_vm14 }
 0x269   : > { %v1544_v61 = vsel %vm1543_vm12, %v3729_v41, %v1540_v34  ;;  %v1547_v62 = vmul.f32 %v3731_v50, %v1546_v5  ;;  %vm1561_vm1 = vweird.f32 %v4686_v33 }
 0x26a   : > { %v1419_v43 = vmul.f32 %v4692_v57, %v4692_v57  ;;  %v1420_v39 = vmul.f32 %v4694_v59, %v4694_v59  ;;  %v1671_v19 = vmul.f32 %v1544_v61, %v4452_v29  ;;  %v1672_v36 = vmul.f32 %v1544_v61, %v4454_v30 }
 0x26b   : > { %v1548_v20 = vmul.f32 0.5, %v1547_v62  ;;  %v1309_v25 = vpop.xlane.xlu1 %1308  ;;  %v1445_v55 = vpop.xlane.xlu2 %1444 }
 0x26c   : > { %v1327_v31 = vmul.f32 0.015625, %v1309_v25  ;;  %v1479_v41 = vmul.f32 0.015625, %v1445_v55  ;;  %v1464_v12 = vadd.f32 %v1420_v39, %v1419_v43  ;;  %v1708_v14 = vmul.f32 %v4630_v32, %v1671_v19 }
 0x26d   : > { %v1549_v22 = vsub.f32 1.5, %v1548_v20  ;;  %v1709_v29 = vmul.f32 %v4634_v37, %v1672_v36 }
 0x26e   : > { %v3733_v47 = vpop.eup %3732  ;;  %v1357_v30 = vsub.f32 %v4513_v28, %v1327_v31  ;;  %v1358_v2 = vsub.f32 %v4516_v35, %v1327_v31  ;;  %v4710_v3 = vadd.f32 1e-05, %v1479_v41  ;;  %1465 = vadd.xlane.f32.xlu2 %v1464_v12  ;;  %v1745_v17 = vadd.f32 %v4636_v40, %v1708_v14 }
 0x26f   : > { %v1550_v49 = vmul.f32 %v3731_v50, %v1549_v22  ;;  %v1556_v18 = vmul.f32 %v3733_v47, %v4686_v33  ;;  %v1746_v4 = vadd.f32 %v4638_v42, %v1709_v29  ;;  %v1776_v28 = vmax.f32 %v1744_v0, 0.0 }
 0x270   : > { %v4716_v10 = vmul.f32 %v4306_v16, %v1357_v30  ;;  %v4718_v34 = vmul.f32 0.0, %v1358_v2  ;;  %3734 = vrsqrt.f32 %v4710_v3  ;;  %v1777_v44 = vmax.f32 %v1745_v17, 0.0 }
 0x271   : > { %v1554_v35 = vsel %vm1553_vm15, %v3731_v50, %v1550_v49  ;;  %v1557_v5 = vmul.f32 %v3733_v47, %v1556_v18  ;;  %v1778_v54 = vmax.f32 %v1746_v4, 0.0  ;;  %vm1562_vm0 = vweird.f32 %v3733_v47 }
 0x272   : > { %v1421_v61 = vmul.f32 %v4716_v10, %v4716_v10  ;;  %v1422_v62 = vmul.f32 %v4718_v34, %v4718_v34  ;;  %v1805_v36 = vpack.c.bf16 %v1777_v44, %v1775_v13  ;;  %v1673_v25 = vmul.f32 %v1554_v35, %v4472_v24  ;;  %vm1563_vm2 = vmor %vm1561_vm1, %vm1562_vm0 }
 0x273   : > { %v1558_v43 = vmul.f32 0.5, %v1557_v5  ;;  %v1312_v39 = vpop.xlane.xlu2 %1311  ;;  %v1448_v19 = vpop.xlane.xlu0 %1447  ;;  %v1806_v20 = vpack.c.bf16 %v1778_v54, %v1776_v28  ;;  %v1674_v50 = vmul.f32 %v1554_v35, %v4474_v56  ;;  %vm1571_vm4 = vweird.f32 %v4710_v3 }
 0x274   : > { %v1328_v55 = vmul.f32 0.015625, %v1312_v39  ;;  %v1480_v7 = vmul.f32 0.015625, %v1448_v19  ;;  %v1467_v0 = vadd.f32 %v1422_v62, %v1421_v61  ;;  %1964 = vmatmul.bf16.gmra.mxu2 %v1805_v36  ;;  %v1710_v30 = vmul.f32 %v4630_v32, %v1673_v25 }
 0x275   : > { %v1559_v31 = vsub.f32 1.5, %v1558_v43  ;;  %2013 = vmatmul.bf16.gmra.mxu3 %v1806_v20 }
 0x276   : > { %v3735_v41 = vpop.eup %3734  ;;  %v1359_v12 = vsub.f32 %v4533_v46, %v1328_v55  ;;  %v1360_v14 = vsub.f32 %v4536_v63, %v1328_v55  ;;  %v1496_v22 = vadd.f32 1e-05, %v1480_v7  ;;  %1468 = vadd.xlane.f32.xlu0 %v1467_v0  ;;  %v1711_v46 = vmul.f32 %v4634_v37, %v1674_v50 }
 0x277   : > { %v1560_v29 = vmul.f32 %v3733_v47, %v1559_v31  ;;  %v1566_v24 = vmul.f32 %v3735_v41, %v4710_v3  ;;  %vm1572_vm3 = vweird.f32 %v3735_v41 }
 0x278   : > { %v4733_v56 = vmul.f32 %v4306_v16, %v1359_v12  ;;  %v4735_v2 = vmul.f32 0.0, %v1360_v14  ;;  %3736 = vrsqrt.f32 %v1496_v22  ;;  %v1747_v16 = vadd.f32 %v4636_v40, %v1710_v30  ;;  %vm1573_vm5 = vmor %vm1571_vm4, %vm1572_vm3 }
 0x279   : > { %v1564_v17 = vsel %vm1563_vm2, %v3733_v47, %v1560_v29  ;;  %v1567_v63 = vmul.f32 %v3735_v41, %v1566_v24  ;;  %v1748_v47 = vadd.f32 %v4638_v42, %v1711_v46  ;;  %vm1581_vm7 = vweird.f32 %v1496_v22 }
 0x27a   : > { %v1423_v49 = vmul.f32 %v4733_v56, %v4733_v56  ;;  %v1424_v33 = vmul.f32 %v4735_v2, %v4735_v2  ;;  %v1675_v18 = vmul.f32 %v1564_v17, %v4498_v52  ;;  %v1676_v13 = vmul.f32 %v1564_v17, %v4500_v53 }
 0x27b   : > { %v1568_v4 = vmul.f32 0.5, %v1567_v63  ;;  %v1779_v43 = vmax.f32 %v1747_v16, 0.0  ;;  %v1780_v19 = vmax.f32 %v1748_v47, 0.0 }
 0x27c   : > { %v1470_v28 = vadd.f32 %v1424_v33, %v1423_v49  ;;  %v1712_v35 = vmul.f32 %v4630_v32, %v1675_v18  ;;  %v1713_v5 = vmul.f32 %v4634_v37, %v1676_v13 }
 0x27d   : > { %v1569_v44 = vsub.f32 1.5, %v1568_v4 }
 0x27e   : > { %v3737_v54 = vpop.eup %3736  ;;  %1471 = vadd.xlane.f32.xlu1 %v1470_v28  ;;  %v1749_v61 = vadd.f32 %v4636_v40, %v1712_v35  ;;  %v1750_v52 = vadd.f32 %v4638_v42, %v1713_v5 }
 0x27f   : > { %v1570_v62 = vmul.f32 %v3735_v41, %v1569_v44  ;;  %v1576_v53 = vmul.f32 %v3737_v54, %v1496_v22  ;;  %vm1582_vm6 = vweird.f32 %v3737_v54 }
 0x280   : > { %v1781_v39 = vmax.f32 %v1749_v61, 0.0  ;;  %v1782_v36 = vmax.f32 %v1750_v52, 0.0  ;;  %vm1583_vm8 = vmor %vm1581_vm7, %vm1582_vm6 }
 0x281   : > { %v1574_v20 = vsel %vm1573_vm5, %v3735_v41, %v1570_v62  ;;  %v1577_v25 = vmul.f32 %v3737_v54, %v1576_v53  ;;  %vm1004_vm5 = vcmp.lt.s32.totalorder %v4295_v9, 32 }
 0x282   : > { %v1807_v55 = vpack.c.bf16 %v1781_v39, %v1779_v43  ;;  %v1808_v7 = vpack.c.bf16 %v1782_v36, %v1780_v19  ;;  %v1677_v50 = vmul.f32 %v1574_v20, %v4524_v48  ;;  %v1678_v31 = vmul.f32 %v1574_v20, %v4526_v51 }
 0x283   : > { %v1578_v0 = vmul.f32 0.5, %v1577_v25 }
 0x284   : > { %1969 = vmatmul.bf16.gmra.mxu2 %v1807_v55  ;;  %v1714_v14 = vmul.f32 %v4630_v32, %v1677_v50  ;;  %v1715_v29 = vmul.f32 %v4634_v37, %v1678_v31 }
 0x285   : > { %v1579_v12 = vsub.f32 1.5, %v1578_v0  ;;  %2018 = vmatmul.bf16.gmra.mxu3 %v1808_v7 }
 0x286   : > { %v1751_v51 = vadd.f32 %v4636_v40, %v1714_v14  ;;  %v1752_v17 = vadd.f32 %v4638_v42, %v1715_v29 }
 0x287   : > { %v1580_v3 = vmul.f32 %v3737_v54, %v1579_v12 }
 0x288   : > { %v1783_v49 = vmax.f32 %v1751_v51, 0.0  ;;  %v1784_v18 = vmax.f32 %v1752_v17, 0.0 }
 0x289   : > { %v1584_v41 = vsel %vm1583_vm8, %v3737_v54, %v1580_v3 }
 0x28a   : > { %v1679_v24 = vmul.f32 %v1584_v41, %v4544_v8  ;;  %v1680_v30 = vmul.f32 %v1584_v41, %v4546_v11  ;;  %v1451_v11 = vpop.xlane.xlu0 %1450 }
 0x28b   : > { %v1481_v16 = vmul.f32 0.015625, %v1451_v11 }
 0x28c   : > { %v1716_v48 = vmul.f32 %v4630_v32, %v1679_v24  ;;  %v1717_v46 = vmul.f32 %v4634_v37, %v1680_v30 }
 0x28d   : > { %v1497_v28 = vadd.f32 1e-05, %v1481_v16 }
 0x28e   : > { %v1753_v22 = vadd.f32 %v4636_v40, %v1716_v48  ;;  %v1754_v63 = vadd.f32 %v4638_v42, %v1717_v46 }
 0x28f   : > { %3738 = vrsqrt.f32 %v1497_v28  ;;  %vm1591_vm10 = vweird.f32 %v1497_v28 }
 0x290   : > { %v1785_v33 = vmax.f32 %v1753_v22, 0.0  ;;  %v1786_v13 = vmax.f32 %v1754_v63, 0.0 }
 0x292   : > { %v1809_v4 = vpack.c.bf16 %v1785_v33, %v1783_v49  ;;  %v1810_v8 = vpack.c.bf16 %v1786_v13, %v1784_v18 }
 0x294   : > { %1974 = vmatmul.bf16.gmra.mxu2 %v1809_v4 }
 0x295   : > { %2023 = vmatmul.bf16.gmra.mxu3 %v1810_v8  ;;  %v3739_v35 = vpop.eup %3738 }
 0x296   : > { %v1586_v5 = vmul.f32 %v3739_v35, %v1497_v28  ;;  %vm1592_vm9 = vweird.f32 %v3739_v35 }
 0x297   : > { %vm1593_vm11 = vmor %vm1591_vm10, %vm1592_vm9 }
 0x298   : > { %v1587_v47 = vmul.f32 %v3739_v35, %v1586_v5 }
 0x29a   : > { %v1588_v54 = vmul.f32 0.5, %v1587_v47 }
 0x29c   : > { %v1589_v62 = vsub.f32 1.5, %v1588_v54 }
 0x29e   : > { %v1590_v43 = vmul.f32 %v3739_v35, %v1589_v62 }
 0x2a0   : > { %v1594_v25 = vsel %vm1593_vm11, %v3739_v35, %v1590_v43 }
 0x2a1   : > { %v1681_v7 = vmul.f32 %v1594_v25, %v4555_v27  ;;  %v1682_v31 = vmul.f32 %v1594_v25, %v4557_v38 }
 0x2a3   : > { %v1718_v30 = vmul.f32 %v4630_v32, %v1681_v7  ;;  %v1719_v48 = vmul.f32 %v4634_v37, %v1682_v31 }
 0x2a5   : > { %v1755_v63 = vadd.f32 %v4636_v40, %v1718_v30  ;;  %v1756_v13 = vadd.f32 %v4638_v42, %v1719_v48 }
 0x2a7   : > { %v1787_v35 = vmax.f32 %v1755_v63, 0.0  ;;  %v1788_v47 = vmax.f32 %v1756_v13, 0.0 }
 0x2c1   : > { %v1454_v44 = vpop.xlane.xlu1 %1453 }
 0x2c2   : > { %v1482_v61 = vmul.f32 0.015625, %v1454_v44 }
 0x2c4   : > { %v1498_v52 = vadd.f32 1e-05, %v1482_v61 }
 0x2c6   : > { %3740 = vrsqrt.f32 %v1498_v52  ;;  %vm1601_vm13 = vweird.f32 %v1498_v52 }
 0x2c9   : > { %v1457_v53 = vpop.xlane.xlu2 %1456 }
 0x2ca   : > { %v1483_v39 = vmul.f32 0.015625, %v1457_v53 }
 0x2cc   : > { %v3741_v19 = vpop.eup %3740  ;;  %v1499_v36 = vadd.f32 1e-05, %v1483_v39 }
 0x2cd   : > { %v1596_v20 = vmul.f32 %v3741_v19, %v1498_v52  ;;  %vm1602_vm12 = vweird.f32 %v3741_v19 }
 0x2ce   : > { %3742 = vrsqrt.f32 %v1499_v36  ;;  %vm1603_vm14 = vmor %vm1601_vm13, %vm1602_vm12  ;;  %vm1611_vm0 = vweird.f32 %v1499_v36 }
 0x2cf   : > { %v1597_v55 = vmul.f32 %v3741_v19, %v1596_v20 }
 0x2d1   : > { %v1598_v0 = vmul.f32 0.5, %v1597_v55  ;;  %v1460_v50 = vpop.xlane.xlu0 %1459 }
 0x2d2   : > { %v1484_v12 = vmul.f32 0.015625, %v1460_v50 }
 0x2d3   : > { %v1599_v3 = vsub.f32 1.5, %v1598_v0 }
 0x2d4   : > { %v3743_v14 = vpop.eup %3742  ;;  %v1500_v29 = vadd.f32 1e-05, %v1484_v12 }
 0x2d5   : > { %v1600_v41 = vmul.f32 %v3741_v19, %v1599_v3  ;;  %v1606_v24 = vmul.f32 %v3743_v14, %v1499_v36  ;;  %vm1612_vm15 = vweird.f32 %v3743_v14 }
 0x2d6   : > { %3744 = vrsqrt.f32 %v1500_v29  ;;  %vm1613_vm1 = vmor %vm1611_vm0, %vm1612_vm15  ;;  %vm1621_vm3 = vweird.f32 %v1500_v29 }
 0x2d7   : > { %v1604_v51 = vsel %vm1603_vm14, %v3741_v19, %v1600_v41  ;;  %v1607_v27 = vmul.f32 %v3743_v14, %v1606_v24 }
 0x2d8   : > { %v1683_v46 = vmul.f32 %v1604_v51, %v4602_v23  ;;  %v1684_v38 = vmul.f32 %v1604_v51, %v4604_v26  ;;  %v4796_v51 = vsel %vm1004_vm5, 1.0, %v3844_v15 }
 0x2d9   : > { %v1608_v17 = vmul.f32 0.5, %v1607_v27  ;;  %v1463_v22 = vpop.xlane.xlu1 %1462 }
 0x2da   : > { %v1485_v49 = vmul.f32 0.015625, %v1463_v22  ;;  %v1720_v33 = vmul.f32 %v4630_v32, %v1683_v46  ;;  %v1721_v18 = vmul.f32 %v4634_v37, %v1684_v38 }
 0x2db   : > { %v1609_v4 = vsub.f32 1.5, %v1608_v17 }
 0x2dc   : > { %v3745_v8 = vpop.eup %3744  ;;  %v4773_v11 = vadd.f32 1e-05, %v1485_v49  ;;  %v1757_v23 = vadd.f32 %v4636_v40, %v1720_v33  ;;  %v1758_v26 = vadd.f32 %v4638_v42, %v1721_v18 }
 0x2dd   : > { %v1610_v16 = vmul.f32 %v3743_v14, %v1609_v4  ;;  %v1616_v28 = vmul.f32 %v3745_v8, %v1500_v29  ;;  %vm1622_vm2 = vweird.f32 %v3745_v8 }
 0x2de   : > { %3746 = vrsqrt.f32 %v4773_v11  ;;  %v1789_v5 = vmax.f32 %v1757_v23, 0.0  ;;  %v1790_v44 = vmax.f32 %v1758_v26, 0.0  ;;  %vm1623_vm4 = vmor %vm1621_vm3, %vm1622_vm2  ;;  %vm1631_vm7 = vweird.f32 %v4773_v11 }
 0x2df   : > { %v1614_v54 = vsel %vm1613_vm1, %v3743_v14, %v1610_v16  ;;  %v1617_v61 = vmul.f32 %v3745_v8, %v1616_v28 }
 0x2e0   : > { %v1811_v52 = vpack.c.bf16 %v1789_v5, %v1787_v35  ;;  %v1812_v62 = vpack.c.bf16 %v1790_v44, %v1788_v47  ;;  %v1685_v53 = vmul.f32 %v1614_v54, %v4618_v1  ;;  %v1686_v19 = vmul.f32 %v1614_v54, %v4620_v6  ;;  %v4786_v1 = vld [vmem:[%s5710_s8] ss:$0 sm:$0xff] }
 0x2e1   : > { %v1618_v43 = vmul.f32 0.5, %v1617_v61  ;;  %v1466_v39 = vpop.xlane.xlu2 %1465 }
 0x2e2   : > { %v1486_v20 = vmul.f32 0.015625, %v1466_v39  ;;  %1979 = vmatmul.bf16.gmra.mxu2 %v1811_v52  ;;  %2028 = vmatmul.bf16.gmra.mxu3 %v1812_v62  ;;  %v1722_v50 = vmul.f32 %v4630_v32, %v1685_v53  ;;  %v1723_v6 = vmul.f32 %v4634_v37, %v1686_v19 }
 0x2e3   : > { %v1619_v36 = vsub.f32 1.5, %v1618_v43 }
 0x2e4   : > { %v3747_v25 = vpop.eup %3746  ;;  %v4780_v55 = vadd.f32 1e-05, %v1486_v20  ;;  %v1759_v27 = vadd.f32 %v4636_v40, %v1722_v50 }
 0x2e5   : > { %v1620_v7 = vmul.f32 %v3745_v8, %v1619_v36  ;;  %v1626_v0 = vmul.f32 %v3747_v25, %v4773_v11  ;;  %vm1632_vm6 = vweird.f32 %v3747_v25 }
 0x2e6   : > { %3748 = vrsqrt.f32 %v4780_v55  ;;  %v1791_v4 = vmax.f32 %v1759_v27, 0.0  ;;  %vm1633_vm8 = vmor %vm1631_vm7, %vm1632_vm6  ;;  %vm1641_vm10 = vweird.f32 %v4780_v55 }
 0x2e7   : > { %v1624_v31 = vsel %vm1623_vm4, %v3745_v8, %v1620_v7  ;;  %v1627_v12 = vmul.f32 %v3747_v25, %v1626_v0  ;;  %v1960_v29 = vpop.f32.mrf.mxu2 }
 0x2e8   : > { %v1687_v3 = vmul.f32 %v1624_v31, %v4649_v60  ;;  %v1688_v14 = vmul.f32 %v1624_v31, %v4651_v21  ;;  %v2009_v41 = vpop.f32.mrf.mxu3  ;;  %v1961_v30 = vadd.f32 %v4786_v1, %v1960_v29  ;;  %v1760_v60 = vadd.f32 %v4638_v42, %v1723_v6 }
 0x2e9   : > { %v1628_v24 = vmul.f32 0.5, %v1627_v12  ;;  %v1469_v48 = vpop.xlane.xlu0 %1468 }
 0x2ea   : > { %v1487_v9 = vmul.f32 0.015625, %v1469_v48  ;;  %v1724_v46 = vmul.f32 %v4630_v32, %v1687_v3  ;;  %v1725_v38 = vmul.f32 %v4634_v37, %v1688_v14  ;;  %v4802_v21 = vadd.f32 %v2009_v41, %v1961_v30 }
 0x2eb   : > { %v1629_v17 = vsub.f32 1.5, %v1628_v24  ;;  %v1792_v23 = vmax.f32 %v1760_v60, 0.0 }
 0x2ec   : > { %v3749_v22 = vpop.eup %3748  ;;  %v4805_v63 = vadd.f32 1e-05, %v1487_v9  ;;  %v1761_v15 = vadd.f32 %v4636_v40, %v1724_v46  ;;  %v1762_v49 = vadd.f32 %v4638_v42, %v1725_v38  ;;  %v2051_v13 = vmul.f32 %v4796_v51, %v4802_v21 }
 0x2ed   : > { %v1630_v33 = vmul.f32 %v3747_v25, %v1629_v17  ;;  %v1636_v18 = vmul.f32 %v3749_v22, %v4780_v55  ;;  %vm1642_vm9 = vweird.f32 %v3749_v22 }
 0x2ee   : > { %3750 = vrsqrt.f32 %v4805_v63  ;;  %v1793_v8 = vmax.f32 %v1761_v15, 0.0  ;;  %v1794_v26 = vmax.f32 %v1762_v49, 0.0  ;;  %2067 = vadd.xlane.f32.xlu2 %v2051_v13  ;;  %vm1643_vm11 = vmor %vm1641_vm10, %vm1642_vm9  ;;  %vm1651_vm13 = vweird.f32 %v4805_v63 }
 0x2ef   : > { %v1634_v11 = vsel %vm1633_vm8, %v3747_v25, %v1630_v33  ;;  %v1637_v16 = vmul.f32 %v3749_v22, %v1636_v18  ;;  %v1962_v28 = vpop.f32.mrf.mxu2 }
 0x2f0   : > { %v2011_v35 = vpop.f32.mrf.mxu3  ;;  %v1813_v5 = vpack.c.bf16 %v1793_v8, %v1791_v4  ;;  %v1814_v47 = vpack.c.bf16 %v1794_v26, %v1792_v23  ;;  %v1963_v54 = vadd.f32 %v4786_v1, %v1962_v28  ;;  %v1689_v52 = vmul.f32 %v1634_v11, %v4673_v45 }
 0x2f1   : > { %v1638_v44 = vmul.f32 0.5, %v1637_v16  ;;  %v1472_v61 = vpop.xlane.xlu1 %1471  ;;  %v1690_v62 = vmul.f32 %v1634_v11, %v4675_v58 }
 0x2f2   : > { %v1488_v53 = vmul.f32 0.015625, %v1472_v61  ;;  %1984 = vmatmul.bf16.gmra.mxu2 %v1813_v5  ;;  %2033 = vmatmul.bf16.gmra.mxu3 %v1814_v47  ;;  %v4816_v39 = vadd.f32 %v2011_v35, %v1963_v54  ;;  %v1726_v45 = vmul.f32 %v4630_v32, %v1689_v52 }
 0x2f3   : > { %v1639_v43 = vsub.f32 1.5, %v1638_v44  ;;  %v1727_v58 = vmul.f32 %v4634_v37, %v1690_v62 }
 0x2f4   : > { %v3751_v19 = vpop.eup %3750  ;;  %v1504_v20 = vadd.f32 1e-05, %v1488_v53  ;;  %v2052_v7 = vmul.f32 %v4796_v51, %v4816_v39  ;;  %v1763_v41 = vadd.f32 %v4636_v40, %v1726_v45 }
 0x2f5   : > { %v1640_v36 = vmul.f32 %v3749_v22, %v1639_v43  ;;  %v1646_v25 = vmul.f32 %v3751_v19, %v4805_v63  ;;  %v1764_v30 = vadd.f32 %v4638_v42, %v1727_v58  ;;  %vm1652_vm12 = vweird.f32 %v3751_v19 }
 0x2f6   : > { %3752 = vrsqrt.f32 %v1504_v20  ;;  %2069 = vadd.xlane.f32.xlu0 %v2052_v7  ;;  %vm1653_vm14 = vmor %vm1651_vm13, %vm1652_vm12  ;;  %v1795_v17 = vmax.f32 %v1763_v41, 0.0  ;;  %vm1661_vm0 = vweird.f32 %v1504_v20 }
 0x2f7   : > { %v1644_v0 = vsel %vm1643_vm11, %v3749_v22, %v1640_v36  ;;  %v1647_v50 = vmul.f32 %v3751_v19, %v1646_v25  ;;  %v1965_v12 = vpop.f32.mrf.mxu2  ;;  %v1796_v15 = vmax.f32 %v1764_v30, 0.0 }
 0x2f8   : > { %v1691_v6 = vmul.f32 %v1644_v0, %v4692_v57  ;;  %v1692_v31 = vmul.f32 %v1644_v0, %v4694_v59  ;;  %v2014_v55 = vpop.f32.mrf.mxu3  ;;  %v1966_v14 = vadd.f32 %v4786_v1, %v1965_v12 }
 0x2f9   : > { %v1648_v3 = vmul.f32 0.5, %v1647_v50 }
 0x2fa   : > { %v1728_v29 = vmul.f32 %v4630_v32, %v1691_v6  ;;  %v1729_v24 = vmul.f32 %v4634_v37, %v1692_v31  ;;  %v4831_v27 = vadd.f32 %v2014_v55, %v1966_v14 }
 0x2fb   : > { %v1649_v48 = vsub.f32 1.5, %v1648_v3 }
 0x2fc   : > { %v3753_v57 = vpop.eup %3752  ;;  %v1765_v59 = vadd.f32 %v4636_v40, %v1728_v29  ;;  %v1766_v9 = vadd.f32 %v4638_v42, %v1729_v24  ;;  %v2053_v60 = vmul.f32 %v4796_v51, %v4831_v27 }
 0x2fd   : > { %v1650_v46 = vmul.f32 %v3751_v19, %v1649_v48  ;;  %v1656_v38 = vmul.f32 %v3753_v57, %v1504_v20  ;;  %vm1662_vm15 = vweird.f32 %v3753_v57 }
 0x2fe   : > { %v1797_v22 = vmax.f32 %v1765_v59, 0.0  ;;  %v1798_v49 = vmax.f32 %v1766_v9, 0.0  ;;  %2071 = vadd.xlane.f32.xlu1 %v2053_v60  ;;  %vm1663_vm1 = vmor %vm1661_vm0, %vm1662_vm15 }
 0x2ff   : > { %v1654_v33 = vsel %vm1653_vm14, %v3751_v19, %v1650_v46  ;;  %v1657_v18 = vmul.f32 %v3753_v57, %v1656_v38  ;;  %v1967_v13 = vpop.f32.mrf.mxu2 }
 0x300   : > { %v2016_v4 = vpop.f32.mrf.mxu3  ;;  %v1815_v8 = vpack.c.bf16 %v1797_v22, %v1795_v17  ;;  %v1816_v23 = vpack.c.bf16 %v1798_v49, %v1796_v15  ;;  %v1968_v11 = vadd.f32 %v4786_v1, %v1967_v13  ;;  %v1693_v63 = vmul.f32 %v1654_v33, %v4716_v10 }
 0x301   : > { %v1658_v26 = vmul.f32 0.5, %v1657_v18  ;;  %v1694_v16 = vmul.f32 %v1654_v33, %v4718_v34 }
 0x302   : > { %1989 = vmatmul.bf16.gmra.mxu2 %v1815_v8  ;;  %2038 = vmatmul.bf16.gmra.mxu3 %v1816_v23  ;;  %v4841_v35 = vadd.f32 %v2016_v4, %v1968_v11  ;;  %v1730_v44 = vmul.f32 %v4630_v32, %v1693_v63 }
 0x303   : > { %v1659_v28 = vsub.f32 1.5, %v1658_v26  ;;  %v1731_v54 = vmul.f32 %v4634_v37, %v1694_v16 }
 0x304   : > { %v2054_v47 = vmul.f32 %v4796_v51, %v4841_v35  ;;  %v1767_v19 = vadd.f32 %v4636_v40, %v1730_v44 }
 0x305   : > { %v1660_v5 = vmul.f32 %v3753_v57, %v1659_v28  ;;  %v1768_v36 = vadd.f32 %v4638_v42, %v1731_v54 }
 0x306   : > { %2073 = vadd.xlane.f32.xlu2 %v2054_v47  ;;  %v1799_v45 = vmax.f32 %v1767_v19, 0.0 }
 0x307   : > { %v1664_v61 = vsel %vm1663_vm1, %v3753_v57, %v1660_v5  ;;  %v1970_v52 = vpop.f32.mrf.mxu2  ;;  %v1800_v0 = vmax.f32 %v1768_v36, 0.0 }
 0x308   : > { %v1695_v10 = vmul.f32 %v1664_v61, %v4733_v56  ;;  %v1696_v34 = vmul.f32 %v1664_v61, %v4735_v2  ;;  %v2019_v62 = vpop.f32.mrf.mxu3  ;;  %v1971_v53 = vadd.f32 %v4786_v1, %v1970_v52 }
 0x30a   : > { %v1732_v43 = vmul.f32 %v4630_v32, %v1695_v10  ;;  %v1733_v20 = vmul.f32 %v4634_v37, %v1696_v34  ;;  %v4854_v25 = vadd.f32 %v2019_v62, %v1971_v53 }
 0x30c   : > { %v1769_v7 = vadd.f32 %v4636_v40, %v1732_v43  ;;  %v1770_v56 = vadd.f32 %v4638_v42, %v1733_v20  ;;  %v2055_v2 = vmul.f32 %v4796_v51, %v4854_v25 }
 0x30e   : > { %v1801_v58 = vmax.f32 %v1769_v7, 0.0  ;;  %v1802_v50 = vmax.f32 %v1770_v56, 0.0  ;;  %2075 = vadd.xlane.f32.xlu0 %v2055_v2 }
 0x30f   : > { %v1972_v32 = vpop.f32.mrf.mxu2 }
 0x310   : > { %v2021_v6 = vpop.f32.mrf.mxu3  ;;  %v1817_v31 = vpack.c.bf16 %v1801_v58, %v1799_v45  ;;  %v1818_v37 = vpack.c.bf16 %v1802_v50, %v1800_v0  ;;  %v1973_v12 = vadd.f32 %v4786_v1, %v1972_v32 }
 0x312   : > { %1994 = vmatmul.bf16.gmra.mxu2 %v1817_v31  ;;  %2043 = vmatmul.bf16.gmra.mxu3 %v1818_v37  ;;  %v4861_v55 = vadd.f32 %v2021_v6, %v1973_v12 }
 0x314   : > { %v2056_v40 = vmul.f32 %v4796_v51, %v4861_v55 }
 0x316   : > { %2077 = vadd.xlane.f32.xlu1 %v2056_v40 }
 0x317   : > { %v1975_v42 = vpop.f32.mrf.mxu2 }
 0x318   : > { %v2024_v3 = vpop.f32.mrf.mxu3  ;;  %v1976_v14 = vadd.f32 %v4786_v1, %v1975_v42 }
 0x31a   : > { %v4866_v29 = vadd.f32 %v2024_v3, %v1976_v14 }
 0x31c   : > { %v2057_v41 = vmul.f32 %v4796_v51, %v4866_v29 }
 0x31e   : > { %2079 = vadd.xlane.f32.xlu2 %v2057_v41 }
 0x31f   : > { %v1977_v24 = vpop.f32.mrf.mxu2 }
 0x320   : > { %v1978_v30 = vadd.f32 %v4786_v1, %v1977_v24  ;;  %v2026_v48 = vpop.f32.mrf.mxu3 }
 0x322   : > { %v4871_v57 = vadd.f32 %v2026_v48, %v1978_v30 }
 0x324   : > { %v2058_v59 = vmul.f32 %v4796_v51, %v4871_v57 }
 0x326   : > { %2081 = vadd.xlane.f32.xlu0 %v2058_v59 }
 0x361   : > { %v2068_v34 = vpop.xlane.xlu2 %2067 }
 0x362   : > { %v2099_v53 = vmul.f32 0.03125, %v2068_v34 }
 0x364   : > { %v2115_v20 = vsub.f32 %v4802_v21, %v2099_v53 }
 0x365   : > { %v1980_v9 = vpop.f32.mrf.mxu2  ;;  %v2029_v46 = vpop.f32.mrf.mxu3 }
 0x366   : > { %v1981_v38 = vadd.f32 %v4786_v1, %v1980_v9  ;;  %v4908_v50 = vmul.f32 %v4796_v51, %v2115_v20 }
 0x368   : > { %v4876_v60 = vadd.f32 %v2029_v46, %v1981_v38  ;;  %v2147_v21 = vmul.f32 %v4908_v50, %v4908_v50 }
 0x369   : > { %v2070_v56 = vpop.xlane.xlu0 %2069 }
 0x36a   : > { %v2059_v17 = vmul.f32 %v4796_v51, %v4876_v60  ;;  %v2100_v32 = vmul.f32 0.03125, %v2070_v56 }
 0x36c   : > { %2083 = vadd.xlane.f32.xlu1 %v2059_v17  ;;  %v2116_v12 = vsub.f32 %v4816_v39, %v2100_v32 }
 0x36d   : > { %v1982_v22 = vpop.f32.mrf.mxu2  ;;  %v2031_v15 = vpop.f32.mrf.mxu3 }
 0x36e   : > { %v1983_v49 = vadd.f32 %v4786_v1, %v1982_v22  ;;  %v4923_v9 = vmul.f32 %v4796_v51, %v2116_v12 }
 0x370   : > { %v4881_v33 = vadd.f32 %v2031_v15, %v1983_v49  ;;  %v2148_v49 = vmul.f32 %v4923_v9, %v4923_v9 }
 0x371   : > { %v2072_v40 = vpop.xlane.xlu1 %2071 }
 0x372   : > { %v2060_v18 = vmul.f32 %v4796_v51, %v4881_v33  ;;  %v2101_v41 = vmul.f32 0.03125, %v2072_v40 }
 0x374   : > { %2085 = vadd.xlane.f32.xlu2 %v2060_v18  ;;  %v2117_v39 = vsub.f32 %v4831_v27, %v2101_v41 }
 0x375   : > { %v1985_v13 = vpop.f32.mrf.mxu2  ;;  %v2034_v4 = vpop.f32.mrf.mxu3 }
 0x376   : > { %v1986_v8 = vadd.f32 %v4786_v1, %v1985_v13 }
 0x378   : > { %v4886_v23 = vadd.f32 %v2034_v4, %v1986_v8 }
 0x379   : > { %v2074_v7 = vpop.xlane.xlu2 %2073 }
 0x37a   : > { %v2061_v26 = vmul.f32 %v4796_v51, %v4886_v23  ;;  %v2102_v58 = vmul.f32 0.03125, %v2074_v7 }
 0x37c   : > { %2087 = vadd.xlane.f32.xlu0 %v2061_v26  ;;  %v2118_v31 = vsub.f32 %v4841_v35, %v2102_v58 }
 0x37d   : > { %v1987_v11 = vpop.f32.mrf.mxu2  ;;  %v2036_v63 = vpop.f32.mrf.mxu3 }
 0x37e   : > { %v1988_v16 = vadd.f32 %v4786_v1, %v1987_v11  ;;  %v4920_v35 = vmul.f32 %v4796_v51, %v2118_v31 }
 0x380   : > { %v4891_v28 = vadd.f32 %v2036_v63, %v1988_v16  ;;  %v2150_v17 = vmul.f32 %v4920_v35, %v4920_v35 }
 0x381   : > { %v2076_v3 = vpop.xlane.xlu0 %2075 }
 0x382   : > { %v2062_v5 = vmul.f32 %v4796_v51, %v4891_v28  ;;  %v2103_v48 = vmul.f32 0.03125, %v2076_v3 }
 0x384   : > { %2089 = vadd.xlane.f32.xlu1 %v2062_v5  ;;  %v2119_v22 = vsub.f32 %v4854_v25, %v2103_v48 }
 0x385   : > { %v1990_v47 = vpop.f32.mrf.mxu2  ;;  %v2039_v44 = vpop.f32.mrf.mxu3 }
 0x386   : > { %v1991_v54 = vadd.f32 %v4786_v1, %v1990_v47  ;;  %v4943_v8 = vmul.f32 %v4796_v51, %v2119_v22 }
 0x388   : > { %v4896_v61 = vadd.f32 %v2039_v44, %v1991_v54  ;;  %v2151_v16 = vmul.f32 %v4943_v8, %v4943_v8 }
 0x389   : > { %v2078_v15 = vpop.xlane.xlu1 %2077 }
 0x38a   : > { %v2063_v10 = vmul.f32 %v4796_v51, %v4896_v61  ;;  %v2104_v13 = vmul.f32 0.03125, %v2078_v15 }
 0x38c   : > { %2091 = vadd.xlane.f32.xlu2 %v2063_v10  ;;  %v2120_v25 = vsub.f32 %v4861_v55, %v2104_v13 }
 0x38d   : > { %v1992_v52 = vpop.f32.mrf.mxu2  ;;  %v2041_v62 = vpop.f32.mrf.mxu3 }
 0x38e   : > { %v1993_v43 = vadd.f32 %v4786_v1, %v1992_v52  ;;  %v4954_v5 = vmul.f32 %v4796_v51, %v2120_v25 }
 0x390   : > { %v4901_v19 = vadd.f32 %v2041_v62, %v1993_v43  ;;  %v2152_v55 = vmul.f32 %v4954_v5, %v4954_v5 }
 0x391   : > { %v2080_v42 = vpop.xlane.xlu2 %2079 }
 0x392   : > { %v2064_v36 = vmul.f32 %v4796_v51, %v4901_v19  ;;  %v2105_v24 = vmul.f32 0.03125, %v2080_v42 }
 0x394   : > { %2093 = vadd.xlane.f32.xlu0 %v2064_v36  ;;  %v2121_v38 = vsub.f32 %v4866_v29, %v2105_v24  ;;  %v4940_v29 = vmul.f32 %v4796_v51, %v2117_v39 }
 0x395   : > { %v1995_v2 = vpop.f32.mrf.mxu2  ;;  %v2044_v45 = vpop.f32.mrf.mxu3 }
 0x396   : > { %v1996_v0 = vadd.f32 %v4786_v1, %v1995_v2  ;;  %v4937_v27 = vmul.f32 %v4796_v51, %v2121_v38  ;;  %v2149_v11 = vmul.f32 %v4940_v29, %v4940_v29 }
 0x398   : > { %v4910_v6 = vadd.f32 %v2044_v45, %v1996_v0  ;;  %v2153_v26 = vmul.f32 %v4937_v27, %v4937_v27 }
 0x399   : > { %v2082_v18 = vpop.xlane.xlu0 %2081 }
 0x39a   : > { %v2065_v37 = vmul.f32 %v4796_v51, %v4910_v6  ;;  %v2106_v4 = vmul.f32 0.03125, %v2082_v18 }
 0x39c   : > { %2163 = vadd.xlane.f32.xlu0 %v2147_v21  ;;  %2095 = vadd.xlane.f32.xlu1 %v2065_v37  ;;  %v2122_v63 = vsub.f32 %v4871_v57, %v2106_v4 }
 0x39d   : > { %v1997_v14 = vpop.f32.mrf.mxu2  ;;  %v2046_v59 = vpop.f32.mrf.mxu3 }
 0x39e   : > { %v1998_v30 = vadd.f32 %v4786_v1, %v1997_v14  ;;  %v4957_v47 = vmul.f32 %v4796_v51, %v2122_v63 }
 0x3a0   : > { %v4925_v46 = vadd.f32 %v2046_v59, %v1998_v30  ;;  %v2154_v44 = vmul.f32 %v4957_v47, %v4957_v47 }
 0x3a2   : > { %v2066_v1 = vmul.f32 %v4796_v51, %v4925_v46 }
 0x3a4   : > { %2169 = vadd.xlane.f32.xlu0 %v2150_v17  ;;  %2097 = vadd.xlane.f32.xlu2 %v2066_v1 }
 0x3a5   : > { %2165 = vadd.xlane.f32.xlu1 %v2148_v49 }
 0x3ac   : > { %2175 = vadd.xlane.f32.xlu0 %v2153_v26  ;;  %2167 = vadd.xlane.f32.xlu2 %v2149_v11 }
 0x3ad   : > { %2171 = vadd.xlane.f32.xlu1 %v2151_v16 }
 0x3b4   : > { %2173 = vadd.xlane.f32.xlu2 %v2152_v55 }
 0x3b5   : > { %2177 = vadd.xlane.f32.xlu1 %v2154_v44 }
 0x3df   : > { %v2084_v57 = vpop.xlane.xlu1 %2083 }
 0x3e0   : > { %v2107_v54 = vmul.f32 0.03125, %v2084_v57 }
 0x3e2   : > { %v2123_v10 = vsub.f32 %v4876_v60, %v2107_v54 }
 0x3e4   : > { %v4965_v34 = vmul.f32 %v4796_v51, %v2123_v10 }
 0x3e6   : > { %v2155_v52 = vmul.f32 %v4965_v34, %v4965_v34 }
 0x3e7   : > { %v2086_v62 = vpop.xlane.xlu2 %2085 }
 0x3e8   : > { %v2108_v53 = vmul.f32 0.03125, %v2086_v62  ;;  %2179 = vadd.xlane.f32.xlu2 %v2155_v52 }
 0x3ea   : > { %v2124_v43 = vsub.f32 %v4881_v33, %v2108_v53 }
 0x3ec   : > { %v4971_v20 = vmul.f32 %v4796_v51, %v2124_v43 }
 0x3ee   : > { %v2156_v36 = vmul.f32 %v4971_v20, %v4971_v20 }
 0x3ef   : > { %v2088_v7 = vpop.xlane.xlu0 %2087 }
 0x3f0   : > { %v2109_v56 = vmul.f32 0.03125, %v2088_v7  ;;  %2181 = vadd.xlane.f32.xlu0 %v2156_v36 }
 0x3f2   : > { %v2125_v60 = vsub.f32 %v4886_v23, %v2109_v56 }
 0x3f4   : > { %v4977_v2 = vmul.f32 %v4796_v51, %v2125_v60 }
 0x3f6   : > { %v2157_v45 = vmul.f32 %v4977_v2, %v4977_v2 }
 0x3f7   : > { %v2090_v58 = vpop.xlane.xlu1 %2089 }
 0x3f8   : > { %v2110_v0 = vmul.f32 0.03125, %v2090_v58  ;;  %2183 = vadd.xlane.f32.xlu1 %v2157_v45  ;;  %v5018_v45 = vld [vmem:[%s5711_s9] ss:$0 sm:$0xff] }
 0x3fa   : > { %v2126_v33 = vsub.f32 %v4891_v28, %v2110_v0 }
 0x3fc   : > { %v4983_v32 = vmul.f32 %v4796_v51, %v2126_v33 }
 0x3fe   : > { %v2158_v31 = vmul.f32 %v4983_v32, %v4983_v32 }
 0x3ff   : > { %v2092_v21 = vpop.xlane.xlu2 %2091 }
 0x400   : > { %v2111_v37 = vmul.f32 0.03125, %v2092_v21  ;;  %2185 = vadd.xlane.f32.xlu2 %v2158_v31  ;;  %v5025_v31 = vld [vmem:[%s5712_s10] ss:$0 sm:$0xff] }
 0x402   : > { %v2127_v23 = vsub.f32 %v4896_v61, %v2111_v37 }
 0x404   : > { %v4989_v12 = vmul.f32 %v4796_v51, %v2127_v23 }
 0x406   : > { %v2159_v40 = vmul.f32 %v4989_v12, %v4989_v12 }
 0x407   : > { %v2094_v42 = vpop.xlane.xlu0 %2093 }
 0x408   : > { %v2112_v3 = vmul.f32 0.03125, %v2094_v42  ;;  %2187 = vadd.xlane.f32.xlu0 %v2159_v40 }
 0x40a   : > { %v2128_v28 = vsub.f32 %v4901_v19, %v2112_v3 }
 0x40c   : > { %v4995_v14 = vmul.f32 %v4796_v51, %v2128_v28 }
 0x40e   : > { %v2160_v41 = vmul.f32 %v4995_v14, %v4995_v14 }
 0x40f   : > { %v2096_v24 = vpop.xlane.xlu1 %2095  ;;  %v2164_v30 = vpop.xlane.xlu0 %2163 }
 0x410   : > { %v2113_v61 = vmul.f32 0.03125, %v2096_v24  ;;  %v2195_v48 = vmul.f32 0.03125, %v2164_v30  ;;  %2189 = vadd.xlane.f32.xlu1 %v2160_v41 }
 0x412   : > { %v2129_v59 = vsub.f32 %v4910_v6, %v2113_v61  ;;  %v2211_v39 = vadd.f32 1e-05, %v2195_v48 }
 0x414   : > { %3754 = vrsqrt.f32 %v2211_v39  ;;  %v5001_v38 = vmul.f32 %v4796_v51, %v2129_v59  ;;  %vm2233_vm3 = vweird.f32 %v2211_v39 }
 0x416   : > { %v2161_v19 = vmul.f32 %v5001_v38, %v5001_v38 }
 0x417   : > { %v2098_v17 = vpop.xlane.xlu2 %2097  ;;  %v2170_v1 = vpop.xlane.xlu0 %2169 }
 0x418   : > { %v2166_v22 = vpop.xlane.xlu1 %2165  ;;  %v2198_v15 = vmul.f32 0.03125, %v2170_v1  ;;  %2191 = vadd.xlane.f32.xlu2 %v2161_v19  ;;  %v2114_v25 = vmul.f32 0.03125, %v2098_v17 }
 0x419   : > { %v2196_v49 = vmul.f32 0.03125, %v2166_v22 }
 0x41a   : > { %v3755_v18 = vpop.eup %3754  ;;  %v2214_v13 = vadd.f32 1e-05, %v2198_v15  ;;  %v2130_v63 = vsub.f32 %v4925_v46, %v2114_v25 }
 0x41b   : > { %v2228_v4 = vmul.f32 %v3755_v18, %v2211_v39  ;;  %v2212_v26 = vadd.f32 1e-05, %v2196_v49  ;;  %vm2234_vm2 = vweird.f32 %v3755_v18 }
 0x41c   : > { %3756 = vrsqrt.f32 %v2214_v13  ;;  %v5013_v46 = vmul.f32 %v4796_v51, %v2130_v63  ;;  %vm2235_vm4 = vmor %vm2233_vm3, %vm2234_vm2  ;;  %vm2263_vm7 = vweird.f32 %v2214_v13 }
 0x41d   : > { %v2229_v6 = vmul.f32 %v3755_v18, %v2228_v4  ;;  %3758 = vrsqrt.f32 %v2212_v26  ;;  %vm2243_vm8 = vweird.f32 %v2212_v26 }
 0x41e   : > { %v2162_v23 = vmul.f32 %v5013_v46, %v5013_v46 }
 0x41f   : > { %v2230_v11 = vmul.f32 0.5, %v2229_v6  ;;  %v2168_v16 = vpop.xlane.xlu2 %2167  ;;  %v2176_v55 = vpop.xlane.xlu0 %2175 }
 0x420   : > { %v2197_v44 = vmul.f32 0.03125, %v2168_v16  ;;  %v2172_v57 = vpop.xlane.xlu1 %2171  ;;  %v2201_v54 = vmul.f32 0.03125, %v2176_v55  ;;  %2193 = vadd.xlane.f32.xlu0 %v2162_v23 }
 0x421   : > { %v2231_v10 = vsub.f32 1.5, %v2230_v11  ;;  %v2199_v52 = vmul.f32 0.03125, %v2172_v57 }
 0x422   : > { %v3757_v62 = vpop.eup %3756  ;;  %v5006_v53 = vadd.f32 1e-05, %v2197_v44  ;;  %v5008_v43 = vadd.f32 1e-05, %v2201_v54 }
 0x423   : > { %v3759_v36 = vpop.eup %3758  ;;  %v2232_v7 = vmul.f32 %v3755_v18, %v2231_v10  ;;  %v2258_v56 = vmul.f32 %v3757_v62, %v2214_v13  ;;  %v5010_v60 = vadd.f32 1e-05, %v2199_v52  ;;  %vm2264_vm5 = vweird.f32 %v3757_v62 }
 0x424   : > { %v2238_v58 = vmul.f32 %v3759_v36, %v2212_v26  ;;  %3760 = vrsqrt.f32 %v5006_v53  ;;  %vm2244_vm6 = vweird.f32 %v3759_v36  ;;  %vm2265_vm9 = vmor %vm2263_vm7, %vm2264_vm5  ;;  %vm2253_vm13 = vweird.f32 %v5006_v53 }
 0x425   : > { %v2236_v0 = vsel %vm2235_vm4, %v3755_v18, %v2232_v7  ;;  %v2259_v33 = vmul.f32 %v3757_v62, %v2258_v56  ;;  %3762 = vrsqrt.f32 %v5010_v60  ;;  %vm2245_vm10 = vmor %vm2243_vm8, %vm2244_vm6  ;;  %vm2273_vm14 = vweird.f32 %v5010_v60 }
 0x426   : > { %v2387_v51 = vmul.f32 %v2236_v0, %v4908_v50  ;;  %v2239_v21 = vmul.f32 %v3759_v36, %v2238_v58  ;;  %3764 = vrsqrt.f32 %v5008_v43  ;;  %vm2293_vm2 = vweird.f32 %v5008_v43 }
 0x427   : > { %v2260_v37 = vmul.f32 0.5, %v2259_v33 }
 0x428   : > { %v2406_v40 = vmul.f32 %v5018_v45, %v2387_v51  ;;  %v2240_v42 = vmul.f32 0.5, %v2239_v21 }
 0x429   : > { %v2261_v3 = vsub.f32 1.5, %v2260_v37 }
 0x42a   : > { %v3761_v28 = vpop.eup %3760  ;;  %v5033_v41 = vadd.f32 %v5025_v31, %v2406_v40  ;;  %v2241_v24 = vsub.f32 1.5, %v2240_v42 }
 0x42b   : > { %v3763_v50 = vpop.eup %3762  ;;  %v2262_v30 = vmul.f32 %v3757_v62, %v2261_v3  ;;  %v2248_v61 = vmul.f32 %v3761_v28, %v5006_v53  ;;  %vm2254_vm11 = vweird.f32 %v3761_v28 }
 0x42c   : > { %v5036_v48 = vpop.eup %3764  ;;  %v5039_v59 = vmul.f32 0.70710677, %v5033_v41  ;;  %v2242_v39 = vmul.f32 %v3759_v36, %v2241_v24  ;;  %v2268_v19 = vmul.f32 %v3763_v50, %v5010_v60  ;;  %vm2274_vm12 = vweird.f32 %v3763_v50  ;;  %vm2255_vm15 = vmor %vm2253_vm13, %vm2254_vm11 }
 0x42d   : > { %v2266_v17 = vsel %vm2265_vm9, %v3757_v62, %v2262_v30  ;;  %v2249_v1 = vmul.f32 %v3761_v28, %v2248_v61  ;;  %v2288_v22 = vmul.f32 %v5036_v48, %v5008_v43  ;;  %vm2275_vm0 = vmor %vm2273_vm14, %vm2274_vm12  ;;  %vm2294_vm1 = vweird.f32 %v5036_v48 }
 0x42e   : > { %v2473_v15 = vmul.f32 %v5039_v59, %v5039_v59  ;;  %v2246_v49 = vsel %vm2245_vm10, %v3759_v36, %v2242_v39  ;;  %v2390_v18 = vmul.f32 %v2266_v17, %v4920_v35  ;;  %v2269_v13 = vmul.f32 %v3763_v50, %v2268_v19  ;;  %vm5109_vm3 = vmor %vm2293_vm2, %vm2294_vm1 }
 0x42f   : > { %v2388_v4 = vmul.f32 %v2246_v49, %v4923_v9  ;;  %v2250_v25 = vmul.f32 0.5, %v2249_v1  ;;  %v2289_v63 = vmul.f32 %v5036_v48, %v2288_v22  ;;  %v5145_v43 = vmul.f32 0.5, %v5033_v41 }
 0x430   : > { %v5048_v26 = vmin.f32 %v2473_v15, 16.0  ;;  %v2409_v6 = vmul.f32 %v5018_v45, %v2390_v18  ;;  %v2270_v11 = vmul.f32 0.5, %v2269_v13 }
 0x431   : > { %v2407_v16 = vmul.f32 %v5018_v45, %v2388_v4  ;;  %v2251_v55 = vsub.f32 1.5, %v2250_v25  ;;  %v2290_v7 = vmul.f32 0.5, %v2289_v63 }
 0x432   : > { %v2475_v44 = vmul.f32 2.1237322e-06, %v5048_v26  ;;  %v2486_v35 = vmul.f32 3.8918573e-05, %v5048_v26  ;;  %v5056_v57 = vadd.f32 %v5025_v31, %v2409_v6  ;;  %v2271_v9 = vsub.f32 1.5, %v2270_v11 }
 0x433   : > { %v5059_v54 = vadd.f32 %v5025_v31, %v2407_v16  ;;  %v2252_v10 = vmul.f32 %v3761_v28, %v2251_v55 }
 0x434   : > { %v2476_v52 = vadd.f32 0.00028619796, %v2475_v44  ;;  %v2487_v62 = vadd.f32 0.001143296, %v2486_v35  ;;  %v2272_v36 = vmul.f32 %v3763_v50, %v2271_v9  ;;  %v5067_v58 = vmul.f32 0.70710677, %v5056_v57  ;;  %v2174_v9 = vpop.xlane.xlu2 %2173 }
 0x435   : > { %v5064_v56 = vmul.f32 0.70710677, %v5059_v54  ;;  %v2256_v0 = vsel %vm2255_vm15, %v3761_v28, %v2252_v10  ;;  %v2291_v28 = vsub.f32 1.5, %v2290_v7 }
 0x436   : > { %v2477_v33 = vmul.f32 %v2476_v52, %v5048_v26  ;;  %v2488_v53 = vmul.f32 %v2487_v62, %v5048_v26  ;;  %v2389_v60 = vmul.f32 %v2256_v0, %v4940_v29  ;;  %v2276_v51 = vsel %vm2275_vm0, %v3763_v50, %v2272_v36 }
 0x437   : > { %v2513_v21 = vmul.f32 %v5064_v56, %v5064_v56  ;;  %v2593_v37 = vmul.f32 %v5067_v58, %v5067_v58  ;;  %v2391_v23 = vmul.f32 %v2276_v51, %v4943_v8  ;;  %v2292_v49 = vmul.f32 %v5036_v48, %v2291_v28 }
 0x438   : > { %v2478_v40 = vadd.f32 0.0036580483, %v2477_v33  ;;  %v2489_v42 = vadd.f32 0.014752088, %v2488_v53  ;;  %v2408_v3 = vmul.f32 %v5018_v45, %v2389_v60 }
 0x439   : > { %v5079_v24 = vmin.f32 %v2513_v21, 16.0  ;;  %v5081_v30 = vmin.f32 %v2593_v37, 16.0  ;;  %v2410_v61 = vmul.f32 %v5018_v45, %v2391_v23  ;;  %v2296_v36 = vsel %vm5109_vm3, %v5036_v48, %v2292_v49 }
 0x43a   : > { %v2479_v29 = vmul.f32 %v2478_v40, %v5048_v26  ;;  %v2490_v50 = vmul.f32 %v2489_v42, %v5048_v26  ;;  %v5091_v17 = vadd.f32 %v5025_v31, %v2408_v3  ;;  %v2200_v37 = vmul.f32 0.03125, %v2174_v9 }
 0x43b   : > { %v2515_v39 = vmul.f32 2.1237322e-06, %v5079_v24  ;;  %v2526_v8 = vmul.f32 3.8918573e-05, %v5079_v24  ;;  %v2595_v19 = vmul.f32 2.1237322e-06, %v5081_v30  ;;  %v5099_v63 = vadd.f32 %v5025_v31, %v2410_v61 }
 0x43c   : > { %v2480_v1 = vadd.f32 0.05243302, %v2479_v29  ;;  %v2491_v22 = vadd.f32 0.112945676, %v2490_v50  ;;  %v2606_v15 = vmul.f32 3.8918573e-05, %v5081_v30  ;;  %v2393_v48 = vmul.f32 %v2296_v36, %v4937_v27 }
 0x43d   : > { %v2516_v18 = vadd.f32 0.00028619796, %v2515_v39  ;;  %v2527_v13 = vadd.f32 0.001143296, %v2526_v8  ;;  %v2596_v4 = vadd.f32 0.00028619796, %v2595_v19 }
 0x43e   : > { %v2481_v25 = vmul.f32 %v2480_v1, %v5048_v26  ;;  %v2492_v6 = vmul.f32 %v2491_v22, %v5048_v26  ;;  %v2607_v11 = vadd.f32 0.001143296, %v2606_v15  ;;  %v5105_v35 = vmul.f32 0.70710677, %v5091_v17 }
 0x43f   : > { %v2517_v16 = vmul.f32 %v2516_v18, %v5079_v24  ;;  %v2528_v55 = vmul.f32 %v2527_v13, %v5079_v24  ;;  %v2597_v44 = vmul.f32 %v2596_v4, %v5081_v30  ;;  %v5121_v21 = vmul.f32 0.70710677, %v5099_v63 }
 0x440   : > { %v2482_v10 = vadd.f32 0.18741608, %v2481_v25  ;;  %v2493_v52 = vadd.f32 0.4994258, %v2492_v6  ;;  %v2608_v62 = vmul.f32 %v2607_v11, %v5081_v30  ;;  %v2553_v53 = vmul.f32 %v5105_v35, %v5105_v35 }
 0x441   : > { %v2518_v7 = vadd.f32 0.0036580483, %v2517_v16  ;;  %v2529_v0 = vadd.f32 0.014752088, %v2528_v55  ;;  %v2598_v33 = vadd.f32 0.0036580483, %v2597_v44  ;;  %v2633_v19 = vmul.f32 %v5121_v21, %v5121_v21 }
 0x442   : > { %v2494_v60 = vmul.f32 %v2493_v52, %v5048_v26  ;;  %v2609_v51 = vadd.f32 0.014752088, %v2608_v62  ;;  %v2483_v3 = vmul.f32 %v2482_v10, %v5048_v26  ;;  %v5129_v50 = vmin.f32 %v2553_v53, 16.0 }
 0x443   : > { %v2519_v23 = vmul.f32 %v2518_v7, %v5079_v24  ;;  %v2530_v40 = vmul.f32 %v2529_v0, %v5079_v24  ;;  %v2599_v42 = vmul.f32 %v2598_v33, %v5081_v30  ;;  %v5133_v1 = vadd.f32 1e-05, %v2200_v37 }
 0x444   : > { %v2495_v28 = vadd.f32 1.0, %v2494_v60  ;;  %v2610_v29 = vmul.f32 %v2609_v51, %v5081_v30  ;;  %v2412_v15 = vmul.f32 %v5018_v45, %v2393_v48  ;;  %v2484_v49 = vadd.f32 1.1283791, %v2483_v3 }
 0x445   : > { %v2520_v61 = vadd.f32 0.05243302, %v2519_v23  ;;  %v2531_v39 = vadd.f32 0.112945676, %v2530_v40  ;;  %v2600_v8 = vadd.f32 0.05243302, %v2599_v42  ;;  %vm2283_vm2 = vweird.f32 %v5133_v1 }
 0x446   : > { %3766 = vrcp.f32 %v2495_v28  ;;  %v2611_v18 = vadd.f32 0.112945676, %v2610_v29  ;;  %v2555_v13 = vmul.f32 2.1237322e-06, %v5129_v50  ;;  %v5140_v6 = vmin.f32 %v2633_v19, 16.0 }
 0x447   : > { %v2521_v22 = vmul.f32 %v2520_v61, %v5079_v24  ;;  %v2532_v27 = vmul.f32 %v2531_v39, %v5079_v24  ;;  %v2601_v26 = vmul.f32 %v2600_v8, %v5081_v30  ;;  %v2566_v44 = vmul.f32 3.8918573e-05, %v5129_v50 }
 0x448   : > { %v2612_v16 = vmul.f32 %v2611_v18, %v5081_v30  ;;  %v2556_v55 = vadd.f32 0.00028619796, %v2555_v13  ;;  %v5149_v10 = vadd.f32 %v5025_v31, %v2412_v15  ;;  %3768 = vrsqrt.f32 %v5133_v1 }
 0x449   : > { %v2522_v4 = vadd.f32 0.18741608, %v2521_v22  ;;  %v2533_v25 = vadd.f32 0.4994258, %v2532_v27  ;;  %v2602_v11 = vadd.f32 0.18741608, %v2601_v26  ;;  %v2485_v51 = vmul.f32 %v2484_v49, %v5039_v59 }
 0x44a   : > { %v2613_v36 = vadd.f32 0.4994258, %v2612_v16  ;;  %v2557_v7 = vmul.f32 %v2556_v55, %v5129_v50  ;;  %v2567_v0 = vadd.f32 0.001143296, %v2566_v44  ;;  %v2635_v60 = vmul.f32 2.1237322e-06, %v5140_v6 }
 0x44b   : > { %v2534_v9 = vmul.f32 %v2533_v25, %v5079_v24  ;;  %v2523_v62 = vmul.f32 %v2522_v4, %v5079_v24  ;;  %v2603_v41 = vmul.f32 %v2602_v11, %v5081_v30  ;;  %v2505_v37 = vand.u32 2147483647, %v2495_v28 }
 0x44c   : > { %v3767_v52 = vpop.eup %3766  ;;  %v2614_v23 = vmul.f32 %v2613_v36, %v5081_v30  ;;  %v2568_v40 = vmul.f32 %v2567_v0, %v5129_v50  ;;  %v2507_v24 = vand.u32 2147483648, %v2495_v28  ;;  %v2558_v48 = vadd.f32 0.0036580483, %v2557_v7 }
 0x44d   : > { %v2497_v33 = vmul.f32 %v3767_v52, %v2495_v28  ;;  %v5154_v53 = vadd.f32 1.0, %v2534_v9  ;;  %vm2502_vm4 = vweird.f32 %v3767_v52  ;;  %v2524_v3 = vadd.f32 1.1283791, %v2523_v62 }
 0x44e   : > { %v5162_v29 = vadd.f32 1.0, %v2614_v23  ;;  %v2646_v61 = vmul.f32 3.8918573e-05, %v5140_v6  ;;  %v5165_v39 = vpop.eup %3768  ;;  %v2604_v59 = vadd.f32 1.1283791, %v2603_v41  ;;  %vm2501_vm5 = vweird.f32 %v2495_v28 }
 0x44f   : > { %v2498_v42 = vsub.f32 1.0, %v2497_v33  ;;  %3770 = vrcp.f32 %v5154_v53  ;;  %v2569_v19 = vadd.f32 0.014752088, %v2568_v40  ;;  %v2636_v22 = vadd.f32 0.00028619796, %v2635_v60  ;;  %vm2503_vm7 = vmor %vm2501_vm5, %vm2502_vm4 }
 0x450   : > { %vm5167_vm6 = vcmp.eq.f32.partialorder %v2505_v37, 8.507059e+37  ;;  %v2545_v27 = vand.u32 2147483647, %v5154_v53  ;;  %3772 = vrcp.f32 %v5162_v29  ;;  %v2508_v15 = vor.u32 1.1754944e-38, %v2507_v24 }
 0x451   : > { %v2499_v8 = vmul.f32 %v3767_v52, %v2498_v42  ;;  %v2547_v49 = vand.u32 2147483648, %v5154_v53  ;;  %v2559_v18 = vmul.f32 %v2558_v48, %v5129_v50  ;;  %v2525_v13 = vmul.f32 %v2524_v3, %v5064_v56 }
 0x452   : > { %v2570_v28 = vmul.f32 %v2569_v19, %v5129_v50  ;;  %v2647_v4 = vadd.f32 0.001143296, %v2646_v61  ;;  %v5179_v25 = vmul.f32 0.70710677, %v5149_v10  ;;  %vm2541_vm8 = vweird.f32 %v5154_v53 }
 0x453   : > { %v2500_v26 = vadd.f32 %v3767_v52, %v2499_v8  ;;  %v2605_v55 = vmul.f32 %v2604_v59, %v5067_v58  ;;  %v2637_v44 = vmul.f32 %v2636_v22, %v5140_v6  ;;  %vm5187_vm9 = vcmp.eq.f32.partialorder %v2545_v27, 8.507059e+37 }
 0x454   : > { %v2571_v36 = vadd.f32 0.112945676, %v2570_v28  ;;  %v2548_v0 = vor.u32 1.1754944e-38, %v2547_v49  ;;  %v2560_v33 = vadd.f32 0.05243302, %v2559_v18  ;;  %vm2621_vm10 = vweird.f32 %v5162_v29 }
 0x455   : > { %v3771_v11 = vpop.eup %3770  ;;  %v2504_v16 = vsel %vm2503_vm7, %v3767_v52, %v2500_v26  ;;  %v2648_v52 = vmul.f32 %v2647_v4, %v5140_v6  ;;  %v2713_v37 = vmul.f32 %v5179_v25, %v5179_v25  ;;  %v2625_v42 = vand.u32 2147483647, %v5162_v29 }
 0x456   : > { %v2509_v9 = vsel %vm5167_vm6, %v2508_v15, %v2504_v16  ;;  %v2537_v62 = vmul.f32 %v3771_v11, %v5154_v53  ;;  %v3773_v41 = vpop.eup %3772  ;;  %v2572_v58 = vmul.f32 %v2571_v36, %v5129_v50  ;;  %v2638_v24 = vadd.f32 0.0036580483, %v2637_v44 }
 0x457   : > { %v2510_v7 = vmul.f32 %v2509_v9, %v2485_v51  ;;  %v2617_v40 = vmul.f32 %v3773_v41, %v5162_v29  ;;  %vm2542_vm11 = vweird.f32 %v3771_v11  ;;  %v2649_v3 = vadd.f32 0.014752088, %v2648_v52 }
 0x458   : > { %v2538_v60 = vsub.f32 1.0, %v2537_v62  ;;  %v2573_v48 = vadd.f32 0.4994258, %v2572_v58  ;;  %v2561_v59 = vmul.f32 %v2560_v33, %v5129_v50  ;;  %v5199_v19 = vmin.f32 %v2713_v37, 16.0  ;;  %vm2543_vm12 = vmor %vm2541_vm8, %vm2542_vm11 }
 0x459   : > { %v3579_v23 = vclamps-f32 %v2510_v7, 1.0  ;;  %v2618_v8 = vsub.f32 1.0, %v2617_v40  ;;  %v2627_v30 = vand.u32 2147483648, %v5162_v29  ;;  %v2650_v26 = vmul.f32 %v2649_v3, %v5140_v6 }
 0x45a   : > { %v2539_v51 = vmul.f32 %v3771_v11, %v2538_v60  ;;  %v2574_v27 = vmul.f32 %v2573_v48, %v5129_v50  ;;  %vm2622_vm13 = vweird.f32 %v3773_v41  ;;  %v2639_v18 = vmul.f32 %v2638_v24, %v5140_v6 }
 0x45b   : > { %v3113_v61 = vadd.f32 1.0, %v3579_v23  ;;  %v2619_v49 = vmul.f32 %v3773_v41, %v2618_v8  ;;  %v2651_v16 = vadd.f32 0.112945676, %v2650_v26  ;;  %v2715_v44 = vmul.f32 2.1237322e-06, %v5199_v19  ;;  %vm2623_vm14 = vmor %vm2621_vm10, %vm2622_vm13 }
 0x45c   : > { %v2540_v22 = vadd.f32 %v3771_v11, %v2539_v51  ;;  %v5214_v4 = vadd.f32 1.0, %v2574_v27  ;;  %v2562_v36 = vadd.f32 0.18741608, %v2561_v59  ;;  %v2628_v33 = vor.u32 1.1754944e-38, %v2627_v30 }
 0x45d   : > { %v3129_v15 = vmul.f32 %v3113_v61, %v5145_v43  ;;  %v3818_v43 = vld [vmem:[%s4249_s14] sm:$0xff]  ;;  %v2620_v62 = vadd.f32 %v3773_v41, %v2619_v49  ;;  %vm2626_vm15 = vcmp.eq.f32.partialorder %v2625_v42, 8.507059e+37  ;;  %v2640_v60 = vadd.f32 0.05243302, %v2639_v18 }
 0x45e   : > { %v2544_v28 = vsel %vm2543_vm12, %v3771_v11, %v2540_v22  ;;  %3774 = vrcp.f32 %v5214_v4  ;;  %v2278_v11 = vmul.f32 %v5165_v39, %v5133_v1  ;;  %v2652_v58 = vmul.f32 %v2651_v16, %v5140_v6  ;;  %v2178_v22 = vpop.xlane.xlu1 %2177 }
 0x45f   : > { %v3145_v9 = vadd.f32 %v3818_v43, %v3129_v15  ;;  %v2549_v53 = vsel %vm5187_vm9, %v2548_v0, %v2544_v28  ;;  %v2624_v52 = vsel %vm2623_vm14, %v3773_v41, %v2620_v62  ;;  %v2716_v37 = vadd.f32 0.00028619796, %v2715_v44  ;;  %v3819_v15 = vld [vmem:[%s4249_s14 + $0x8] sm:$0xff] }
 0x460   : > { %v2550_v7 = vmul.f32 %v2549_v53, %v2525_v13  ;;  %v2629_v0 = vsel %vm2626_vm15, %v2628_v33, %v2624_v52  ;;  %v2563_v13 = vmul.f32 %v2562_v36, %v5129_v50  ;;  %v2653_v29 = vadd.f32 0.4994258, %v2652_v58 }
 0x461   : > { %3161 = vst [vmem:[%s5212_s19] sm:$0xff] %v3145_v9  ;;  %v2630_v23 = vmul.f32 %v2629_v0, %v2605_v55  ;;  %v2442_v40 = vmul.f32 0.5, %v5059_v54  ;;  %v2726_v51 = vmul.f32 3.8918573e-05, %v5199_v19  ;;  %v2279_v48 = vmul.f32 %v5165_v39, %v2278_v11 }
 0x462   : > { %v3580_v56 = vclamps-f32 %v2550_v7, 1.0  ;;  %v2444_v41 = vmul.f32 0.5, %v5056_v57  ;;  %v2641_v3 = vmul.f32 %v2640_v60, %v5140_v6  ;;  %v2654_v61 = vmul.f32 %v2653_v29, %v5140_v6  ;;  %v3820_v7 = vld [vmem:[%s4249_s14 + $0x18] sm:$0xff] }
 0x463   : > { %v3582_v42 = vclamps-f32 %v2630_v23, 1.0  ;;  %v2717_v50 = vmul.f32 %v2716_v37, %v5199_v19  ;;  %v2727_v59 = vadd.f32 0.001143296, %v2726_v51  ;;  %v2280_v54 = vmul.f32 0.5, %v2279_v48 }
 0x464   : > { %v3114_v24 = vadd.f32 1.0, %v3580_v56  ;;  %v3775_v8 = vpop.eup %3774  ;;  %v2564_v27 = vadd.f32 1.1283791, %v2563_v13  ;;  %v2585_v57 = vand.u32 2147483647, %v5214_v4  ;;  %v2587_v18 = vand.u32 2147483648, %v5214_v4 }
 0x465   : > { %v3116_v30 = vadd.f32 1.0, %v3582_v42  ;;  %v2577_v26 = vmul.f32 %v3775_v8, %v5214_v4  ;;  %v5239_v28 = vadd.f32 1.0, %v2654_v61  ;;  %v2728_v16 = vmul.f32 %v2727_v59, %v5199_v19 }
 0x466   : > { %v3130_v55 = vmul.f32 %v3114_v24, %v2442_v40  ;;  %v2281_v9 = vsub.f32 1.5, %v2280_v54  ;;  %v2202_v53 = vmul.f32 0.03125, %v2178_v22  ;;  %v2642_v62 = vadd.f32 0.18741608, %v2641_v3 }
 0x467   : > { %v3132_v44 = vmul.f32 %v3116_v30, %v2444_v41  ;;  %v2578_v43 = vsub.f32 1.0, %v2577_v26  ;;  %3776 = vrcp.f32 %v5239_v28  ;;  %v2718_v36 = vadd.f32 0.0036580483, %v2717_v50 }
 0x468   : > { %v3146_v49 = vadd.f32 %v3819_v15, %v3130_v55  ;;  %vm2284_vm0 = vweird.f32 %v5165_v39  ;;  %vm2582_vm1 = vweird.f32 %v3775_v8  ;;  %v2729_v52 = vadd.f32 0.014752088, %v2728_v16 }
 0x469   : > { %v3148_v33 = vadd.f32 %v3820_v7, %v3132_v44  ;;  %v2579_v11 = vmul.f32 %v3775_v8, %v2578_v43  ;;  %v2565_v60 = vmul.f32 %v2564_v27, %v5105_v35  ;;  %v2282_v58 = vmul.f32 %v5165_v39, %v2281_v9  ;;  %vm2285_vm5 = vmor %vm2283_vm2, %vm2284_vm0 }
 0x46a   : > { %3162 = vst [vmem:[%s5212_s19 + $0x8] sm:$0xff] %v3146_v49  ;;  %v5249_v56 = vadd.f32 1e-05, %v2202_v53  ;;  %vm2581_vm3 = vweird.f32 %v5214_v4  ;;  %vm2586_vm4 = vcmp.eq.f32.partialorder %v2585_v57, 8.507059e+37  ;;  %v2730_v37 = vmul.f32 %v2729_v52, %v5199_v19 }
 0x46b   : > { %3164 = vst [vmem:[%s5212_s19 + $0x18] sm:$0xff] %v3148_v33  ;;  %v2580_v0 = vadd.f32 %v3775_v8, %v2579_v11  ;;  %vm2583_vm6 = vmor %vm2581_vm3, %vm2582_vm1  ;;  %v2588_v23 = vor.u32 1.1754944e-38, %v2587_v18  ;;  %v2643_v35 = vmul.f32 %v2642_v62, %v5140_v6  ;;  %v2286_v13 = vsel %vm2285_vm5, %v5165_v39, %v2282_v58 }
 0x46c   : > { %3778 = vrsqrt.f32 %v5249_v56  ;;  %v2719_v29 = vmul.f32 %v2718_v36, %v5199_v19  ;;  %v2731_v40 = vadd.f32 0.112945676, %v2730_v37  ;;  %v2392_v4 = vmul.f32 %v2286_v13, %v4954_v5 }
 0x46d   : > { %v2584_v1 = vsel %vm2583_vm6, %v3775_v8, %v2580_v0  ;;  %v3777_v24 = vpop.eup %3776  ;;  %v2443_v42 = vmul.f32 0.5, %v5091_v17  ;;  %v2644_v61 = vadd.f32 1.1283791, %v2643_v35  ;;  %v2665_v59 = vand.u32 2147483647, %v5239_v28 }
 0x46e   : > { %v2589_v51 = vsel %vm2586_vm4, %v2588_v23, %v2584_v1  ;;  %v2657_v41 = vmul.f32 %v3777_v24, %v5239_v28  ;;  %v2732_v3 = vmul.f32 %v2731_v40, %v5199_v19  ;;  %v2411_v6 = vmul.f32 %v5018_v45, %v2392_v4 }
 0x46f   : > { %v2590_v48 = vmul.f32 %v2589_v51, %v2565_v60  ;;  %v2720_v8 = vadd.f32 0.05243302, %v2719_v29  ;;  %v2667_v5 = vand.u32 2147483648, %v5239_v28  ;;  %vm2662_vm7 = vweird.f32 %v3777_v24 }
 0x470   : > { %v2658_v55 = vsub.f32 1.0, %v2657_v41  ;;  %v2733_v54 = vadd.f32 0.4994258, %v2732_v3  ;;  %v5268_v22 = vadd.f32 %v5025_v31, %v2411_v6  ;;  %vm2661_vm8 = vweird.f32 %v5239_v28  ;;  %v3821_v28 = vld [vmem:[%s4249_s14 + $0x10] sm:$0xff] }
 0x471   : > { %v3581_v39 = vclamps-f32 %v2590_v48, 1.0  ;;  %v2721_v18 = vmul.f32 %v2720_v8, %v5199_v19  ;;  %v2645_v44 = vmul.f32 %v2644_v61, %v5121_v21  ;;  %vm2663_vm9 = vmor %vm2661_vm8, %vm2662_vm7  ;;  %v2668_v43 = vor.u32 1.1754944e-38, %v2667_v5 }
 0x472   : > { %v3779_v50 = vpop.eup %3778  ;;  %v2659_v17 = vmul.f32 %v3777_v24, %v2658_v55  ;;  %v2734_v26 = vmul.f32 %v2733_v54, %v5199_v19  ;;  %v5274_v57 = vmul.f32 0.70710677, %v5268_v22  ;;  %vm2666_vm10 = vcmp.eq.f32.partialorder %v2665_v59, 8.507059e+37 }
 0x473   : > { %v3115_v30 = vadd.f32 1.0, %v3581_v39  ;;  %v2298_v27 = vmul.f32 %v3779_v50, %v5249_v56  ;;  %v2722_v52 = vadd.f32 0.18741608, %v2721_v18  ;;  %vm2304_vm11 = vweird.f32 %v3779_v50 }
 0x474   : > { %v2660_v49 = vadd.f32 %v3777_v24, %v2659_v17  ;;  %v2735_v9 = vadd.f32 1.0, %v2734_v26  ;;  %v2673_v53 = vmul.f32 %v5274_v57, %v5274_v57  ;;  %v2445_v23 = vmul.f32 0.5, %v5099_v63 }
 0x475   : > { %v3131_v15 = vmul.f32 %v3115_v30, %v2443_v42  ;;  %v2299_v16 = vmul.f32 %v3779_v50, %v2298_v27  ;;  %vm2303_vm12 = vweird.f32 %v5249_v56  ;;  %v2723_v1 = vmul.f32 %v2722_v52, %v5199_v19  ;;  %v2180_v42 = vpop.xlane.xlu2 %2179  ;;  %v3822_v56 = vld [vmem:[%s4249_s14 + $0x20] sm:$0xff] }
 0x476   : > { %v2664_v36 = vsel %vm2663_vm9, %v3777_v24, %v2660_v49  ;;  %3780 = vrcp.f32 %v2735_v9  ;;  %v5282_v60 = vmin.f32 %v2673_v53, 16.0  ;;  %vm2305_vm13 = vmor %vm2303_vm12, %vm2304_vm11  ;;  %v2203_v6 = vmul.f32 0.03125, %v2180_v42  ;;  %v2182_v53 = vpop.xlane.xlu0 %2181  ;;  %v2184_v42 = vpop.xlane.xlu1 %2183 }
 0x477   : > { %v3147_v62 = vadd.f32 %v3821_v28, %v3131_v15  ;;  %v2300_v7 = vmul.f32 0.5, %v2299_v16  ;;  %v2669_v33 = vsel %vm2666_vm10, %v2668_v43, %v2664_v36  ;;  %v2724_v61 = vadd.f32 1.1283791, %v2723_v1 }
 0x478   : > { %v2670_v11 = vmul.f32 %v2669_v33, %v2645_v44  ;;  %v2675_v0 = vmul.f32 2.1237322e-06, %v5282_v60  ;;  %v2686_v37 = vmul.f32 3.8918573e-05, %v5282_v60  ;;  %v2747_v8 = vand.u32 2147483648, %v2735_v9 }
 0x479   : > { %3163 = vst [vmem:[%s5212_s19 + $0x10] sm:$0xff] %v3147_v62  ;;  %v2301_v58 = vsub.f32 1.5, %v2300_v7  ;;  %v2219_v5 = vadd.f32 1e-05, %v2203_v6  ;;  %v2745_v30 = vand.u32 2147483647, %v2735_v9  ;;  %vm2741_vm15 = vweird.f32 %v2735_v9 }
 0x47a   : > { %v3583_v21 = vclamps-f32 %v2670_v11, 1.0  ;;  %v2676_v29 = vadd.f32 0.00028619796, %v2675_v0  ;;  %v2687_v40 = vadd.f32 0.001143296, %v2686_v37  ;;  %v2748_v49 = vor.u32 1.1754944e-38, %v2747_v8 }
 0x47b   : > { %v2302_v35 = vmul.f32 %v3779_v50, %v2301_v58  ;;  %3782 = vrsqrt.f32 %v2219_v5  ;;  %v2725_v44 = vmul.f32 %v2724_v61, %v5179_v25  ;;  %vm2746_vm1 = vcmp.eq.f32.partialorder %v2745_v30, 8.507059e+37 }
 0x47c   : > { %v3117_v13 = vadd.f32 1.0, %v3583_v21  ;;  %v3781_v4 = vpop.eup %3780  ;;  %v2677_v41 = vmul.f32 %v2676_v29, %v5282_v60  ;;  %v2688_v63 = vmul.f32 %v2687_v40, %v5282_v60  ;;  %v2204_v7 = vmul.f32 0.03125, %v2182_v53 }
 0x47d   : > { %v2306_v24 = vsel %vm2305_vm13, %v3779_v50, %v2302_v35  ;;  %v2737_v48 = vmul.f32 %v3781_v4, %v2735_v9  ;;  %vm2742_vm14 = vweird.f32 %v3781_v4  ;;  %vm2313_vm3 = vweird.f32 %v2219_v5 }
 0x47e   : > { %v3133_v51 = vmul.f32 %v3117_v13, %v2445_v23  ;;  %v2394_v3 = vmul.f32 %v2306_v24, %v4957_v47  ;;  %v2678_v55 = vadd.f32 0.0036580483, %v2677_v41  ;;  %v2689_v59 = vadd.f32 0.014752088, %v2688_v63  ;;  %vm2743_vm0 = vmor %vm2741_vm15, %vm2742_vm14  ;;  %v3823_v63 = vld [vmem:[%s4249_s14 + $0x30] sm:$0xff] }
 0x47f   : > { %v2738_v19 = vsub.f32 1.0, %v2737_v48  ;;  %v5310_v21 = vadd.f32 1e-05, %v2204_v7  ;;  %v2447_v13 = vmul.f32 0.5, %v5149_v10 }
 0x480   : > { %v3149_v39 = vadd.f32 %v3822_v56, %v3133_v51  ;;  %v2413_v50 = vmul.f32 %v5018_v45, %v2394_v3  ;;  %v2679_v17 = vmul.f32 %v2678_v55, %v5282_v60  ;;  %v2690_v27 = vmul.f32 %v2689_v59, %v5282_v60 }
 0x481   : > { %v2739_v54 = vmul.f32 %v3781_v4, %v2738_v19  ;;  %v3783_v11 = vpop.eup %3782  ;;  %3784 = vrsqrt.f32 %v5310_v21  ;;  %v2205_v19 = vmul.f32 0.03125, %v2184_v42  ;;  %vm2323_vm5 = vweird.f32 %v5310_v21 }
 0x482   : > { %3165 = vst [vmem:[%s5212_s19 + $0x20] sm:$0xff] %v3149_v39  ;;  %v5298_v47 = vadd.f32 %v5025_v31, %v2413_v50  ;;  %v2680_v15 = vadd.f32 0.05243302, %v2679_v17  ;;  %v2691_v18 = vadd.f32 0.112945676, %v2690_v27  ;;  %v2308_v0 = vmul.f32 %v3783_v11, %v2219_v5 }
 0x483   : > { %v2740_v26 = vadd.f32 %v3781_v4, %v2739_v54  ;;  %vm2314_vm2 = vweird.f32 %v3783_v11  ;;  %v5327_v54 = vadd.f32 1e-05, %v2205_v19  ;;  %v2188_v19 = vpop.xlane.xlu0 %2187 }
 0x484   : > { %v5301_v16 = vmul.f32 0.70710677, %v5298_v47  ;;  %v2692_v62 = vmul.f32 %v2691_v18, %v5282_v60  ;;  %v2681_v33 = vmul.f32 %v2680_v15, %v5282_v60  ;;  %v2309_v40 = vmul.f32 %v3783_v11, %v2308_v0  ;;  %vm2315_vm4 = vmor %vm2313_vm3, %vm2314_vm2 }
 0x485   : > { %v2744_v43 = vsel %vm2743_vm0, %v3781_v4, %v2740_v26  ;;  %vm2333_vm12 = vweird.f32 %v5327_v54 }
 0x486   : > { %v2749_v28 = vsel %vm2746_vm1, %v2748_v49, %v2744_v43  ;;  %v2753_v36 = vmul.f32 %v5301_v16, %v5301_v16  ;;  %v2693_v52 = vadd.f32 0.4994258, %v2692_v62  ;;  %v2682_v29 = vadd.f32 0.18741608, %v2681_v33  ;;  %v2186_v43 = vpop.xlane.xlu2 %2185 }
 0x487   : > { %v2750_v9 = vmul.f32 %v2749_v28, %v2725_v44  ;;  %v2310_v41 = vmul.f32 0.5, %v2309_v40  ;;  %v3785_v39 = vpop.eup %3784 }
 0x488   : > { %v5308_v58 = vmin.f32 %v2753_v36, 16.0  ;;  %v2694_v37 = vmul.f32 %v2693_v52, %v5282_v60  ;;  %v2683_v61 = vmul.f32 %v2682_v29, %v5282_v60  ;;  %v2318_v50 = vmul.f32 %v3785_v39, %v5310_v21 }
 0x489   : > { %v3585_v25 = vclamps-f32 %v2750_v9, 1.0  ;;  %v2311_v56 = vsub.f32 1.5, %v2310_v41  ;;  %v2206_v36 = vmul.f32 0.03125, %v2186_v43  ;;  %vm2324_vm6 = vweird.f32 %v3785_v39 }
 0x48a   : > { %v2755_v23 = vmul.f32 2.1237322e-06, %v5308_v58  ;;  %v2766_v35 = vmul.f32 3.8918573e-05, %v5308_v58  ;;  %v5317_v4 = vadd.f32 1.0, %v2694_v37  ;;  %v2319_v26 = vmul.f32 %v3785_v39, %v2318_v50  ;;  %vm2325_vm9 = vmor %vm2323_vm5, %vm2324_vm6 }
 0x48b   : > { %v3119_v1 = vadd.f32 1.0, %v3585_v25  ;;  %v2312_v59 = vmul.f32 %v3783_v11, %v2311_v56  ;;  %v2684_v60 = vadd.f32 1.1283791, %v2683_v61  ;;  %v5343_v25 = vadd.f32 1e-05, %v2206_v36 }
 0x48c   : > { %v2756_v24 = vadd.f32 0.00028619796, %v2755_v23  ;;  %v2767_v51 = vadd.f32 0.001143296, %v2766_v35  ;;  %3786 = vrcp.f32 %v5317_v4  ;;  %v2705_v53 = vand.u32 2147483647, %v5317_v4 }
 0x48d   : > { %v3135_v48 = vmul.f32 %v3119_v1, %v2447_v13  ;;  %v2316_v27 = vsel %vm2315_vm4, %v3783_v11, %v2312_v59  ;;  %3788 = vrsqrt.f32 %v5327_v54  ;;  %v2320_v62 = vmul.f32 0.5, %v2319_v26 }
 0x48e   : > { %v2757_v6 = vmul.f32 %v2756_v24, %v5308_v58  ;;  %v2768_v10 = vmul.f32 %v2767_v51, %v5308_v58  ;;  %v2395_v5 = vmul.f32 %v2316_v27, %v4965_v34  ;;  %v2707_v9 = vand.u32 2147483648, %v5317_v4 }
 0x48f   : > { %v3151_v3 = vadd.f32 %v3823_v63, %v3135_v48  ;;  %v2321_v52 = vsub.f32 1.5, %v2320_v62  ;;  %vm2701_vm8 = vweird.f32 %v5317_v4  ;;  %3790 = vrsqrt.f32 %v5343_v25 }
 0x490   : > { %v2758_v55 = vadd.f32 0.0036580483, %v2757_v6  ;;  %v2769_v8 = vadd.f32 0.014752088, %v2768_v10  ;;  %v2414_v28 = vmul.f32 %v5018_v45, %v2395_v5  ;;  %v2685_v48 = vmul.f32 %v2684_v60, %v5274_v57 }
 0x491   : > { %3167 = vst [vmem:[%s5212_s19 + $0x30] sm:$0xff] %v3151_v3  ;;  %v2322_v1 = vmul.f32 %v3785_v39, %v2321_v52  ;;  %vm2706_vm11 = vcmp.eq.f32.partialorder %v2705_v53, 8.507059e+37  ;;  %v2446_v57 = vmul.f32 0.5, %v5268_v22  ;;  %vm2343_vm14 = vweird.f32 %v5343_v25 }
 0x492   : > { %v2759_v30 = vmul.f32 %v2758_v55, %v5308_v58  ;;  %v2770_v17 = vmul.f32 %v2769_v8, %v5308_v58  ;;  %v3787_v15 = vpop.eup %3786  ;;  %v5341_v11 = vadd.f32 %v5025_v31, %v2414_v28 }
 0x493   : > { %v2697_v49 = vmul.f32 %v3787_v15, %v5317_v4  ;;  %vm2702_vm7 = vweird.f32 %v3787_v15  ;;  %v5345_v35 = vpop.eup %3788  ;;  %v2708_v4 = vor.u32 1.1754944e-38, %v2707_v9  ;;  %v2326_v42 = vsel %vm2325_vm9, %v3785_v39, %v2322_v1 }
 0x494   : > { %v2760_v18 = vadd.f32 0.05243302, %v2759_v30  ;;  %v2771_v44 = vadd.f32 0.112945676, %v2770_v17  ;;  %v5349_v13 = vmul.f32 0.70710677, %v5341_v11  ;;  %v2328_v51 = vmul.f32 %v5345_v35, %v5327_v54  ;;  %vm2703_vm10 = vmor %vm2701_vm8, %vm2702_vm7 }
 0x495   : > { %v2698_v7 = vsub.f32 1.0, %v2697_v49  ;;  %v5369_v55 = vpop.eup %3790  ;;  %vm2334_vm13 = vweird.f32 %v5345_v35 }
 0x496   : > { %v2761_v34 = vmul.f32 %v2760_v18, %v5308_v58  ;;  %v2772_v33 = vmul.f32 %v2771_v44, %v5308_v58  ;;  %v2793_v41 = vmul.f32 %v5349_v13, %v5349_v13  ;;  %v2329_v56 = vmul.f32 %v5345_v35, %v2328_v51  ;;  %vm2335_vm0 = vmor %vm2333_vm12, %vm2334_vm13 }
 0x497   : > { %v2699_v0 = vmul.f32 %v3787_v15, %v2698_v7  ;;  %v2338_v22 = vmul.f32 %v5369_v55, %v5343_v25  ;;  %vm2344_vm1 = vweird.f32 %v5369_v55 }
 0x498   : > { %v2762_v37 = vadd.f32 0.18741608, %v2761_v34  ;;  %v2773_v23 = vadd.f32 0.4994258, %v2772_v33  ;;  %v5364_v10 = vmin.f32 %v2793_v41, 16.0  ;;  %v2330_v50 = vmul.f32 0.5, %v2329_v56  ;;  %vm2345_vm3 = vmor %vm2343_vm14, %vm2344_vm1 }
 0x499   : > { %v2700_v29 = vadd.f32 %v3787_v15, %v2699_v0  ;;  %v2339_v5 = vmul.f32 %v5369_v55, %v2338_v22  ;;  %v3824_v34 = vld [vmem:[%s4249_s14 + $0x28] sm:$0xff] }
 0x49a   : > { %v2763_v40 = vmul.f32 %v2762_v37, %v5308_v58  ;;  %v2774_v24 = vmul.f32 %v2773_v23, %v5308_v58  ;;  %v2396_v58 = vmul.f32 %v2326_v42, %v4971_v20  ;;  %v2795_v39 = vmul.f32 2.1237322e-06, %v5364_v10  ;;  %v5423_v42 = vld [vmem:[%s5711_s9] ss:$0 sm:$0xff] }
 0x49b   : > { %v2704_v63 = vsel %vm2703_vm10, %v3787_v15, %v2700_v29  ;;  %v2806_v59 = vmul.f32 3.8918573e-05, %v5364_v10  ;;  %v2331_v60 = vsub.f32 1.5, %v2330_v50  ;;  %v2340_v62 = vmul.f32 0.5, %v2339_v5 }
 0x49c   : > { %v5361_v3 = vadd.f32 1.0, %v2774_v24  ;;  %v2709_v6 = vsel %vm2706_vm11, %v2708_v4, %v2704_v63  ;;  %v2764_v21 = vadd.f32 1.1283791, %v2763_v40  ;;  %v2415_v8 = vmul.f32 %v5018_v45, %v2396_v58 }
 0x49d   : > { %v2710_v61 = vmul.f32 %v2709_v6, %v2685_v48  ;;  %v2796_v17 = vadd.f32 0.00028619796, %v2795_v39  ;;  %v2207_v45 = vmul.f32 0.03125, %v2188_v19  ;;  %v2807_v15 = vadd.f32 0.001143296, %v2806_v59 }
 0x49e   : > { %3792 = vrcp.f32 %v5361_v3  ;;  %v5380_v30 = vmul.f32 %v2764_v21, %v5301_v16  ;;  %v5383_v27 = vadd.f32 %v5025_v31, %v2415_v8  ;;  %vm2781_vm15 = vweird.f32 %v5361_v3  ;;  %v5436_v19 = vld [vmem:[%s5712_s10] ss:$0 sm:$0xff] }
 0x49f   : > { %v3584_v20 = vclamps-f32 %v2710_v61, 1.0  ;;  %v2785_v49 = vand.u32 2147483647, %v5361_v3  ;;  %v2787_v18 = vand.u32 2147483648, %v5361_v3  ;;  %v2797_v16 = vmul.f32 %v2796_v17, %v5364_v10  ;;  %v2190_v17 = vpop.xlane.xlu1 %2189 }
 0x4a0   : > { %v5391_v44 = vmul.f32 0.70710677, %v5383_v27  ;;  %v2808_v53 = vmul.f32 %v2807_v15, %v5364_v10  ;;  %v2332_v28 = vmul.f32 %v5345_v35, %v2331_v60  ;;  %v2341_v37 = vsub.f32 1.5, %v2340_v62 }
 0x4a1   : > { %v3118_v26 = vadd.f32 1.0, %v3584_v20  ;;  %v2798_v7 = vadd.f32 0.0036580483, %v2797_v16  ;;  %v5412_v51 = vadd.f32 1e-05, %v2207_v45  ;;  %v2788_v25 = vor.u32 1.1754944e-38, %v2787_v18 }
 0x4a2   : > { %v2833_v9 = vmul.f32 %v5391_v44, %v5391_v44  ;;  %v2809_v52 = vadd.f32 0.014752088, %v2808_v53  ;;  %v2336_v0 = vsel %vm2335_vm0, %v5345_v35, %v2332_v28  ;;  %v2342_v24 = vmul.f32 %v5369_v55, %v2341_v37 }
 0x4a3   : > { %v3134_v43 = vmul.f32 %v3118_v26, %v2446_v57  ;;  %v2799_v1 = vmul.f32 %v2798_v7, %v5364_v10  ;;  %v2397_v40 = vmul.f32 %v2336_v0, %v4977_v2  ;;  %3794 = vrsqrt.f32 %v5412_v51 }
 0x4a4   : > { %v3793_v31 = vpop.eup %3792  ;;  %v5406_v29 = vmin.f32 %v2833_v9, 16.0  ;;  %v2810_v54 = vmul.f32 %v2809_v52, %v5364_v10  ;;  %v2346_v58 = vsel %vm2345_vm3, %v5369_v55, %v2342_v24  ;;  %vm2786_vm5 = vcmp.eq.f32.partialorder %v2785_v49, 8.507059e+37 }
 0x4a5   : > { %v2777_v36 = vmul.f32 %v3793_v31, %v5361_v3  ;;  %v3150_v33 = vadd.f32 %v3824_v34, %v3134_v43  ;;  %vm2782_vm2 = vweird.f32 %v3793_v31  ;;  %v2800_v4 = vadd.f32 0.05243302, %v2799_v1 }
 0x4a6   : > { %v2835_v35 = vmul.f32 2.1237322e-06, %v5406_v29  ;;  %v2846_v41 = vmul.f32 3.8918573e-05, %v5406_v29  ;;  %v2811_v2 = vadd.f32 0.112945676, %v2810_v54  ;;  %v2416_v63 = vmul.f32 %v5423_v42, %v2397_v40  ;;  %vm2783_vm4 = vmor %vm2781_vm15, %vm2782_vm2 }
 0x4a7   : > { %v2778_v23 = vsub.f32 1.0, %v2777_v36  ;;  %3166 = vst [vmem:[%s5212_s19 + $0x28] sm:$0xff] %v3150_v33  ;;  %v2801_v21 = vmul.f32 %v2800_v4, %v5364_v10  ;;  %v2398_v39 = vmul.f32 %v2346_v58, %v4983_v32  ;;  %v2208_v53 = vmul.f32 0.03125, %v2190_v17  ;;  %v3827_v40 = vld [vmem:[%s4249_s14 + $0x38] sm:$0xff] }
 0x4a8   : > { %v2836_v56 = vadd.f32 0.00028619796, %v2835_v35  ;;  %v2847_v57 = vadd.f32 0.001143296, %v2846_v41  ;;  %v2812_v61 = vmul.f32 %v2811_v2, %v5364_v10  ;;  %v5439_v55 = vadd.f32 %v5436_v19, %v2416_v63 }
 0x4a9   : > { %v2779_v48 = vmul.f32 %v3793_v31, %v2778_v23  ;;  %v2802_v26 = vadd.f32 0.18741608, %v2801_v21  ;;  %v5448_v5 = vpop.eup %3794  ;;  %v2417_v18 = vmul.f32 %v5423_v42, %v2398_v39  ;;  %v5470_v23 = vadd.f32 1e-05, %v2208_v53 }
 0x4aa   : > { %v2837_v20 = vmul.f32 %v2836_v56, %v5406_v29  ;;  %v2848_v3 = vmul.f32 %v2847_v57, %v5406_v29  ;;  %v2813_v50 = vadd.f32 0.4994258, %v2812_v61  ;;  %v5445_v22 = vmul.f32 0.70710677, %v5439_v55 }
 0x4ab   : > { %v2780_v6 = vadd.f32 %v3793_v31, %v2779_v48  ;;  %v2803_v7 = vmul.f32 %v2802_v26, %v5364_v10  ;;  %v5464_v33 = vadd.f32 %v5436_v19, %v2417_v18  ;;  %v2348_v52 = vmul.f32 %v5448_v5, %v5412_v51 }
 0x4ac   : > { %v2838_v15 = vadd.f32 0.0036580483, %v2837_v20  ;;  %v2849_v60 = vadd.f32 0.014752088, %v2848_v3  ;;  %v2814_v32 = vmul.f32 %v2813_v50, %v5364_v10  ;;  %v2873_v49 = vmul.f32 %v5445_v22, %v5445_v22 }
 0x4ad   : > { %v2784_v8 = vsel %vm2783_vm4, %v3793_v31, %v2780_v6  ;;  %v2804_v24 = vadd.f32 1.1283791, %v2803_v7  ;;  %v5476_v35 = vmul.f32 0.5, %v5341_v11  ;;  %v5479_v2 = vmul.f32 0.70710677, %v5464_v33 }
 0x4ae   : > { %v2789_v59 = vsel %vm2786_vm5, %v2788_v25, %v2784_v8  ;;  %v2839_v31 = vmul.f32 %v2838_v15, %v5406_v29  ;;  %v2850_v43 = vmul.f32 %v2849_v60, %v5406_v29  ;;  %v5457_v28 = vadd.f32 1.0, %v2814_v32 }
 0x4af   : > { %v2790_v45 = vmul.f32 %v2789_v59, %v5380_v30  ;;  %v2448_v30 = vmul.f32 0.5, %v5298_v47  ;;  %v5459_v62 = vmin.f32 %v2873_v49, 16.0  ;;  %v2349_v63 = vmul.f32 %v5448_v5, %v2348_v52 }
 0x4b0   : > { %v2840_v9 = vadd.f32 0.05243302, %v2839_v31  ;;  %v2851_v34 = vadd.f32 0.112945676, %v2850_v43  ;;  %3796 = vrcp.f32 %v5457_v28  ;;  %vm2353_vm6 = vweird.f32 %v5412_v51  ;;  %v2192_v43 = vpop.xlane.xlu2 %2191 }
 0x4b1   : > { %v3586_v16 = vclamps-f32 %v2790_v45, 1.0  ;;  %v2875_v37 = vmul.f32 2.1237322e-06, %v5459_v62  ;;  %v2886_v1 = vmul.f32 3.8918573e-05, %v5459_v62  ;;  %3798 = vrsqrt.f32 %v5470_v23 }
 0x4b2   : > { %v2852_v0 = vmul.f32 %v2851_v34, %v5406_v29  ;;  %v2841_v10 = vmul.f32 %v2840_v9, %v5406_v29  ;;  %v2913_v57 = vmul.f32 %v5479_v2, %v5479_v2  ;;  %v2350_v25 = vmul.f32 0.5, %v2349_v63 }
 0x4b3   : > { %v3120_v36 = vadd.f32 1.0, %v3586_v16  ;;  %v2876_v4 = vadd.f32 0.00028619796, %v2875_v37  ;;  %v2887_v41 = vadd.f32 0.001143296, %v2886_v1  ;;  %v2805_v61 = vmul.f32 %v2804_v24, %v5349_v13 }
 0x4b4   : > { %v2853_v48 = vadd.f32 0.4994258, %v2852_v0  ;;  %v2842_v56 = vadd.f32 0.18741608, %v2841_v10  ;;  %v2825_v8 = vand.u32 2147483647, %v5457_v28  ;;  %vm2354_vm7 = vweird.f32 %v5448_v5 }
 0x4b5   : > { %v3136_v47 = vmul.f32 %v3120_v36, %v2448_v30  ;;  %v2877_v6 = vmul.f32 %v2876_v4, %v5459_v62  ;;  %v2888_v11 = vmul.f32 %v2887_v41, %v5459_v62  ;;  %v5495_v50 = vmin.f32 %v2913_v57, 16.0  ;;  %vm2355_vm11 = vmor %vm2353_vm6, %vm2354_vm7 }
 0x4b6   : > { %v2854_v58 = vmul.f32 %v2853_v48, %v5406_v29  ;;  %v3797_v21 = vpop.eup %3796  ;;  %v2351_v17 = vsub.f32 1.5, %v2350_v25  ;;  %v2827_v26 = vand.u32 2147483648, %v5457_v28  ;;  %v2843_v13 = vmul.f32 %v2842_v56, %v5406_v29 }
 0x4b7   : > { %v3152_v54 = vadd.f32 %v3827_v40, %v3136_v47  ;;  %v2817_v39 = vmul.f32 %v3797_v21, %v5457_v28  ;;  %v2878_v3 = vadd.f32 0.0036580483, %v2877_v6  ;;  %v2889_v59 = vadd.f32 0.014752088, %v2888_v11  ;;  %v5503_v32 = vpop.eup %3798 }
 0x4b8   : > { %v5493_v20 = vadd.f32 1.0, %v2854_v58  ;;  %vm2822_vm8 = vweird.f32 %v3797_v21  ;;  %v2915_v18 = vmul.f32 2.1237322e-06, %v5495_v50  ;;  %v2926_v16 = vmul.f32 3.8918573e-05, %v5495_v50 }
 0x4b9   : > { %3168 = vst [vmem:[%s5212_s19 + $0x38] sm:$0xff] %v3152_v54  ;;  %v2818_v45 = vsub.f32 1.0, %v2817_v39  ;;  %v2879_v15 = vmul.f32 %v2878_v3, %v5459_v62  ;;  %v2890_v60 = vmul.f32 %v2889_v59, %v5459_v62  ;;  %v2352_v31 = vmul.f32 %v5448_v5, %v2351_v17 }
 0x4ba   : > { %3800 = vrcp.f32 %v5493_v20  ;;  %vm2821_vm9 = vweird.f32 %v5457_v28  ;;  %vm5509_vm10 = vcmp.eq.f32.partialorder %v2825_v8, 8.507059e+37  ;;  %v2916_v36 = vadd.f32 0.00028619796, %v2915_v18 }
 0x4bb   : > { %v2819_v49 = vmul.f32 %v3797_v21, %v2818_v45  ;;  %v2880_v29 = vadd.f32 0.05243302, %v2879_v15  ;;  %v2891_v53 = vadd.f32 0.112945676, %v2890_v60  ;;  %v2927_v7 = vadd.f32 0.001143296, %v2926_v16  ;;  %vm2823_vm12 = vmor %vm2821_vm9, %vm2822_vm8 }
 0x4bc   : > { %v2356_v9 = vsel %vm2355_vm11, %v5448_v5, %v2352_v31  ;;  %v2828_v34 = vor.u32 1.1754944e-38, %v2827_v26  ;;  %v2358_v47 = vmul.f32 %v5503_v32, %v5470_v23  ;;  %v2844_v10 = vadd.f32 1.1283791, %v2843_v13 }
 0x4bd   : > { %v2820_v30 = vadd.f32 %v3797_v21, %v2819_v49  ;;  %v2892_v52 = vmul.f32 %v2891_v53, %v5459_v62  ;;  %v2399_v28 = vmul.f32 %v2356_v9, %v4989_v12  ;;  %v2917_v51 = vmul.f32 %v2916_v36, %v5495_v50 }
 0x4be   : > { %v2928_v1 = vmul.f32 %v2927_v7, %v5495_v50  ;;  %v2865_v54 = vand.u32 2147483647, %v5493_v20  ;;  %v2881_v24 = vmul.f32 %v2880_v29, %v5459_v62  ;;  %v2867_v58 = vand.u32 2147483648, %v5493_v20  ;;  %v3828_v29 = vld [vmem:[%s4249_s14 + $0x40] sm:$0xff] }
 0x4bf   : > { %v2824_v37 = vsel %vm2823_vm12, %v3797_v21, %v2820_v30  ;;  %v2893_v48 = vadd.f32 0.4994258, %v2892_v52  ;;  %v2918_v4 = vadd.f32 0.0036580483, %v2917_v51  ;;  %v2418_v6 = vmul.f32 %v5423_v42, %v2399_v28 }
 0x4c0   : > { %v3801_v0 = vpop.eup %3800  ;;  %v2829_v5 = vsel %vm5509_vm10, %v2828_v34, %v2824_v37  ;;  %v2929_v41 = vadd.f32 0.014752088, %v2928_v1  ;;  %v2359_v21 = vmul.f32 %v5503_v32, %v2358_v47  ;;  %v2845_v26 = vmul.f32 %v2844_v10, %v5391_v44 }
 0x4c1   : > { %v2857_v40 = vmul.f32 %v3801_v0, %v5493_v20  ;;  %v2830_v12 = vmul.f32 %v2829_v5, %v2805_v61  ;;  %v2894_v11 = vmul.f32 %v2893_v48, %v5459_v62  ;;  %v2919_v57 = vmul.f32 %v2918_v4, %v5495_v50 }
 0x4c2   : > { %v2930_v25 = vmul.f32 %v2929_v41, %v5495_v50  ;;  %vm2862_vm13 = vweird.f32 %v3801_v0  ;;  %v2882_v61 = vadd.f32 0.18741608, %v2881_v24  ;;  %v5535_v8 = vadd.f32 %v5436_v19, %v2418_v6 }
 0x4c3   : > { %v2858_v63 = vsub.f32 1.0, %v2857_v40  ;;  %v3587_v56 = vclamps-f32 %v2830_v12, 1.0  ;;  %v5537_v59 = vadd.f32 1.0, %v2894_v11  ;;  %v2920_v17 = vadd.f32 0.05243302, %v2919_v57  ;;  %v2194_v12 = vpop.xlane.xlu0 %2193  ;;  %v3829_v57 = vld [vmem:[%s4249_s14 + $0x48] sm:$0xff] }
 0x4c4   : > { %v2931_v45 = vadd.f32 0.112945676, %v2930_v25  ;;  %vm2861_vm14 = vweird.f32 %v5493_v20  ;;  %v5542_v15 = vmul.f32 0.70710677, %v5535_v8  ;;  %v2868_v49 = vor.u32 1.1754944e-38, %v2867_v58 }
 0x4c5   : > { %v2859_v39 = vmul.f32 %v3801_v0, %v2858_v63  ;;  %v3121_v3 = vadd.f32 1.0, %v3587_v56  ;;  %vm2863_vm15 = vmor %vm2861_vm14, %vm2862_vm13  ;;  %3802 = vrcp.f32 %v5537_v59  ;;  %v2360_v18 = vmul.f32 0.5, %v2359_v21 }
 0x4c6   : > { %vm2866_vm0 = vcmp.eq.f32.partialorder %v2865_v54, 8.507059e+37  ;;  %v2883_v31 = vmul.f32 %v2882_v61, %v5459_v62  ;;  %v2932_v44 = vmul.f32 %v2931_v45, %v5495_v50  ;;  %v2921_v30 = vmul.f32 %v2920_v17, %v5495_v50 }
 0x4c7   : > { %v2860_v13 = vadd.f32 %v3801_v0, %v2859_v39  ;;  %v3137_v60 = vmul.f32 %v3121_v3, %v5476_v35  ;;  %v2953_v35 = vmul.f32 %v5542_v15, %v5542_v15  ;;  %v2450_v36 = vmul.f32 0.5, %v5383_v27 }
 0x4c8   : > { %v2933_v9 = vadd.f32 0.4994258, %v2932_v44  ;;  %v2361_v52 = vsub.f32 1.5, %v2360_v18  ;;  %vm2364_vm1 = vweird.f32 %v5503_v32  ;;  %v2209_v62 = vmul.f32 0.03125, %v2192_v43 }
 0x4c9   : > { %v2864_v16 = vsel %vm2863_vm15, %v3801_v0, %v2860_v13  ;;  %v3153_v20 = vadd.f32 %v3828_v29, %v3137_v60  ;;  %v5554_v34 = vmin.f32 %v2953_v35, 16.0  ;;  %v2884_v47 = vadd.f32 1.1283791, %v2883_v31 }
 0x4ca   : > { %v2869_v53 = vsel %vm2866_vm0, %v2868_v49, %v2864_v16  ;;  %v2934_v0 = vmul.f32 %v2933_v9, %v5495_v50  ;;  %vm2363_vm2 = vweird.f32 %v5470_v23  ;;  %v2922_v10 = vadd.f32 0.18741608, %v2921_v30 }
 0x4cb   : > { %v2870_v7 = vmul.f32 %v2869_v53, %v2845_v26  ;;  %3169 = vst [vmem:[%s5212_s19 + $0x40] sm:$0xff] %v3153_v20  ;;  %v3803_v37 = vpop.eup %3802  ;;  %v2955_v51 = vmul.f32 2.1237322e-06, %v5554_v34  ;;  %v2966_v27 = vmul.f32 3.8918573e-05, %v5554_v34  ;;  %v2362_v1 = vmul.f32 %v5503_v32, %v2361_v52  ;;  %vm2365_vm3 = vmor %vm2363_vm2, %vm2364_vm1 }
 0x4cc   : > { %v2897_v40 = vmul.f32 %v3803_v37, %v5537_v59  ;;  %v2905_v54 = vand.u32 2147483647, %v5537_v59  ;;  %v5564_v24 = vadd.f32 1e-05, %v2209_v62  ;;  %v5566_v48 = vadd.f32 1.0, %v2934_v0 }
 0x4cd   : > { %v3588_v28 = vclamps-f32 %v2870_v7, 1.0  ;;  %v2956_v23 = vadd.f32 0.00028619796, %v2955_v51  ;;  %v2967_v4 = vadd.f32 0.001143296, %v2966_v27  ;;  %v2366_v41 = vsel %vm2365_vm3, %v5503_v32, %v2362_v1 }
 0x4ce   : > { %v2898_v58 = vsub.f32 1.0, %v2897_v40  ;;  %v2907_v6 = vand.u32 2147483648, %v5537_v59  ;;  %v2400_v21 = vmul.f32 %v2366_v41, %v4995_v14  ;;  %vm2902_vm4 = vweird.f32 %v3803_v37 }
 0x4cf   : > { %v3122_v5 = vadd.f32 1.0, %v3588_v28  ;;  %v2923_v56 = vmul.f32 %v2922_v10, %v5495_v50  ;;  %3804 = vrcp.f32 %v5566_v48  ;;  %v2210_v11 = vmul.f32 0.03125, %v2194_v12 }
 0x4d0   : > { %v2899_v39 = vmul.f32 %v3803_v37, %v2898_v58  ;;  %v2957_v61 = vmul.f32 %v2956_v23, %v5554_v34  ;;  %v2968_v32 = vmul.f32 %v2967_v4, %v5554_v34  ;;  %v2885_v3 = vmul.f32 %v2884_v47, %v5445_v22 }
 0x4d1   : > { %v3138_v63 = vmul.f32 %v3122_v5, %v2450_v36  ;;  %vm2901_vm5 = vweird.f32 %v5537_v59  ;;  %v2419_v17 = vmul.f32 %v5423_v42, %v2400_v21  ;;  %3806 = vrsqrt.f32 %v5564_v24 }
 0x4d2   : > { %v2900_v14 = vadd.f32 %v3803_v37, %v2899_v39  ;;  %vm2906_vm6 = vcmp.eq.f32.partialorder %v2905_v54, 8.507059e+37  ;;  %v2958_v50 = vadd.f32 0.0036580483, %v2957_v61  ;;  %v2969_v45 = vadd.f32 0.014752088, %v2968_v32  ;;  %vm2903_vm7 = vmor %vm2901_vm5, %vm2902_vm4 }
 0x4d3   : > { %v3154_v25 = vadd.f32 %v3829_v57, %v3138_v63  ;;  %v2908_v26 = vor.u32 1.1754944e-38, %v2907_v6  ;;  %v2924_v13 = vadd.f32 1.1283791, %v2923_v56  ;;  %v5583_v60 = vadd.f32 %v5436_v19, %v2419_v17  ;;  %v3830_v56 = vld [vmem:[%s4249_s14 + $0x50] sm:$0xff] }
 0x4d4   : > { %v5585_v49 = vadd.f32 1e-05, %v2210_v11  ;;  %v2904_v22 = vsel %vm2903_vm7, %v3803_v37, %v2900_v14  ;;  %v2945_v59 = vand.u32 2147483647, %v5566_v48  ;;  %v2959_v18 = vmul.f32 %v2958_v50, %v5554_v34 }
 0x4d5   : > { %3170 = vst [vmem:[%s5212_s19 + $0x48] sm:$0xff] %v3154_v25  ;;  %v2970_v16 = vmul.f32 %v2969_v45, %v5554_v34  ;;  %v3805_v31 = vpop.eup %3804  ;;  %v2909_v44 = vsel %vm2906_vm6, %v2908_v26, %v2904_v22  ;;  %v2947_v43 = vand.u32 2147483648, %v5566_v48  ;;  %v5592_v29 = vmul.f32 0.70710677, %v5583_v60 }
 0x4d6   : > { %3808 = vrsqrt.f32 %v5585_v49  ;;  %v2910_v20 = vmul.f32 %v2909_v44, %v2885_v3  ;;  %v2937_v53 = vmul.f32 %v3805_v31, %v5566_v48  ;;  %v2451_v35 = vmul.f32 0.5, %v5439_v55 }
 0x4d7   : > { %v3807_v30 = vpop.eup %3806  ;;  %v2925_v36 = vmul.f32 %v2924_v13, %v5479_v2  ;;  %v2971_v7 = vadd.f32 0.112945676, %v2970_v16  ;;  %v2993_v9 = vmul.f32 %v5592_v29, %v5592_v29  ;;  %v2960_v28 = vadd.f32 0.05243302, %v2959_v18 }
 0x4d8   : > { %v3589_v52 = vclamps-f32 %v2910_v20, 1.0  ;;  %v2938_v62 = vsub.f32 1.0, %v2937_v53  ;;  %v2368_v47 = vmul.f32 %v3807_v30, %v5564_v24  ;;  %vm5601_vm8 = vcmp.eq.f32.partialorder %v2945_v59, 8.507059e+37 }
 0x4d9   : > { %v2948_v37 = vor.u32 1.1754944e-38, %v2947_v43  ;;  %v2972_v10 = vmul.f32 %v2971_v7, %v5554_v34  ;;  %v5606_v51 = vmin.f32 %v2993_v9, 16.0  ;;  %vm2942_vm9 = vweird.f32 %v3805_v31 }
 0x4da   : > { %v3123_v55 = vadd.f32 1.0, %v3589_v52  ;;  %v2939_v2 = vmul.f32 %v3805_v31, %v2938_v62  ;;  %v2369_v27 = vmul.f32 %v3807_v30, %v2368_v47  ;;  %vm2941_vm10 = vweird.f32 %v5566_v48 }
 0x4db   : > { %v2973_v5 = vadd.f32 0.4994258, %v2972_v10  ;;  %v2995_v40 = vmul.f32 2.1237322e-06, %v5606_v51  ;;  %v3006_v54 = vmul.f32 3.8918573e-05, %v5606_v51  ;;  %v2961_v4 = vmul.f32 %v2960_v28, %v5554_v34  ;;  %vm2943_vm11 = vmor %vm2941_vm10, %vm2942_vm9 }
 0x4dc   : > { %v3809_v1 = vpop.eup %3808  ;;  %v3139_v12 = vmul.f32 %v3123_v55, %v2451_v35  ;;  %v2940_v23 = vadd.f32 %v3805_v31, %v2939_v2  ;;  %v2370_v41 = vmul.f32 0.5, %v2369_v27  ;;  %vm2374_vm12 = vweird.f32 %v3807_v30 }
 0x4dd   : > { %v2974_v63 = vmul.f32 %v2973_v5, %v5554_v34  ;;  %v2996_v58 = vadd.f32 0.00028619796, %v2995_v40  ;;  %v3007_v6 = vadd.f32 0.001143296, %v3006_v54  ;;  %v2378_v21 = vmul.f32 %v3809_v1, %v5585_v49 }
 0x4de   : > { %v3155_v48 = vadd.f32 %v3830_v56, %v3139_v12  ;;  %v2944_v11 = vsel %vm2943_vm11, %v3805_v31, %v2940_v23  ;;  %v2371_v57 = vsub.f32 1.5, %v2370_v41  ;;  %vm2373_vm13 = vweird.f32 %v5564_v24 }
 0x4df   : > { %v2949_v25 = vsel %vm5601_vm8, %v2948_v37, %v2944_v11  ;;  %v5617_v39 = vadd.f32 1.0, %v2974_v63  ;;  %v2997_v61 = vmul.f32 %v2996_v58, %v5606_v51  ;;  %v3008_v32 = vmul.f32 %v3007_v6, %v5606_v51  ;;  %vm2375_vm14 = vmor %vm2373_vm13, %vm2374_vm12 }
 0x4e0   : > { %3171 = vst [vmem:[%s5212_s19 + $0x50] sm:$0xff] %v3155_v48  ;;  %v2950_v3 = vmul.f32 %v2949_v25, %v2925_v36  ;;  %v2372_v17 = vmul.f32 %v3807_v30, %v2371_v57  ;;  %v2379_v14 = vmul.f32 %v3809_v1, %v2378_v21  ;;  %v2962_v22 = vadd.f32 0.18741608, %v2961_v4 }
 0x4e1   : > { %3810 = vrcp.f32 %v5617_v39  ;;  %v2998_v45 = vadd.f32 0.0036580483, %v2997_v61  ;;  %v3009_v26 = vadd.f32 0.014752088, %v3008_v32  ;;  %v2452_v16 = vmul.f32 0.5, %v5464_v33  ;;  %v3831_v33 = vld [vmem:[%s4249_s14 + $0x58] sm:$0xff] }
 0x4e2   : > { %v3590_v50 = vclamps-f32 %v2950_v3, 1.0  ;;  %v2376_v13 = vsel %vm2375_vm14, %v3807_v30, %v2372_v17  ;;  %v2380_v18 = vmul.f32 0.5, %v2379_v14  ;;  %vm2384_vm15 = vweird.f32 %v3809_v1 }
 0x4e3   : > { %v2401_v59 = vmul.f32 %v2376_v13, %v5001_v38  ;;  %v3010_v44 = vmul.f32 %v3009_v26, %v5606_v51  ;;  %v2999_v53 = vmul.f32 %v2998_v45, %v5606_v51  ;;  %v2963_v36 = vmul.f32 %v2962_v22, %v5554_v34 }
 0x4e4   : > { %v3124_v31 = vadd.f32 1.0, %v3590_v50  ;;  %v2381_v43 = vsub.f32 1.5, %v2380_v18  ;;  %vm2383_vm0 = vweird.f32 %v5585_v49  ;;  %v2987_v55 = vand.u32 2147483648, %v5617_v39 }
 0x4e5   : > { %v2420_v24 = vmul.f32 %v5423_v42, %v2401_v59  ;;  %v3011_v35 = vadd.f32 0.112945676, %v3010_v44  ;;  %vm2385_vm1 = vmor %vm2383_vm0, %vm2384_vm15  ;;  %v3000_v34 = vadd.f32 0.05243302, %v2999_v53  ;;  %v2964_v10 = vadd.f32 1.1283791, %v2963_v36 }
 0x4e6   : > { %v3140_v20 = vmul.f32 %v3124_v31, %v2452_v16  ;;  %v2382_v7 = vmul.f32 %v3809_v1, %v2381_v43  ;;  %v2985_v5 = vand.u32 2147483647, %v5617_v39  ;;  %vm2981_vm3 = vweird.f32 %v5617_v39 }
 0x4e7   : > { %v3811_v30 = vpop.eup %3810  ;;  %v5631_v38 = vadd.f32 %v5436_v19, %v2420_v24  ;;  %v3012_v62 = vmul.f32 %v3011_v35, %v5606_v51  ;;  %v2988_v4 = vor.u32 1.1754944e-38, %v2987_v55  ;;  %v2453_v3 = vmul.f32 0.5, %v5535_v8  ;;  %v3832_v24 = vld [vmem:[%s4249_s14 + $0x60] sm:$0xff] }
 0x4e8   : > { %v3156_v9 = vadd.f32 %v3831_v33, %v3140_v20  ;;  %v2977_v52 = vmul.f32 %v3811_v30, %v5617_v39  ;;  %v2386_v47 = vsel %vm2385_vm1, %v3809_v1, %v2382_v7  ;;  %vm2982_vm2 = vweird.f32 %v3811_v30 }
 0x4e9   : > { %v5638_v28 = vmul.f32 0.70710677, %v5631_v38  ;;  %v2402_v37 = vmul.f32 %v2386_v47, %v5013_v46  ;;  %v3013_v49 = vadd.f32 0.4994258, %v3012_v62  ;;  %v3001_v46 = vmul.f32 %v3000_v34, %v5606_v51  ;;  %vm2983_vm4 = vmor %vm2981_vm3, %vm2982_vm2 }
 0x4ea   : > { %3172 = vst [vmem:[%s5212_s19 + $0x58] sm:$0xff] %v3156_v9  ;;  %v2978_v0 = vsub.f32 1.0, %v2977_v52  ;;  %vm2986_vm5 = vcmp.eq.f32.partialorder %v2985_v5, 8.507059e+37 }
 0x4eb   : > { %v3033_v2 = vmul.f32 %v5638_v28, %v5638_v28  ;;  %v2421_v40 = vmul.f32 %v5423_v42, %v2402_v37  ;;  %v3014_v1 = vmul.f32 %v3013_v49, %v5606_v51  ;;  %v2965_v42 = vmul.f32 %v2964_v10, %v5542_v15 }
 0x4ec   : > { %v2979_v27 = vmul.f32 %v3811_v30, %v2978_v0  ;;  %v3002_v11 = vadd.f32 0.18741608, %v3001_v46 }
 0x4ed   : > { %v5648_v54 = vmin.f32 %v3033_v2, 16.0  ;;  %v5653_v23 = vadd.f32 %v5436_v19, %v2421_v40  ;;  %v3015_v41 = vadd.f32 1.0, %v3014_v1 }
 0x4ee   : > { %v2980_v12 = vadd.f32 %v3811_v30, %v2979_v27  ;;  %v3003_v14 = vmul.f32 %v3002_v11, %v5606_v51  ;;  %v3833_v11 = vld [vmem:[%s4249_s14 + $0x68] sm:$0xff] }
 0x4ef   : > { %v3035_v63 = vmul.f32 2.1237322e-06, %v5648_v54  ;;  %v3046_v58 = vmul.f32 3.8918573e-05, %v5648_v54  ;;  %v5659_v21 = vmul.f32 0.70710677, %v5653_v23  ;;  %3812 = vrcp.f32 %v3015_v41 }
 0x4f0   : > { %v2984_v6 = vsel %vm2983_vm4, %v3811_v30, %v2980_v12  ;;  %v3004_v8 = vadd.f32 1.1283791, %v3003_v14  ;;  %v3027_v53 = vand.u32 2147483648, %v3015_v41  ;;  %v3025_v7 = vand.u32 2147483647, %v3015_v41 }
 0x4f1   : > { %v2989_v56 = vsel %vm2986_vm5, %v2988_v4, %v2984_v6  ;;  %v3036_v19 = vadd.f32 0.00028619796, %v3035_v63  ;;  %v3047_v57 = vadd.f32 0.001143296, %v3046_v58  ;;  %v3073_v25 = vmul.f32 %v5659_v21, %v5659_v21 }
 0x4f2   : > { %v2990_v48 = vmul.f32 %v2989_v56, %v2965_v42  ;;  %vm3021_vm7 = vweird.f32 %v3015_v41  ;;  %v3028_v47 = vor.u32 1.1754944e-38, %v3027_v53  ;;  %v3005_v10 = vmul.f32 %v3004_v8, %v5592_v29 }
 0x4f3   : > { %v3037_v61 = vmul.f32 %v3036_v19, %v5648_v54  ;;  %v3048_v15 = vmul.f32 %v3047_v57, %v5648_v54  ;;  %v5665_v32 = vmin.f32 %v3073_v25, 16.0  ;;  %vm3026_vm9 = vcmp.eq.f32.partialorder %v3025_v7, 8.507059e+37 }
 0x4f4   : > { %v3591_v39 = vclamps-f32 %v2990_v48, 1.0  ;;  %v2454_v29 = vmul.f32 0.5, %v5583_v60 }
 0x4f5   : > { %v3049_v50 = vadd.f32 0.014752088, %v3048_v15  ;;  %v3813_v45 = vpop.eup %3812  ;;  %v3075_v26 = vmul.f32 2.1237322e-06, %v5665_v32  ;;  %v3086_v13 = vmul.f32 3.8918573e-05, %v5665_v32 }
 0x4f6   : > { %v3125_v17 = vadd.f32 1.0, %v3591_v39  ;;  %v3017_v59 = vmul.f32 %v3813_v45, %v3015_v41  ;;  %v3038_v18 = vadd.f32 0.0036580483, %v3037_v61  ;;  %vm3022_vm6 = vweird.f32 %v3813_v45 }
 0x4f7   : > { %v3050_v16 = vmul.f32 %v3049_v50, %v5648_v54  ;;  %v3076_v31 = vadd.f32 0.00028619796, %v3075_v26  ;;  %v3087_v44 = vadd.f32 0.001143296, %v3086_v13  ;;  %vm3023_vm8 = vmor %vm3021_vm7, %vm3022_vm6 }
 0x4f8   : > { %v3141_v22 = vmul.f32 %v3125_v17, %v2453_v3  ;;  %v3018_v20 = vsub.f32 1.0, %v3017_v59  ;;  %v3039_v33 = vmul.f32 %v3038_v18, %v5648_v54 }
 0x4f9   : > { %v3051_v51 = vadd.f32 0.112945676, %v3050_v16  ;;  %v3077_v35 = vmul.f32 %v3076_v31, %v5665_v32  ;;  %v3088_v30 = vmul.f32 %v3087_v44, %v5665_v32 }
 0x4fa   : > { %v3157_v43 = vadd.f32 %v3832_v24, %v3141_v22  ;;  %v3019_v36 = vmul.f32 %v3813_v45, %v3018_v20  ;;  %v3040_v49 = vadd.f32 0.05243302, %v3039_v33 }
 0x4fb   : > { %v3052_v9 = vmul.f32 %v3051_v51, %v5648_v54  ;;  %v3089_v52 = vadd.f32 0.014752088, %v3088_v30  ;;  %v3078_v34 = vadd.f32 0.0036580483, %v3077_v35 }
 0x4fc   : > { %3173 = vst [vmem:[%s5212_s19 + $0x60] sm:$0xff] %v3157_v43  ;;  %v3020_v62 = vadd.f32 %v3813_v45, %v3019_v36  ;;  %v3041_v41 = vmul.f32 %v3040_v49, %v5648_v54 }
 0x4fd   : > { %v3053_v0 = vadd.f32 0.4994258, %v3052_v9  ;;  %v3090_v37 = vmul.f32 %v3089_v52, %v5665_v32  ;;  %v3079_v12 = vmul.f32 %v3078_v34, %v5665_v32  ;;  %v2456_v34 = vmul.f32 0.5, %v5653_v23 }
 0x4fe   : > { %v3024_v55 = vsel %vm3023_vm8, %v3813_v45, %v3020_v62  ;;  %v3042_v56 = vadd.f32 0.18741608, %v3041_v41  ;;  %v3834_v62 = vld [vmem:[%s4249_s14 + $0x70] sm:$0xff] }
 0x4ff   : > { %v3029_v2 = vsel %vm3026_vm9, %v3028_v47, %v3024_v55  ;;  %v3054_v27 = vmul.f32 %v3053_v0, %v5648_v54  ;;  %v3091_v5 = vadd.f32 0.112945676, %v3090_v37  ;;  %v3080_v42 = vadd.f32 0.05243302, %v3079_v12 }
 0x500   : > { %v3030_v40 = vmul.f32 %v3029_v2, %v3005_v10  ;;  %v3043_v61 = vmul.f32 %v3042_v56, %v5648_v54  ;;  %v3835_v10 = vld [vmem:[%s4249_s14 + $0x78] sm:$0xff] }
 0x501   : > { %v3055_v1 = vadd.f32 1.0, %v3054_v27  ;;  %v3092_v46 = vmul.f32 %v3091_v5, %v5665_v32  ;;  %v3081_v39 = vmul.f32 %v3080_v42, %v5665_v32 }
 0x502   : > { %v3592_v4 = vclamps-f32 %v3030_v40, 1.0  ;;  %v3044_v14 = vadd.f32 1.1283791, %v3043_v61 }
 0x503   : > { %3814 = vrcp.f32 %v3055_v1  ;;  %v3093_v58 = vadd.f32 0.4994258, %v3092_v46  ;;  %v3067_v60 = vand.u32 2147483648, %v3055_v1  ;;  %v3082_v17 = vadd.f32 0.18741608, %v3081_v39 }
 0x504   : > { %v3126_v63 = vadd.f32 1.0, %v3592_v4  ;;  %v3065_v45 = vand.u32 2147483647, %v3055_v1  ;;  %vm3061_vm11 = vweird.f32 %v3055_v1  ;;  %v3045_v16 = vmul.f32 %v3044_v14, %v5638_v28 }
 0x505   : > { %v3094_v48 = vmul.f32 %v3093_v58, %v5665_v32  ;;  %v3068_v22 = vor.u32 1.1754944e-38, %v3067_v60  ;;  %v3083_v59 = vmul.f32 %v3082_v17, %v5665_v32  ;;  %v2455_v32 = vmul.f32 0.5, %v5631_v38 }
 0x506   : > { %v3142_v6 = vmul.f32 %v3126_v63, %v2454_v29  ;;  %vm3066_vm13 = vcmp.eq.f32.partialorder %v3065_v45, 8.507059e+37 }
 0x507   : > { %v3095_v57 = vadd.f32 1.0, %v3094_v48  ;;  %v3084_v8 = vadd.f32 1.1283791, %v3083_v59 }
 0x508   : > { %v3158_v19 = vadd.f32 %v3833_v11, %v3142_v6 }
 0x509   : > { %v3815_v25 = vpop.eup %3814  ;;  %3816 = vrcp.f32 %v3095_v57  ;;  %v3107_v43 = vand.u32 2147483648, %v3095_v57  ;;  %v3105_v53 = vand.u32 2147483647, %v3095_v57  ;;  %vm3101_vm15 = vweird.f32 %v3095_v57 }
 0x50a   : > { %3174 = vst [vmem:[%s5212_s19 + $0x68] sm:$0xff] %v3158_v19  ;;  %v3057_v15 = vmul.f32 %v3815_v25, %v3055_v1  ;;  %vm3062_vm10 = vweird.f32 %v3815_v25  ;;  %v3085_v36 = vmul.f32 %v3084_v8, %v5659_v21 }
 0x50b   : > { %vm3063_vm12 = vmor %vm3061_vm11, %vm3062_vm10  ;;  %v3108_v28 = vor.u32 1.1754944e-38, %v3107_v43  ;;  %vm3106_vm1 = vcmp.eq.f32.partialorder %v3105_v53, 8.507059e+37 }
 0x50c   : > { %v3058_v3 = vsub.f32 1.0, %v3057_v15 }
 0x50e   : > { %v3059_v50 = vmul.f32 %v3815_v25, %v3058_v3 }
 0x50f   : > { %v3817_v26 = vpop.eup %3816 }
 0x510   : > { %v3060_v13 = vadd.f32 %v3815_v25, %v3059_v50  ;;  %v3097_v18 = vmul.f32 %v3817_v26, %v3095_v57  ;;  %vm3102_vm14 = vweird.f32 %v3817_v26 }
 0x511   : > { %vm3103_vm0 = vmor %vm3101_vm15, %vm3102_vm14 }
 0x512   : > { %v3064_v54 = vsel %vm3063_vm12, %v3815_v25, %v3060_v13  ;;  %v3098_v44 = vsub.f32 1.0, %v3097_v18 }
 0x513   : > { %v3069_v31 = vsel %vm3066_vm13, %v3068_v22, %v3064_v54 }
 0x514   : > { %v3070_v24 = vmul.f32 %v3069_v31, %v3045_v16  ;;  %v3099_v20 = vmul.f32 %v3817_v26, %v3098_v44 }
 0x516   : > { %v3593_v51 = vclamps-f32 %v3070_v24, 1.0  ;;  %v3100_v35 = vadd.f32 %v3817_v26, %v3099_v20 }
 0x518   : > { %v3127_v30 = vadd.f32 1.0, %v3593_v51  ;;  %v3104_v7 = vsel %vm3103_vm0, %v3817_v26, %v3100_v35 }
 0x519   : > { %v3109_v9 = vsel %vm3106_vm1, %v3108_v28, %v3104_v7 }
 0x51a   : > { %v3143_v33 = vmul.f32 %v3127_v30, %v2455_v32  ;;  %v3110_v52 = vmul.f32 %v3109_v9, %v3085_v36 }
 0x51c   : > { %v3159_v47 = vadd.f32 %v3834_v62, %v3143_v33  ;;  %v3594_v0 = vclamps-f32 %v3110_v52, 1.0 }
 0x51e   : > { %3175 = vst [vmem:[%s5212_s19 + $0x70] sm:$0xff] %v3159_v47  ;;  %v3128_v37 = vadd.f32 1.0, %v3594_v0 }
 0x520   : > { %v3144_v38 = vmul.f32 %v3128_v37, %v2456_v34 }
 0x522   : > { %v3160_v55 = vadd.f32 %v3835_v10, %v3144_v38 }
 0x524   : > { %3176 = vst [vmem:[%s5212_s19 + $0x78] sm:$0xff] %v3160_v55 }
 0x525 PF: > { %s21_s17 = sadd.s32 1, %s3842_s17  }
 0x526   : > { %p18_p4 = scmp.ge.s32.totalorder %s21_s17, 4  }
 0x528   :  { %20 = sbr.rel (!%p18_p4) target bundleno = 1 (0x1), region = 97 }

</bundles_post_ra>
